<compile_context>
chip_gen: v7x
topology: tpu7x:2x2x1
jax: 0.10.0
libtpu: 0.0.40
codegen_flags: <defaults>
</compile_context>

<pallas_src>
import math
import functools

import jax
import jax.numpy as jnp
from jax.experimental import pallas as pl
from jax.experimental.pallas import tpu as pltpu


# ----------------------------------------------------------------------------
# helpers
# ----------------------------------------------------------------------------
def _layernorm(x, g, b, eps=1e-5):
    mu = jnp.mean(x, axis=-1, keepdims=True)
    var = jnp.mean((x - mu) ** 2, axis=-1, keepdims=True)
    return (x - mu) * jax.lax.rsqrt(var + eps) * g + b


def _pick_batch_block(bz, T, target_rows=128):
    """Largest divisor of bz (capped) so that Bb*T >= target_rows if possible."""
    want = max(1, -(-target_rows // T))          # ceil(target_rows / T)
    for bb in range(min(want, bz), 0, -1):
        if bz % bb == 0:
            return bb
    return 1


# ----------------------------------------------------------------------------
# Pallas kernel: one grid step == (one batch block, one transformer layer).
# ----------------------------------------------------------------------------
def gpt_kernel(tok_ref, pos_ref, vel_ref,
               ln1g_ref, ln1b_ref,
               wq_ref, bq_ref, wk_ref, bk_ref, wv_ref, bv_ref,
               wp_ref, bp_ref,
               ln2g_ref, ln2b_ref,
               w1_ref, b1_ref, w2_ref, b2_ref,
               lnfg_ref, lnfb_ref,
               out_ref,
               x_ref,                       # VMEM scratch: (Bb*T, C) f32 carry
               *, n_head, batch_block, tokens_per_seq):
    l = pl.program_id(1)
    n_layers = pl.num_programs(1)

    Bb = batch_block
    T = tokens_per_seq
    C = x_ref.shape[-1]
    M = Bb * T
    hd = C // n_head
    scale = 1.0 / math.sqrt(hd)
    mm_dtype = wq_ref.dtype                  # f32 or bf16 (MXU-only dtype)

    # ------- layer 0: x = drop(pos_emb + token_embeddings + vel_emb) --------
    @pl.when(l == 0)
    def _init():
        xs = tok_ref[...] + pos_ref[...] + vel_ref[...]     # (Bb,T,C)+(1,T,C)+(Bb,1,C)
        x_ref[...] = xs.reshape(M, C)

    x = x_ref[...]                                          # (M, C) f32

    # ------------------- attention: x = x + proj(attn(ln1(x))) --------------
    xn = _layernorm(x, ln1g_ref[...], ln1b_ref[...])
    xn_m = xn.astype(mm_dtype)
    q = jnp.dot(xn_m, wq_ref[...], preferred_element_type=jnp.float32) + bq_ref[...]
    k = jnp.dot(xn_m, wk_ref[...], preferred_element_type=jnp.float32) + bk_ref[...]
    v = jnp.dot(xn_m, wv_ref[...], preferred_element_type=jnp.float32) + bv_ref[...]

    # head-batched attention: (Bb*H, T, hd) built from static (sublane, lane)
    # slices, then ONE batched dot_general per einsum (no per-head matmul loop,
    # no per-head concatenate of outputs).
    def split_heads(z):
        return jnp.stack(
            [z[b * T:(b + 1) * T, h * hd:(h + 1) * hd]
             for b in range(Bb) for h in range(n_head)], axis=0)

    qh = split_heads(q).astype(mm_dtype)
    kh = split_heads(k).astype(mm_dtype)
    vh = split_heads(v).astype(mm_dtype)

    att = jnp.einsum('bqd,bkd->bqk', qh, kh,
                     preferred_element_type=jnp.float32) * scale    # (Bb*H, T, T) f32
    att = att - jnp.max(att, axis=-1, keepdims=True)
    att = jnp.exp(att)
    denom = jnp.sum(att, axis=-1, keepdims=True)
    att = att * pl.reciprocal(denom, approx=True)                   # EUP, not VPU div

    yh = jnp.einsum('bqk,bkd->bqd', att.astype(mm_dtype), vh,
                    preferred_element_type=jnp.float32)             # (Bb*H, T, hd)

    # reassemble heads -> (M, C): lane-concat heads per batch, row-concat batches
    y = jnp.concatenate(
        [jnp.concatenate([yh[b * n_head + h] for h in range(n_head)], axis=-1)
         for b in range(Bb)], axis=0)                               # (M, C)

    y = jnp.dot(y.astype(mm_dtype), wp_ref[...],
                preferred_element_type=jnp.float32) + bp_ref[...]
    x = x + y

    # ----------------------- MLP: x = x + mlp(ln2(x)) -----------------------
    xn2 = _layernorm(x, ln2g_ref[...], ln2b_ref[...])
    h1 = jnp.dot(xn2.astype(mm_dtype), w1_ref[...],
                 preferred_element_type=jnp.float32) + b1_ref[...]
    h1 = jnp.maximum(h1, 0.0)                                       # ReLU (f32, VPU)
    x = x + (jnp.dot(h1.astype(mm_dtype), w2_ref[...],
                     preferred_element_type=jnp.float32) + b2_ref[...])

    x_ref[...] = x

    # ------------------------ last layer: final LayerNorm -------------------
    @pl.when(l == n_layers - 1)
    def _final():
        xf = _layernorm(x, lnfg_ref[...], lnfb_ref[...])
        out_ref[...] = xf.reshape(Bb, T, C).astype(out_ref.dtype)


# ----------------------------------------------------------------------------
# Parameter init (deterministic, mirrors GPT._init_weights):
#   Linear.weight ~ N(0, 0.02), Linear.bias = 0, LayerNorm: weight=1, bias=0,
#   pos_emb = zeros.  Linear weights stored as (in, out) so the kernel does x@W+b.
#   Matmul weights may be stored in bf16 (MXU input dtype); everything else f32.
# ----------------------------------------------------------------------------
def init_params(key, *, n_embd, n_head, block_exp, n_layer, T,
                matmul_dtype=jnp.float32):
    C, L, Hff = n_embd, n_layer, block_exp * n_embd
    ks = jax.random.split(key, 8)

    def nrm(k, shape, dt=jnp.float32):
        return (0.02 * jax.random.normal(k, shape, jnp.float32)).astype(dt)

    zeros = lambda shape: jnp.zeros(shape, jnp.float32)
    ones = lambda shape: jnp.ones(shape, jnp.float32)
    return dict(
        pos_emb=zeros((1, T, C)),
        vel_w=nrm(ks[0], (1, C)), vel_b=zeros((C,)),
        ln1g=ones((L, 1, C)), ln1b=zeros((L, 1, C)),
        wq=nrm(ks[1], (L, C, C), matmul_dtype), bq=zeros((L, 1, C)),
        wk=nrm(ks[2], (L, C, C), matmul_dtype), bk=zeros((L, 1, C)),
        wv=nrm(ks[3], (L, C, C), matmul_dtype), bv=zeros((L, 1, C)),
        wp=nrm(ks[4], (L, C, C), matmul_dtype), bp=zeros((L, 1, C)),
        ln2g=ones((L, 1, C)), ln2b=zeros((L, 1, C)),
        w1=nrm(ks[5], (L, C, Hff), matmul_dtype), b1=zeros((L, 1, Hff)),
        w2=nrm(ks[6], (L, Hff, C), matmul_dtype), b2=zeros((L, 1, C)),
        lnfg=ones((1, C)), lnfb=zeros((1, C)),
    )


# ----------------------------------------------------------------------------
# Wrapper: NCHW glue + pallas_call.
# ----------------------------------------------------------------------------
def gpt_forward(image_tensor, sdc_tensor, velocity, params, *,
                n_views, seq_len, vert_anchors, horz_anchors,
                n_embd, n_head, n_layer,
                batch_block=None,
                vmem_limit_bytes=48 * 1024 * 1024):
    C = n_embd
    bz = sdc_tensor.shape[0] // seq_len
    h, w = sdc_tensor.shape[2], sdc_tensor.shape[3]
    T = (n_views + 1) * seq_len * vert_anchors * horz_anchors

    # ---- build token embeddings exactly like the torch forward -------------
    img = image_tensor.reshape(bz, n_views * seq_len, C, h, w)
    sdc = sdc_tensor.reshape(bz, seq_len, C, h, w)
    tok = jnp.concatenate([img, sdc], axis=1)                      # (B, T', C, H, W)
    tok = jnp.transpose(tok, (0, 1, 3, 4, 2)).reshape(bz, T, C)    # (B, T, C)

    # velocity embedding: Linear(1, C) applied to velocity.unsqueeze(1)
    vel = velocity[:, None] @ params["vel_w"] + params["vel_b"]    # (B, C)
    vel = vel[:, None, :]                                          # (B, 1, C)

    # ---- grid: (batch blocks [parallel], layers [arbitrary carry]) ----------
    if batch_block is None:
        # Fill the MXU: aim for Bb*T >= 128 rows per step.  NOTE(v7x): with very
        # small bz you may prefer a smaller batch_block so >=2 parallel grid steps
        # exist for the 2 TensorCores.
        batch_block = _pick_batch_block(bz, T)
    assert bz % batch_block == 0, "batch_block must divide the batch size"
    Bb = batch_block
    nb = bz // Bb
    grid = (nb, n_layer)
    Hff = params["w1"].shape[-1]

    # layer-invariant inputs (loaded once per batch block)
    tok_spec = pl.BlockSpec((Bb, T, C), lambda b, l: (b, 0, 0))
    pos_spec = pl.BlockSpec((1, T, C), lambda b, l: (0, 0, 0))
    vel_spec = pl.BlockSpec((Bb, 1, C), lambda b, l: (b, 0, 0))

    # per-layer streamed weights: only layer l (x2 pipeline buffers) in VMEM
    def lspec(trailing):
        return pl.BlockSpec((None,) + trailing,
                            lambda b, l, _n=len(trailing): (l,) + (0,) * _n)

    layer_specs = [
        lspec((1, C)),    # ln1g
        lspec((1, C)),    # ln1b
        lspec((C, C)),    # wq
        lspec((1, C)),    # bq
        lspec((C, C)),    # wk
        lspec((1, C)),    # bk
        lspec((C, C)),    # wv
        lspec((1, C)),    # bv
        lspec((C, C)),    # wp
        lspec((1, C)),    # bp
        lspec((1, C)),    # ln2g
        lspec((1, C)),    # ln2b
        lspec((C, Hff)),  # w1
        lspec((1, Hff)),  # b1
        lspec((Hff, C)),  # w2
        lspec((1, C)),    # b2
    ]
    lnf_spec = pl.BlockSpec((1, C), lambda b, l: (0, 0))

    weight_order = ["ln1g", "ln1b", "wq", "bq", "wk", "bk", "wv", "bv",
                    "wp", "bp", "ln2g", "ln2b", "w1", "b1", "w2", "b2"]
    weight_args = [params[k] for k in weight_order]

    kernel = functools.partial(gpt_kernel, n_head=n_head,
                               batch_block=Bb, tokens_per_seq=T)

    out = pl.pallas_call(
        kernel,
        out_shape=jax.ShapeDtypeStruct((bz, T, C), jnp.float32),
        grid=grid,
        in_specs=[tok_spec, pos_spec, vel_spec] + layer_specs + [lnf_spec, lnf_spec],
        out_specs=pl.BlockSpec((Bb, T, C), lambda b, l: (b, 0, 0)),
        scratch_shapes=[pltpu.VMEM((Bb * T, C), jnp.float32)],
        compiler_params=pltpu.CompilerParams(
            dimension_semantics=("parallel", "arbitrary"),
            vmem_limit_bytes=vmem_limit_bytes),
    )(tok, params["pos_emb"], vel, *weight_args, params["lnfg"], params["lnfb"])

    # ---- reshape back to the torch output convention ------------------------
    x = out.reshape(bz, (n_views + 1) * seq_len, vert_anchors, horz_anchors, C)
    x = jnp.transpose(x, (0, 1, 4, 2, 3))                          # (B, T', C, H, W)
    image_out = x[:, :n_views * seq_len].reshape(bz * n_views * seq_len, C, h, w)
    sdc_out = x[:, n_views * seq_len:].reshape(bz * seq_len, C, h, w)
    return image_out, sdc_out


# ----------------------------------------------------------------------------
if __name__ == "__main__":
    # small config
    n_embd, n_head, block_exp, n_layer = 32, 4, 4, 2
    vert_anchors, horz_anchors, seq_len, n_views = 4, 4, 2, 1
    bz = 2
    T = (n_views + 1) * seq_len * vert_anchors * horz_anchors      # 64

    # MXU input dtype for the weights/matmuls.  jnp.bfloat16 is recommended on
    # v6e/v7x (halves weight DMA + VMEM, ~2x MXU); LN/softmax/ReLU stay f32 either
    # way.  f32 keeps exact parity with the PyTorch reference.
    MATMUL_DTYPE = jnp.float32

    key = jax.random.PRNGKey(0)
    k_img, k_sdc, k_vel, k_par = jax.random.split(key, 4)

    image_tensor = jax.random.normal(
        k_img, (bz * n_views * seq_len, n_embd, vert_anchors, horz_anchors),
        jnp.float32)
    sdc_tensor = jax.random.normal(
        k_sdc, (bz * seq_len, n_embd, vert_anchors, horz_anchors), jnp.float32)
    velocity = jax.random.normal(k_vel, (bz,), jnp.float32)

    params = init_params(k_par, n_embd=n_embd, n_head=n_head,
                         block_exp=block_exp, n_layer=n_layer, T=T,
                         matmul_dtype=MATMUL_DTYPE)

    img_out, sdc_out = gpt_forward(
        image_tensor, sdc_tensor, velocity, params,
        n_views=n_views, seq_len=seq_len,
        vert_anchors=vert_anchors, horz_anchors=horz_anchors,
        n_embd=n_embd, n_head=n_head, n_layer=n_layer)

    jax.block_until_ready((img_out, sdc_out))
    assert img_out.shape == (bz * n_views * seq_len, n_embd, vert_anchors, horz_anchors)
    assert sdc_out.shape == (bz * seq_len, n_embd, vert_anchors, horz_anchors)
    print("KERNEL_OK")
</pallas_src>

<mosaic_0001>
module attributes {stable_mosaic.version = 11 : i64} {
  func.func @gpt_kernel(%arg0: i32, %arg1: i32, %arg2: memref<2x64x32xf32, #tpu.memory_space<vmem>>, %arg3: memref<1x64x32xf32, #tpu.memory_space<vmem>>, %arg4: memref<2x1x32xf32, #tpu.memory_space<vmem>>, %arg5: memref<1x1x32xf32, #tpu.memory_space<vmem>>, %arg6: memref<1x1x32xf32, #tpu.memory_space<vmem>>, %arg7: memref<1x32x32xf32, #tpu.memory_space<vmem>>, %arg8: memref<1x1x32xf32, #tpu.memory_space<vmem>>, %arg9: memref<1x32x32xf32, #tpu.memory_space<vmem>>, %arg10: memref<1x1x32xf32, #tpu.memory_space<vmem>>, %arg11: memref<1x32x32xf32, #tpu.memory_space<vmem>>, %arg12: memref<1x1x32xf32, #tpu.memory_space<vmem>>, %arg13: memref<1x32x32xf32, #tpu.memory_space<vmem>>, %arg14: memref<1x1x32xf32, #tpu.memory_space<vmem>>, %arg15: memref<1x1x32xf32, #tpu.memory_space<vmem>>, %arg16: memref<1x1x32xf32, #tpu.memory_space<vmem>>, %arg17: memref<1x32x128xf32, #tpu.memory_space<vmem>>, %arg18: memref<1x1x128xf32, #tpu.memory_space<vmem>>, %arg19: memref<1x128x32xf32, #tpu.memory_space<vmem>>, %arg20: memref<1x1x32xf32, #tpu.memory_space<vmem>>, %arg21: memref<1x32xf32, #tpu.memory_space<vmem>>, %arg22: memref<1x32xf32, #tpu.memory_space<vmem>>, %arg23: memref<2x64x32xf32, #tpu.memory_space<vmem>>, %arg24: memref<128x32xf32, #tpu.memory_space<vmem>>) attributes {dimension_semantics = [#tpu.dimension_semantics<parallel>, #tpu.dimension_semantics<arbitrary>], iteration_bounds = array<i64: 1, 2>, scalar_prefetch = 0 : i64, scratch_operands = 1 : i64, tpu.core_type = #tpu.core_type<tc>, window_params = [{transform_indices = @transform_0, window_bounds = array<i64: 2, 64, 32>}, {pipeline_mode = #tpu.pipeline_mode<synchronous>, transform_indices = @transform_1, window_bounds = array<i64: 1, 64, 32>}, {transform_indices = @transform_2, window_bounds = array<i64: 2, 1, 32>}, {transform_indices = @transform_3, window_bounds = array<i64: 1, 1, 32>}, {transform_indices = @transform_4, window_bounds = array<i64: 1, 1, 32>}, {transform_indices = @transform_5, window_bounds = array<i64: 1, 32, 32>}, {transform_indices = @transform_6, window_bounds = array<i64: 1, 1, 32>}, {transform_indices = @transform_7, window_bounds = array<i64: 1, 32, 32>}, {transform_indices = @transform_8, window_bounds = array<i64: 1, 1, 32>}, {transform_indices = @transform_9, window_bounds = array<i64: 1, 32, 32>}, {transform_indices = @transform_10, window_bounds = array<i64: 1, 1, 32>}, {transform_indices = @transform_11, window_bounds = array<i64: 1, 32, 32>}, {transform_indices = @transform_12, window_bounds = array<i64: 1, 1, 32>}, {transform_indices = @transform_13, window_bounds = array<i64: 1, 1, 32>}, {transform_indices = @transform_14, window_bounds = array<i64: 1, 1, 32>}, {transform_indices = @transform_15, window_bounds = array<i64: 1, 32, 128>}, {transform_indices = @transform_16, window_bounds = array<i64: 1, 1, 128>}, {transform_indices = @transform_17, window_bounds = array<i64: 1, 128, 32>}, {transform_indices = @transform_18, window_bounds = array<i64: 1, 1, 32>}, {pipeline_mode = #tpu.pipeline_mode<synchronous>, transform_indices = @transform_19, window_bounds = array<i64: 1, 32>}, {pipeline_mode = #tpu.pipeline_mode<synchronous>, transform_indices = @transform_20, window_bounds = array<i64: 1, 32>}, {transform_indices = @transform_21, window_bounds = array<i64: 2, 64, 32>}]} {
    %c0_i32 = arith.constant 0 : i32
    %0 = arith.cmpi eq, %arg1, %c0_i32 : i32
    %1 = arith.extui %0 : i1 to i32
    %c0_i32_0 = arith.constant 0 : i32
    %2 = arith.cmpi ne, %1, %c0_i32_0 : i32
    scf.if %2 {
      %c0_74 = arith.constant 0 : index
      %c0_75 = arith.constant 0 : index
      %c0_76 = arith.constant 0 : index
      %190 = vector.load %arg2[%c0_74, %c0_75, %c0_76] : memref<2x64x32xf32, #tpu.memory_space<vmem>>, vector<2x64x32xf32>
      %c0_77 = arith.constant 0 : index
      %c0_78 = arith.constant 0 : index
      %c0_79 = arith.constant 0 : index
      %191 = vector.load %arg3[%c0_77, %c0_78, %c0_79] : memref<1x64x32xf32, #tpu.memory_space<vmem>>, vector<1x64x32xf32>
      %192 = vector.broadcast %191 : vector<1x64x32xf32> to vector<2x64x32xf32>
      %193 = arith.addf %190, %192 : vector<2x64x32xf32>
      %c0_80 = arith.constant 0 : index
      %c0_81 = arith.constant 0 : index
      %c0_82 = arith.constant 0 : index
      %194 = vector.load %arg4[%c0_80, %c0_81, %c0_82] : memref<2x1x32xf32, #tpu.memory_space<vmem>>, vector<2x1x32xf32>
      %195 = vector.broadcast %194 : vector<2x1x32xf32> to vector<2x64x32xf32>
      %196 = arith.addf %193, %195 : vector<2x64x32xf32>
      %197 = vector.shape_cast %196 : vector<2x64x32xf32> to vector<128x32xf32>
      %c0_83 = arith.constant 0 : index
      %c0_84 = arith.constant 0 : index
      %198 = vector.load %arg24[%c0_83, %c0_84] : memref<128x32xf32, #tpu.memory_space<vmem>>, vector<128x32xf32>
      tpu.vector_store %arg24[%c0_83, %c0_84], %197 {strides = array<i32>} : memref<128x32xf32, #tpu.memory_space<vmem>>, vector<128x32xf32>,
    } else {
    }
    %c0 = arith.constant 0 : index
    %c0_1 = arith.constant 0 : index
    %3 = vector.load %arg24[%c0, %c0_1] : memref<128x32xf32, #tpu.memory_space<vmem>>, vector<128x32xf32>
    %c0_2 = arith.constant 0 : index
    %c0_3 = arith.constant 0 : index
    %c0_4 = arith.constant 0 : index
    %4 = vector.load %arg5[%c0_2, %c0_3, %c0_4] : memref<1x1x32xf32, #tpu.memory_space<vmem>>, vector<1x1x32xf32>
    %5 = vector.shape_cast %4 : vector<1x1x32xf32> to vector<1x32xf32>
    %c0_5 = arith.constant 0 : index
    %c0_6 = arith.constant 0 : index
    %c0_7 = arith.constant 0 : index
    %6 = vector.load %arg6[%c0_5, %c0_6, %c0_7] : memref<1x1x32xf32, #tpu.memory_space<vmem>>, vector<1x1x32xf32>
    %7 = vector.shape_cast %6 : vector<1x1x32xf32> to vector<1x32xf32>
    %cst = arith.constant dense<0.000000e+00> : vector<128xf32>
    %8 = vector.multi_reduction <add>, %3, %cst [1] : vector<128x32xf32> to vector<128xf32>
    %9 = vector.shape_cast %8 : vector<128xf32> to vector<128x1xf32>
    %cst_8 = arith.constant 3.200000e+01 : f32
    %10 = vector.broadcast %cst_8 : f32 to vector<128x1xf32>
    %11 = arith.divf %9, %10 : vector<128x1xf32>
    %12 = vector.broadcast %11 : vector<128x1xf32> to vector<128x32xf32>
    %13 = arith.subf %3, %12 : vector<128x32xf32>
    %14 = arith.mulf %13, %13 : vector<128x32xf32>
    %cst_9 = arith.constant dense<0.000000e+00> : vector<128xf32>
    %15 = vector.multi_reduction <add>, %14, %cst_9 [1] : vector<128x32xf32> to vector<128xf32>
    %16 = vector.shape_cast %15 : vector<128xf32> to vector<128x1xf32>
    %cst_10 = arith.constant 3.200000e+01 : f32
    %17 = vector.broadcast %cst_10 : f32 to vector<128x1xf32>
    %18 = arith.divf %16, %17 : vector<128x1xf32>
    %19 = vector.broadcast %11 : vector<128x1xf32> to vector<128x32xf32>
    %20 = arith.subf %3, %19 : vector<128x32xf32>
    %cst_11 = arith.constant 9.99999974E-6 : f32
    %21 = vector.broadcast %cst_11 : f32 to vector<128x1xf32>
    %22 = arith.addf %18, %21 : vector<128x1xf32>
    %23 = math.rsqrt %22 : vector<128x1xf32>
    %24 = vector.broadcast %23 : vector<128x1xf32> to vector<128x32xf32>
    %25 = arith.mulf %20, %24 : vector<128x32xf32>
    %26 = vector.broadcast %5 : vector<1x32xf32> to vector<128x32xf32>
    %27 = arith.mulf %25, %26 : vector<128x32xf32>
    %28 = vector.broadcast %7 : vector<1x32xf32> to vector<128x32xf32>
    %29 = arith.addf %27, %28 : vector<128x32xf32>
    %c0_12 = arith.constant 0 : index
    %c0_13 = arith.constant 0 : index
    %c0_14 = arith.constant 0 : index
    %30 = vector.load %arg7[%c0_12, %c0_13, %c0_14] : memref<1x32x32xf32, #tpu.memory_space<vmem>>, vector<1x32x32xf32>
    %31 = vector.shape_cast %30 : vector<1x32x32xf32> to vector<32x32xf32>
    %cst_15 = arith.constant dense<0.000000e+00> : vector<128x32xf32>
    %32 = tpu.matmul %29, %31, %cst_15 {dimension_numbers = #tpu.dot_dimension_numbers<[1], [0], [0], [1], [0, 0, 1, 1], [], []>} : vector<128x32xf32>, vector<32x32xf32>, vector<128x32xf32> -> vector<128x32xf32>
    %c0_16 = arith.constant 0 : index
    %c0_17 = arith.constant 0 : index
    %c0_18 = arith.constant 0 : index
    %33 = vector.load %arg8[%c0_16, %c0_17, %c0_18] : memref<1x1x32xf32, #tpu.memory_space<vmem>>, vector<1x1x32xf32>
    %34 = vector.shape_cast %33 : vector<1x1x32xf32> to vector<1x32xf32>
    %35 = vector.broadcast %34 : vector<1x32xf32> to vector<128x32xf32>
    %36 = arith.addf %32, %35 : vector<128x32xf32>
    %c0_19 = arith.constant 0 : index
    %c0_20 = arith.constant 0 : index
    %c0_21 = arith.constant 0 : index
    %37 = vector.load %arg9[%c0_19, %c0_20, %c0_21] : memref<1x32x32xf32, #tpu.memory_space<vmem>>, vector<1x32x32xf32>
    %38 = vector.shape_cast %37 : vector<1x32x32xf32> to vector<32x32xf32>
    %cst_22 = arith.constant dense<0.000000e+00> : vector<128x32xf32>
    %39 = tpu.matmul %29, %38, %cst_22 {dimension_numbers = #tpu.dot_dimension_numbers<[1], [0], [0], [1], [0, 0, 1, 1], [], []>} : vector<128x32xf32>, vector<32x32xf32>, vector<128x32xf32> -> vector<128x32xf32>
    %c0_23 = arith.constant 0 : index
    %c0_24 = arith.constant 0 : index
    %c0_25 = arith.constant 0 : index
    %40 = vector.load %arg10[%c0_23, %c0_24, %c0_25] : memref<1x1x32xf32, #tpu.memory_space<vmem>>, vector<1x1x32xf32>
    %41 = vector.shape_cast %40 : vector<1x1x32xf32> to vector<1x32xf32>
    %42 = vector.broadcast %41 : vector<1x32xf32> to vector<128x32xf32>
    %43 = arith.addf %39, %42 : vector<128x32xf32>
    %c0_26 = arith.constant 0 : index
    %c0_27 = arith.constant 0 : index
    %c0_28 = arith.constant 0 : index
    %44 = vector.load %arg11[%c0_26, %c0_27, %c0_28] : memref<1x32x32xf32, #tpu.memory_space<vmem>>, vector<1x32x32xf32>
    %45 = vector.shape_cast %44 : vector<1x32x32xf32> to vector<32x32xf32>
    %cst_29 = arith.constant dense<0.000000e+00> : vector<128x32xf32>
    %46 = tpu.matmul %29, %45, %cst_29 {dimension_numbers = #tpu.dot_dimension_numbers<[1], [0], [0], [1], [0, 0, 1, 1], [], []>} : vector<128x32xf32>, vector<32x32xf32>, vector<128x32xf32> -> vector<128x32xf32>
    %c0_30 = arith.constant 0 : index
    %c0_31 = arith.constant 0 : index
    %c0_32 = arith.constant 0 : index
    %47 = vector.load %arg12[%c0_30, %c0_31, %c0_32] : memref<1x1x32xf32, #tpu.memory_space<vmem>>, vector<1x1x32xf32>
    %48 = vector.shape_cast %47 : vector<1x1x32xf32> to vector<1x32xf32>
    %49 = vector.broadcast %48 : vector<1x32xf32> to vector<128x32xf32>
    %50 = arith.addf %46, %49 : vector<128x32xf32>
    %51 = vector.extract_strided_slice %36 {offsets = [0, 0], sizes = [64, 8], strides = [1, 1]} : vector<128x32xf32> to vector<64x8xf32>
    %52 = vector.extract_strided_slice %36 {offsets = [0, 8], sizes = [64, 8], strides = [1, 1]} : vector<128x32xf32> to vector<64x8xf32>
    %53 = vector.extract_strided_slice %36 {offsets = [0, 16], sizes = [64, 8], strides = [1, 1]} : vector<128x32xf32> to vector<64x8xf32>
    %54 = vector.extract_strided_slice %36 {offsets = [0, 24], sizes = [64, 8], strides = [1, 1]} : vector<128x32xf32> to vector<64x8xf32>
    %55 = vector.extract_strided_slice %36 {offsets = [64, 0], sizes = [64, 8], strides = [1, 1]} : vector<128x32xf32> to vector<64x8xf32>
    %56 = vector.extract_strided_slice %36 {offsets = [64, 8], sizes = [64, 8], strides = [1, 1]} : vector<128x32xf32> to vector<64x8xf32>
    %57 = vector.extract_strided_slice %36 {offsets = [64, 16], sizes = [64, 8], strides = [1, 1]} : vector<128x32xf32> to vector<64x8xf32>
    %58 = vector.extract_strided_slice %36 {offsets = [64, 24], sizes = [64, 8], strides = [1, 1]} : vector<128x32xf32> to vector<64x8xf32>
    %59 = vector.shape_cast %51 : vector<64x8xf32> to vector<1x64x8xf32>
    %60 = vector.shape_cast %52 : vector<64x8xf32> to vector<1x64x8xf32>
    %61 = vector.shape_cast %53 : vector<64x8xf32> to vector<1x64x8xf32>
    %62 = vector.shape_cast %54 : vector<64x8xf32> to vector<1x64x8xf32>
    %63 = vector.shape_cast %55 : vector<64x8xf32> to vector<1x64x8xf32>
    %64 = vector.shape_cast %56 : vector<64x8xf32> to vector<1x64x8xf32>
    %65 = vector.shape_cast %57 : vector<64x8xf32> to vector<1x64x8xf32>
    %66 = vector.shape_cast %58 : vector<64x8xf32> to vector<1x64x8xf32>
    %67 = tpu.concatenate %59, %60, %61, %62, %63, %64, %65, %66 in 0 : vector<1x64x8xf32>, vector<1x64x8xf32>, vector<1x64x8xf32>, vector<1x64x8xf32>, vector<1x64x8xf32>, vector<1x64x8xf32>, vector<1x64x8xf32>, vector<1x64x8xf32> -> vector<8x64x8xf32>
    %68 = vector.extract_strided_slice %43 {offsets = [0, 0], sizes = [64, 8], strides = [1, 1]} : vector<128x32xf32> to vector<64x8xf32>
    %69 = vector.extract_strided_slice %43 {offsets = [0, 8], sizes = [64, 8], strides = [1, 1]} : vector<128x32xf32> to vector<64x8xf32>
    %70 = vector.extract_strided_slice %43 {offsets = [0, 16], sizes = [64, 8], strides = [1, 1]} : vector<128x32xf32> to vector<64x8xf32>
    %71 = vector.extract_strided_slice %43 {offsets = [0, 24], sizes = [64, 8], strides = [1, 1]} : vector<128x32xf32> to vector<64x8xf32>
    %72 = vector.extract_strided_slice %43 {offsets = [64, 0], sizes = [64, 8], strides = [1, 1]} : vector<128x32xf32> to vector<64x8xf32>
    %73 = vector.extract_strided_slice %43 {offsets = [64, 8], sizes = [64, 8], strides = [1, 1]} : vector<128x32xf32> to vector<64x8xf32>
    %74 = vector.extract_strided_slice %43 {offsets = [64, 16], sizes = [64, 8], strides = [1, 1]} : vector<128x32xf32> to vector<64x8xf32>
    %75 = vector.extract_strided_slice %43 {offsets = [64, 24], sizes = [64, 8], strides = [1, 1]} : vector<128x32xf32> to vector<64x8xf32>
    %76 = vector.shape_cast %68 : vector<64x8xf32> to vector<1x64x8xf32>
    %77 = vector.shape_cast %69 : vector<64x8xf32> to vector<1x64x8xf32>
    %78 = vector.shape_cast %70 : vector<64x8xf32> to vector<1x64x8xf32>
    %79 = vector.shape_cast %71 : vector<64x8xf32> to vector<1x64x8xf32>
    %80 = vector.shape_cast %72 : vector<64x8xf32> to vector<1x64x8xf32>
    %81 = vector.shape_cast %73 : vector<64x8xf32> to vector<1x64x8xf32>
    %82 = vector.shape_cast %74 : vector<64x8xf32> to vector<1x64x8xf32>
    %83 = vector.shape_cast %75 : vector<64x8xf32> to vector<1x64x8xf32>
    %84 = tpu.concatenate %76, %77, %78, %79, %80, %81, %82, %83 in 0 : vector<1x64x8xf32>, vector<1x64x8xf32>, vector<1x64x8xf32>, vector<1x64x8xf32>, vector<1x64x8xf32>, vector<1x64x8xf32>, vector<1x64x8xf32>, vector<1x64x8xf32> -> vector<8x64x8xf32>
    %85 = vector.extract_strided_slice %50 {offsets = [0, 0], sizes = [64, 8], strides = [1, 1]} : vector<128x32xf32> to vector<64x8xf32>
    %86 = vector.extract_strided_slice %50 {offsets = [0, 8], sizes = [64, 8], strides = [1, 1]} : vector<128x32xf32> to vector<64x8xf32>
    %87 = vector.extract_strided_slice %50 {offsets = [0, 16], sizes = [64, 8], strides = [1, 1]} : vector<128x32xf32> to vector<64x8xf32>
    %88 = vector.extract_strided_slice %50 {offsets = [0, 24], sizes = [64, 8], strides = [1, 1]} : vector<128x32xf32> to vector<64x8xf32>
    %89 = vector.extract_strided_slice %50 {offsets = [64, 0], sizes = [64, 8], strides = [1, 1]} : vector<128x32xf32> to vector<64x8xf32>
    %90 = vector.extract_strided_slice %50 {offsets = [64, 8], sizes = [64, 8], strides = [1, 1]} : vector<128x32xf32> to vector<64x8xf32>
    %91 = vector.extract_strided_slice %50 {offsets = [64, 16], sizes = [64, 8], strides = [1, 1]} : vector<128x32xf32> to vector<64x8xf32>
    %92 = vector.extract_strided_slice %50 {offsets = [64, 24], sizes = [64, 8], strides = [1, 1]} : vector<128x32xf32> to vector<64x8xf32>
    %93 = vector.shape_cast %85 : vector<64x8xf32> to vector<1x64x8xf32>
    %94 = vector.shape_cast %86 : vector<64x8xf32> to vector<1x64x8xf32>
    %95 = vector.shape_cast %87 : vector<64x8xf32> to vector<1x64x8xf32>
    %96 = vector.shape_cast %88 : vector<64x8xf32> to vector<1x64x8xf32>
    %97 = vector.shape_cast %89 : vector<64x8xf32> to vector<1x64x8xf32>
    %98 = vector.shape_cast %90 : vector<64x8xf32> to vector<1x64x8xf32>
    %99 = vector.shape_cast %91 : vector<64x8xf32> to vector<1x64x8xf32>
    %100 = vector.shape_cast %92 : vector<64x8xf32> to vector<1x64x8xf32>
    %101 = tpu.concatenate %93, %94, %95, %96, %97, %98, %99, %100 in 0 : vector<1x64x8xf32>, vector<1x64x8xf32>, vector<1x64x8xf32>, vector<1x64x8xf32>, vector<1x64x8xf32>, vector<1x64x8xf32>, vector<1x64x8xf32>, vector<1x64x8xf32> -> vector<8x64x8xf32>
    "tpu.trace_start"() <{level = 10 : i32, message = "bqd,bkd->bqk"}> : () -> ()
    %cst_33 = arith.constant dense<0.000000e+00> : vector<8x64x64xf32>
    %102 = tpu.matmul %67, %84, %cst_33 {dimension_numbers = #tpu.dot_dimension_numbers<[2], [2], [1], [1], [0, 0, 0, 1, 1, 1], [0], [0]>} : vector<8x64x8xf32>, vector<8x64x8xf32>, vector<8x64x64xf32> -> vector<8x64x64xf32>
    "tpu.trace_stop"() : () -> ()
    %cst_34 = arith.constant 0.353553385 : f32
    %103 = vector.broadcast %cst_34 : f32 to vector<8x64x64xf32>
    %104 = arith.mulf %102, %103 : vector<8x64x64xf32>
    %cst_35 = arith.constant dense<0xFF800000> : vector<8x64xf32>
    %105 = vector.multi_reduction <maximumf>, %104, %cst_35 [2] : vector<8x64x64xf32> to vector<8x64xf32>
    %106 = vector.shape_cast %105 : vector<8x64xf32> to vector<8x64x1xf32>
    %107 = vector.broadcast %106 : vector<8x64x1xf32> to vector<8x64x64xf32>
    %108 = arith.subf %104, %107 : vector<8x64x64xf32>
    %109 = math.exp %108 : vector<8x64x64xf32>
    %cst_36 = arith.constant dense<0.000000e+00> : vector<8x64xf32>
    %110 = vector.multi_reduction <add>, %109, %cst_36 [2] : vector<8x64x64xf32> to vector<8x64xf32>
    %111 = vector.shape_cast %110 : vector<8x64xf32> to vector<8x64x1xf32>
    %112 = tpu.reciprocal %111 {approx = true} : vector<8x64x1xf32> -> vector<8x64x1xf32>
    %113 = vector.broadcast %112 : vector<8x64x1xf32> to vector<8x64x64xf32>
    %114 = arith.mulf %109, %113 : vector<8x64x64xf32>
    "tpu.trace_start"() <{level = 10 : i32, message = "bqk,bkd->bqd"}> : () -> ()
    %cst_37 = arith.constant dense<0.000000e+00> : vector<8x64x8xf32>
    %115 = tpu.matmul %114, %101, %cst_37 {dimension_numbers = #tpu.dot_dimension_numbers<[2], [1], [1], [2], [0, 0, 0, 1, 1, 2], [0], [0]>} : vector<8x64x64xf32>, vector<8x64x8xf32>, vector<8x64x8xf32> -> vector<8x64x8xf32>
    "tpu.trace_stop"() : () -> ()
    %116 = vector.extract_strided_slice %115 {offsets = [0, 0, 0], sizes = [1, 64, 8], strides = [1, 1, 1]} : vector<8x64x8xf32> to vector<1x64x8xf32>
    %117 = vector.shape_cast %116 : vector<1x64x8xf32> to vector<64x8xf32>
    %118 = vector.extract_strided_slice %115 {offsets = [1, 0, 0], sizes = [1, 64, 8], strides = [1, 1, 1]} : vector<8x64x8xf32> to vector<1x64x8xf32>
    %119 = vector.shape_cast %118 : vector<1x64x8xf32> to vector<64x8xf32>
    %120 = vector.extract_strided_slice %115 {offsets = [2, 0, 0], sizes = [1, 64, 8], strides = [1, 1, 1]} : vector<8x64x8xf32> to vector<1x64x8xf32>
    %121 = vector.shape_cast %120 : vector<1x64x8xf32> to vector<64x8xf32>
    %122 = vector.extract_strided_slice %115 {offsets = [3, 0, 0], sizes = [1, 64, 8], strides = [1, 1, 1]} : vector<8x64x8xf32> to vector<1x64x8xf32>
    %123 = vector.shape_cast %122 : vector<1x64x8xf32> to vector<64x8xf32>
    %124 = tpu.concatenate %117, %119, %121, %123 in 1 : vector<64x8xf32>, vector<64x8xf32>, vector<64x8xf32>, vector<64x8xf32> -> vector<64x32xf32>
    %125 = vector.extract_strided_slice %115 {offsets = [4, 0, 0], sizes = [1, 64, 8], strides = [1, 1, 1]} : vector<8x64x8xf32> to vector<1x64x8xf32>
    %126 = vector.shape_cast %125 : vector<1x64x8xf32> to vector<64x8xf32>
    %127 = vector.extract_strided_slice %115 {offsets = [5, 0, 0], sizes = [1, 64, 8], strides = [1, 1, 1]} : vector<8x64x8xf32> to vector<1x64x8xf32>
    %128 = vector.shape_cast %127 : vector<1x64x8xf32> to vector<64x8xf32>
    %129 = vector.extract_strided_slice %115 {offsets = [6, 0, 0], sizes = [1, 64, 8], strides = [1, 1, 1]} : vector<8x64x8xf32> to vector<1x64x8xf32>
    %130 = vector.shape_cast %129 : vector<1x64x8xf32> to vector<64x8xf32>
    %131 = vector.extract_strided_slice %115 {offsets = [7, 0, 0], sizes = [1, 64, 8], strides = [1, 1, 1]} : vector<8x64x8xf32> to vector<1x64x8xf32>
    %132 = vector.shape_cast %131 : vector<1x64x8xf32> to vector<64x8xf32>
    %133 = tpu.concatenate %126, %128, %130, %132 in 1 : vector<64x8xf32>, vector<64x8xf32>, vector<64x8xf32>, vector<64x8xf32> -> vector<64x32xf32>
    %134 = tpu.concatenate %124, %133 in 0 : vector<64x32xf32>, vector<64x32xf32> -> vector<128x32xf32>
    %c0_38 = arith.constant 0 : index
    %c0_39 = arith.constant 0 : index
    %c0_40 = arith.constant 0 : index
    %135 = vector.load %arg13[%c0_38, %c0_39, %c0_40] : memref<1x32x32xf32, #tpu.memory_space<vmem>>, vector<1x32x32xf32>
    %136 = vector.shape_cast %135 : vector<1x32x32xf32> to vector<32x32xf32>
    %cst_41 = arith.constant dense<0.000000e+00> : vector<128x32xf32>
    %137 = tpu.matmul %134, %136, %cst_41 {dimension_numbers = #tpu.dot_dimension_numbers<[1], [0], [0], [1], [0, 0, 1, 1], [], []>} : vector<128x32xf32>, vector<32x32xf32>, vector<128x32xf32> -> vector<128x32xf32>
    %c0_42 = arith.constant 0 : index
    %c0_43 = arith.constant 0 : index
    %c0_44 = arith.constant 0 : index
    %138 = vector.load %arg14[%c0_42, %c0_43, %c0_44] : memref<1x1x32xf32, #tpu.memory_space<vmem>>, vector<1x1x32xf32>
    %139 = vector.shape_cast %138 : vector<1x1x32xf32> to vector<1x32xf32>
    %140 = vector.broadcast %139 : vector<1x32xf32> to vector<128x32xf32>
    %141 = arith.addf %137, %140 : vector<128x32xf32>
    %142 = arith.addf %3, %141 : vector<128x32xf32>
    %c0_45 = arith.constant 0 : index
    %c0_46 = arith.constant 0 : index
    %c0_47 = arith.constant 0 : index
    %143 = vector.load %arg15[%c0_45, %c0_46, %c0_47] : memref<1x1x32xf32, #tpu.memory_space<vmem>>, vector<1x1x32xf32>
    %144 = vector.shape_cast %143 : vector<1x1x32xf32> to vector<1x32xf32>
    %c0_48 = arith.constant 0 : index
    %c0_49 = arith.constant 0 : index
    %c0_50 = arith.constant 0 : index
    %145 = vector.load %arg16[%c0_48, %c0_49, %c0_50] : memref<1x1x32xf32, #tpu.memory_space<vmem>>, vector<1x1x32xf32>
    %146 = vector.shape_cast %145 : vector<1x1x32xf32> to vector<1x32xf32>
    %cst_51 = arith.constant dense<0.000000e+00> : vector<128xf32>
    %147 = vector.multi_reduction <add>, %142, %cst_51 [1] : vector<128x32xf32> to vector<128xf32>
    %148 = vector.shape_cast %147 : vector<128xf32> to vector<128x1xf32>
    %cst_52 = arith.constant 3.200000e+01 : f32
    %149 = vector.broadcast %cst_52 : f32 to vector<128x1xf32>
    %150 = arith.divf %148, %149 : vector<128x1xf32>
    %151 = vector.broadcast %150 : vector<128x1xf32> to vector<128x32xf32>
    %152 = arith.subf %142, %151 : vector<128x32xf32>
    %153 = arith.mulf %152, %152 : vector<128x32xf32>
    %cst_53 = arith.constant dense<0.000000e+00> : vector<128xf32>
    %154 = vector.multi_reduction <add>, %153, %cst_53 [1] : vector<128x32xf32> to vector<128xf32>
    %155 = vector.shape_cast %154 : vector<128xf32> to vector<128x1xf32>
    %cst_54 = arith.constant 3.200000e+01 : f32
    %156 = vector.broadcast %cst_54 : f32 to vector<128x1xf32>
    %157 = arith.divf %155, %156 : vector<128x1xf32>
    %158 = vector.broadcast %150 : vector<128x1xf32> to vector<128x32xf32>
    %159 = arith.subf %142, %158 : vector<128x32xf32>
    %cst_55 = arith.constant 9.99999974E-6 : f32
    %160 = vector.broadcast %cst_55 : f32 to vector<128x1xf32>
    %161 = arith.addf %157, %160 : vector<128x1xf32>
    %162 = math.rsqrt %161 : vector<128x1xf32>
    %163 = vector.broadcast %162 : vector<128x1xf32> to vector<128x32xf32>
    %164 = arith.mulf %159, %163 : vector<128x32xf32>
    %165 = vector.broadcast %144 : vector<1x32xf32> to vector<128x32xf32>
    %166 = arith.mulf %164, %165 : vector<128x32xf32>
    %167 = vector.broadcast %146 : vector<1x32xf32> to vector<128x32xf32>
    %168 = arith.addf %166, %167 : vector<128x32xf32>
    %c0_56 = arith.constant 0 : index
    %c0_57 = arith.constant 0 : index
    %c0_58 = arith.constant 0 : index
    %169 = vector.load %arg17[%c0_56, %c0_57, %c0_58] : memref<1x32x128xf32, #tpu.memory_space<vmem>>, vector<1x32x128xf32>
    %170 = vector.shape_cast %169 : vector<1x32x128xf32> to vector<32x128xf32>
    %cst_59 = arith.constant dense<0.000000e+00> : vector<128x128xf32>
    %171 = tpu.matmul %168, %170, %cst_59 {dimension_numbers = #tpu.dot_dimension_numbers<[1], [0], [0], [1], [0, 0, 1, 1], [], []>} : vector<128x32xf32>, vector<32x128xf32>, vector<128x128xf32> -> vector<128x128xf32>
    %c0_60 = arith.constant 0 : index
    %c0_61 = arith.constant 0 : index
    %c0_62 = arith.constant 0 : index
    %172 = vector.load %arg18[%c0_60, %c0_61, %c0_62] : memref<1x1x128xf32, #tpu.memory_space<vmem>>, vector<1x1x128xf32>
    %173 = vector.shape_cast %172 : vector<1x1x128xf32> to vector<1x128xf32>
    %174 = vector.broadcast %173 : vector<1x128xf32> to vector<128x128xf32>
    %175 = arith.addf %171, %174 : vector<128x128xf32>
    %cst_63 = arith.constant 0.000000e+00 : f32
    %176 = vector.broadcast %cst_63 : f32 to vector<128x128xf32>
    %177 = arith.maximumf %175, %176 : vector<128x128xf32>
    %c0_64 = arith.constant 0 : index
    %c0_65 = arith.constant 0 : index
    %c0_66 = arith.constant 0 : index
    %178 = vector.load %arg19[%c0_64, %c0_65, %c0_66] : memref<1x128x32xf32, #tpu.memory_space<vmem>>, vector<1x128x32xf32>
    %179 = vector.shape_cast %178 : vector<1x128x32xf32> to vector<128x32xf32>
    %cst_67 = arith.constant dense<0.000000e+00> : vector<128x32xf32>
    %180 = tpu.matmul %177, %179, %cst_67 {dimension_numbers = #tpu.dot_dimension_numbers<[1], [0], [0], [1], [0, 0, 1, 1], [], []>} : vector<128x128xf32>, vector<128x32xf32>, vector<128x32xf32> -> vector<128x32xf32>
    %c0_68 = arith.constant 0 : index
    %c0_69 = arith.constant 0 : index
    %c0_70 = arith.constant 0 : index
    %181 = vector.load %arg20[%c0_68, %c0_69, %c0_70] : memref<1x1x32xf32, #tpu.memory_space<vmem>>, vector<1x1x32xf32>
    %182 = vector.shape_cast %181 : vector<1x1x32xf32> to vector<1x32xf32>
    %183 = vector.broadcast %182 : vector<1x32xf32> to vector<128x32xf32>
    %184 = arith.addf %180, %183 : vector<128x32xf32>
    %185 = arith.addf %142, %184 : vector<128x32xf32>
    %c0_71 = arith.constant 0 : index
    %c0_72 = arith.constant 0 : index
    %186 = vector.load %arg24[%c0_71, %c0_72] : memref<128x32xf32, #tpu.memory_space<vmem>>, vector<128x32xf32>
    tpu.vector_store %arg24[%c0_71, %c0_72], %185 {strides = array<i32>} : memref<128x32xf32, #tpu.memory_space<vmem>>, vector<128x32xf32>,
    %c1_i32 = arith.constant 1 : i32
    %187 = arith.cmpi eq, %arg1, %c1_i32 : i32
    %188 = arith.extui %187 : i1 to i32
    %c0_i32_73 = arith.constant 0 : i32
    %189 = arith.cmpi ne, %188, %c0_i32_73 : i32
    scf.if %189 {
      %c0_74 = arith.constant 0 : index
      %c0_75 = arith.constant 0 : index
      %190 = vector.load %arg21[%c0_74, %c0_75] : memref<1x32xf32, #tpu.memory_space<vmem>>, vector<1x32xf32>
      %c0_76 = arith.constant 0 : index
      %c0_77 = arith.constant 0 : index
      %191 = vector.load %arg22[%c0_76, %c0_77] : memref<1x32xf32, #tpu.memory_space<vmem>>, vector<1x32xf32>
      %cst_78 = arith.constant dense<0.000000e+00> : vector<128xf32>
      %192 = vector.multi_reduction <add>, %185, %cst_78 [1] : vector<128x32xf32> to vector<128xf32>
      %193 = vector.shape_cast %192 : vector<128xf32> to vector<128x1xf32>
      %cst_79 = arith.constant 3.200000e+01 : f32
      %194 = vector.broadcast %cst_79 : f32 to vector<128x1xf32>
      %195 = arith.divf %193, %194 : vector<128x1xf32>
      %196 = vector.broadcast %195 : vector<128x1xf32> to vector<128x32xf32>
      %197 = arith.subf %185, %196 : vector<128x32xf32>
      %198 = arith.mulf %197, %197 : vector<128x32xf32>
      %cst_80 = arith.constant dense<0.000000e+00> : vector<128xf32>
      %199 = vector.multi_reduction <add>, %198, %cst_80 [1] : vector<128x32xf32> to vector<128xf32>
      %200 = vector.shape_cast %199 : vector<128xf32> to vector<128x1xf32>
      %cst_81 = arith.constant 3.200000e+01 : f32
      %201 = vector.broadcast %cst_81 : f32 to vector<128x1xf32>
      %202 = arith.divf %200, %201 : vector<128x1xf32>
      %203 = vector.broadcast %195 : vector<128x1xf32> to vector<128x32xf32>
      %204 = arith.subf %185, %203 : vector<128x32xf32>
      %cst_82 = arith.constant 9.99999974E-6 : f32
      %205 = vector.broadcast %cst_82 : f32 to vector<128x1xf32>
      %206 = arith.addf %202, %205 : vector<128x1xf32>
      %207 = math.rsqrt %206 : vector<128x1xf32>
      %208 = vector.broadcast %207 : vector<128x1xf32> to vector<128x32xf32>
      %209 = arith.mulf %204, %208 : vector<128x32xf32>
      %210 = vector.broadcast %190 : vector<1x32xf32> to vector<128x32xf32>
      %211 = arith.mulf %209, %210 : vector<128x32xf32>
      %212 = vector.broadcast %191 : vector<1x32xf32> to vector<128x32xf32>
      %213 = arith.addf %211, %212 : vector<128x32xf32>
      %214 = vector.shape_cast %213 : vector<128x32xf32> to vector<2x64x32xf32>
      %c0_83 = arith.constant 0 : index
      %c0_84 = arith.constant 0 : index
      %c0_85 = arith.constant 0 : index
      %215 = vector.load %arg23[%c0_83, %c0_84, %c0_85] : memref<2x64x32xf32, #tpu.memory_space<vmem>>, vector<2x64x32xf32>
      tpu.vector_store %arg23[%c0_83, %c0_84, %c0_85], %214 {strides = array<i32>} : memref<2x64x32xf32, #tpu.memory_space<vmem>>, vector<2x64x32xf32>,
    } else {
    }
    return
  }
  func.func @transform_0(%arg0: i32, %arg1: i32) -> (i32, i32, i32) {
    %c0_i32 = arith.constant 0 : i32
    %c0_i32_0 = arith.constant 0 : i32
    %c0_i32_1 = arith.constant 0 : i32
    return %arg0, %c0_i32, %c0_i32_0 : i32, i32, i32
  }
  func.func @transform_1(%arg0: i32, %arg1: i32) -> (i32, i32, i32) {
    %c0_i32 = arith.constant 0 : i32
    %c0_i32_0 = arith.constant 0 : i32
    %c0_i32_1 = arith.constant 0 : i32
    %c0_i32_2 = arith.constant 0 : i32
    return %c0_i32, %c0_i32_0, %c0_i32_1 : i32, i32, i32
  }
  func.func @transform_2(%arg0: i32, %arg1: i32) -> (i32, i32, i32) {
    %c0_i32 = arith.constant 0 : i32
    %c0_i32_0 = arith.constant 0 : i32
    %c0_i32_1 = arith.constant 0 : i32
    return %arg0, %c0_i32, %c0_i32_0 : i32, i32, i32
  }
  func.func @transform_3(%arg0: i32, %arg1: i32) -> (i32, i32, i32) {
    %c0_i32 = arith.constant 0 : i32
    %c0_i32_0 = arith.constant 0 : i32
    %c0_i32_1 = arith.constant 0 : i32
    return %arg1, %c0_i32, %c0_i32_0 : i32, i32, i32
  }
  func.func @transform_4(%arg0: i32, %arg1: i32) -> (i32, i32, i32) {
    %c0_i32 = arith.constant 0 : i32
    %c0_i32_0 = arith.constant 0 : i32
    %c0_i32_1 = arith.constant 0 : i32
    return %arg1, %c0_i32, %c0_i32_0 : i32, i32, i32
  }
  func.func @transform_5(%arg0: i32, %arg1: i32) -> (i32, i32, i32) {
    %c0_i32 = arith.constant 0 : i32
    %c0_i32_0 = arith.constant 0 : i32
    %c0_i32_1 = arith.constant 0 : i32
    return %arg1, %c0_i32, %c0_i32_0 : i32, i32, i32
  }
  func.func @transform_6(%arg0: i32, %arg1: i32) -> (i32, i32, i32) {
    %c0_i32 = arith.constant 0 : i32
    %c0_i32_0 = arith.constant 0 : i32
    %c0_i32_1 = arith.constant 0 : i32
    return %arg1, %c0_i32, %c0_i32_0 : i32, i32, i32
  }
  func.func @transform_7(%arg0: i32, %arg1: i32) -> (i32, i32, i32) {
    %c0_i32 = arith.constant 0 : i32
    %c0_i32_0 = arith.constant 0 : i32
    %c0_i32_1 = arith.constant 0 : i32
    return %arg1, %c0_i32, %c0_i32_0 : i32, i32, i32
  }
  func.func @transform_8(%arg0: i32, %arg1: i32) -> (i32, i32, i32) {
    %c0_i32 = arith.constant 0 : i32
    %c0_i32_0 = arith.constant 0 : i32
    %c0_i32_1 = arith.constant 0 : i32
    return %arg1, %c0_i32, %c0_i32_0 : i32, i32, i32
  }
  func.func @transform_9(%arg0: i32, %arg1: i32) -> (i32, i32, i32) {
    %c0_i32 = arith.constant 0 : i32
    %c0_i32_0 = arith.constant 0 : i32
    %c0_i32_1 = arith.constant 0 : i32
    return %arg1, %c0_i32, %c0_i32_0 : i32, i32, i32
  }
  func.func @transform_10(%arg0: i32, %arg1: i32) -> (i32, i32, i32) {
    %c0_i32 = arith.constant 0 : i32
    %c0_i32_0 = arith.constant 0 : i32
    %c0_i32_1 = arith.constant 0 : i32
    return %arg1, %c0_i32, %c0_i32_0 : i32, i32, i32
  }
  func.func @transform_11(%arg0: i32, %arg1: i32) -> (i32, i32, i32) {
    %c0_i32 = arith.constant 0 : i32
    %c0_i32_0 = arith.constant 0 : i32
    %c0_i32_1 = arith.constant 0 : i32
    return %arg1, %c0_i32, %c0_i32_0 : i32, i32, i32
  }
  func.func @transform_12(%arg0: i32, %arg1: i32) -> (i32, i32, i32) {
    %c0_i32 = arith.constant 0 : i32
    %c0_i32_0 = arith.constant 0 : i32
    %c0_i32_1 = arith.constant 0 : i32
    return %arg1, %c0_i32, %c0_i32_0 : i32, i32, i32
  }
  func.func @transform_13(%arg0: i32, %arg1: i32) -> (i32, i32, i32) {
    %c0_i32 = arith.constant 0 : i32
    %c0_i32_0 = arith.constant 0 : i32
    %c0_i32_1 = arith.constant 0 : i32
    return %arg1, %c0_i32, %c0_i32_0 : i32, i32, i32
  }
  func.func @transform_14(%arg0: i32, %arg1: i32) -> (i32, i32, i32) {
    %c0_i32 = arith.constant 0 : i32
    %c0_i32_0 = arith.constant 0 : i32
    %c0_i32_1 = arith.constant 0 : i32
    return %arg1, %c0_i32, %c0_i32_0 : i32, i32, i32
  }
  func.func @transform_15(%arg0: i32, %arg1: i32) -> (i32, i32, i32) {
    %c0_i32 = arith.constant 0 : i32
    %c0_i32_0 = arith.constant 0 : i32
    %c0_i32_1 = arith.constant 0 : i32
    return %arg1, %c0_i32, %c0_i32_0 : i32, i32, i32
  }
  func.func @transform_16(%arg0: i32, %arg1: i32) -> (i32, i32, i32) {
    %c0_i32 = arith.constant 0 : i32
    %c0_i32_0 = arith.constant 0 : i32
    %c0_i32_1 = arith.constant 0 : i32
    return %arg1, %c0_i32, %c0_i32_0 : i32, i32, i32
  }
  func.func @transform_17(%arg0: i32, %arg1: i32) -> (i32, i32, i32) {
    %c0_i32 = arith.constant 0 : i32
    %c0_i32_0 = arith.constant 0 : i32
    %c0_i32_1 = arith.constant 0 : i32
    return %arg1, %c0_i32, %c0_i32_0 : i32, i32, i32
  }
  func.func @transform_18(%arg0: i32, %arg1: i32) -> (i32, i32, i32) {
    %c0_i32 = arith.constant 0 : i32
    %c0_i32_0 = arith.constant 0 : i32
    %c0_i32_1 = arith.constant 0 : i32
    return %arg1, %c0_i32, %c0_i32_0 : i32, i32, i32
  }
  func.func @transform_19(%arg0: i32, %arg1: i32) -> (i32, i32) {
    %c0_i32 = arith.constant 0 : i32
    %c0_i32_0 = arith.constant 0 : i32
    %c0_i32_1 = arith.constant 0 : i32
    return %c0_i32, %c0_i32_0 : i32, i32
  }
  func.func @transform_20(%arg0: i32, %arg1: i32) -> (i32, i32) {
    %c0_i32 = arith.constant 0 : i32
    %c0_i32_0 = arith.constant 0 : i32
    %c0_i32_1 = arith.constant 0 : i32
    return %c0_i32, %c0_i32_0 : i32, i32
  }
  func.func @transform_21(%arg0: i32, %arg1: i32) -> (i32, i32, i32) {
    %c0_i32 = arith.constant 0 : i32
    %c0_i32_0 = arith.constant 0 : i32
    %c0_i32_1 = arith.constant 0 : i32
    return %arg0, %c0_i32, %c0_i32_0 : i32, i32, i32
  }
}

</mosaic_0001>

<bundles_post_ra>
// kernel: tpu_custom_call.1
= control target key start
LH: loop header
LB: loop body
LE: loop exit
PB: predicated region body
PF: predicated region fallthrough
CT: control target
= control target key end

     0   :  { %s9312_s25 = smov 0   ;;  %s9314_s26 = smov 0   ;;  %s12120_s0 = inlined_call_operand.vmem [shape: f32[2,64,32], index: 0, kind: input, shape index: {}]   ;;  %s12121_s1 = inlined_call_operand.vmem [shape: f32[1,64,32], index: 1, kind: input, shape index: {}]   ;;  %s12122_s2 = inlined_call_operand.vmem [shape: f32[2,1,32], index: 2, kind: input, shape index: {}]   ;;  %s12123_s3 = inlined_call_operand.vmem [shape: f32[2,1,32], index: 3, kind: input, shape index: {}]   ;;  %s12124_s4 = inlined_call_operand.vmem [shape: f32[2,1,32], index: 4, kind: input, shape index: {}]   ;;  %s12125_s5 = inlined_call_operand.vmem [shape: f32[2,32,32], index: 5, kind: input, shape index: {}]   ;;  %s12126_s6 = inlined_call_operand.vmem [shape: f32[2,1,32], index: 6, kind: input, shape index: {}]   ;;  %s12127_s7 = inlined_call_operand.vmem [shape: f32[2,32,32], index: 7, kind: input, shape index: {}]   ;;  %s12128_s8 = inlined_call_operand.vmem [shape: f32[2,1,32], index: 8, kind: input, shape index: {}]   ;;  %s12129_s9 = inlined_call_operand.vmem [shape: f32[2,32,32], index: 9, kind: input, shape index: {}]   ;;  %s12130_s10 = inlined_call_operand.vmem [shape: f32[2,1,32], index: 10, kind: input, shape index: {}]   ;;  %s12131_s11 = inlined_call_operand.vmem [shape: f32[2,32,32], index: 11, kind: input, shape index: {}]   ;;  %s12132_s12 = inlined_call_operand.vmem [shape: f32[2,1,32], index: 12, kind: input, shape index: {}]   ;;  %s12133_s13 = inlined_call_operand.vmem [shape: f32[2,1,32], index: 13, kind: input, shape index: {}]   ;;  %s12134_s14 = inlined_call_operand.vmem [shape: f32[2,1,32], index: 14, kind: input, shape index: {}]   ;;  %s12135_s15 = inlined_call_operand.vmem [shape: f32[2,32,128], index: 15, kind: input, shape index: {}]   ;;  %s12136_s16 = inlined_call_operand.vmem [shape: f32[2,1,128], index: 16, kind: input, shape index: {}]   ;;  %s12137_s17 = inlined_call_operand.vmem [shape: f32[2,128,32], index: 17, kind: input, shape index: {}]   ;;  %s12138_s18 = inlined_call_operand.vmem [shape: f32[2,1,32], index: 18, kind: input, shape index: {}]   ;;  %s12139_s19 = inlined_call_operand.vmem [shape: f32[1,32], index: 19, kind: input, shape index: {}]   ;;  %s12140_s20 = inlined_call_operand.vmem [shape: f32[1,32], index: 20, kind: input, shape index: {}]   ;;  %s12141_s21 = inlined_call_operand.vmem [shape: f32[2,64,32], index: 21, kind: output, shape index: {}]  }
   0x1   :  { %12196 = sst [smem:[#allocation43_spill]] %s12120_s0 }
   0x2   :  { %12197 = sst [smem:[#allocation44_spill]] %s12121_s1 }
   0x3   :  { %12198 = sst [smem:[#allocation45_spill]] %s12122_s2  ;;  %s9310_s2 = smov 0  }
   0x4   :  { %12199 = sst [smem:[#allocation46_spill]] %s12123_s3 }
   0x5   :  { %12200 = sst [smem:[#allocation47_spill]] %s12124_s4 }
   0x6   :  { %12201 = sst [smem:[#allocation48_spill]] %s12125_s5 }
   0x7   :  { %12202 = sst [smem:[#allocation49_spill]] %s12127_s7 }
   0x8   :  { %12203 = sst [smem:[#allocation50_spill]] %s12128_s8 }
   0x9   :  { %12204 = sst [smem:[#allocation51_spill]] %s12129_s9 }
   0xa   :  { %12205 = sst [smem:[#allocation52_spill]] %s12131_s11 }
   0xb   :  { %12206 = sst [smem:[#allocation53_spill]] %s12139_s19 }
   0xc   :  { %12207 = sst [smem:[#allocation54_spill]] %s12140_s20 }
   0xd   :  { %12208 = sst [smem:[#allocation55_spill]] %s12141_s21 }
   0xe LB: > { %12209 = sst [smem:[#allocation3_spill]] %s9184_s2  ;;  %s40_s27 = sadd.s32 1, %s9188_s25  ;;  %s9192_s26 = sphi %s9314_s26, %s31_s26   ;;  %s9188_s25 = sphi %s9312_s25, %s12334_s25   ;;  %s9184_s2 = sphi %s9310_s2, %s12333_s2  }
   0xf   : > { %12210 = sst [smem:[#allocation4_spill]] %s9188_s25  ;;  %p6773_p0 = scmp.ge.s32.totalorder %s9192_s26, 1 }
  0x10   : > { %12211 = sst [smem:[#allocation5_spill]] %s9192_s26  ;;  %p41_p1 = scmp.ge.s32.totalorder %s40_s27, 2 }
  0x11   : > { %p751_p2 = scmp.lt.s32.totalorder %s9192_s26, 3 }
  0x12   : > { %s12336_s27 = smov (%p41_p1, %s40_s27), 0 }
  0x13   : > { %12212 = sst [smem:[#allocation6_spill]] %s12336_s27  ;;  %p752_p3 = pnand %p6773_p0, %p751_p2 }
  0x15   : > { %755 = sbr.rel (%p752_p3) target bundleno = 3152 (0xc50), region = 104 }
  0x1c   : > { %p889_p4 = scmp.lt.s32.totalorder %s9184_s2, 1  ;;  %s12215_s26 = sld [smem:[#allocation48_spill]] }
  0x1d   : > { %s12216_s7 = sld [smem:[#allocation49_spill]]  ;;  %s12218_s9 = sld [smem:[#allocation51_spill]] }
  0x1e   : > { %s9332_s3 = scalar_select %p889_p4, %s9184_s2, 1 }
  0x1f   : > { %s12219_s11 = sld [smem:[#allocation52_spill]]  ;;  %s12220_s22 = sld [smem:[#allocation3_spill]] }
  0x20   : > { %s7078_s1 = sshll.u32 %s9332_s3, 5  ;;  %s948_s5 = scalar_lea.vmem %s12138_s18, %s9332_s3 }
  0x21   : > { %s9390_s24 = scalar_lea.vmem %s12135_s15, %s7078_s1 }
  0x22   : > { %s9350_s21 = scalar_lea.vmem %s12215_s26, %s7078_s1 }
  0x23   : > { %s9355_s2 = scalar_lea.vmem %s12216_s7, %s7078_s1  ;;  %s9364_s23 = scalar_lea.vmem %s12218_s9, %s7078_s1 }
  0x25   : > { %s9373_s28 = scalar_lea.vmem %s12219_s11, %s7078_s1  ;;  %s7083_s11 = sshll.u32 %s9332_s3, 7 }
  0x26   : > { %s9400_s7 = scalar_lea.vmem %s12137_s17, %s7083_s11  ;;  %p6786_p5 = scmp.ne.s32.totalorder %s12220_s22, 0 }
  0x27   : > { %s12221_s27 = sld [smem:[#allocation43_spill]] (!%p6786_p5)  ;;  %s12222_s29 = sld [smem:[#allocation44_spill]] (!%p6786_p5)  ;;  %vm1030_vm0 = vcmask (!%p6786_p5), 261120  }
  0x28   : > { %959 = sbr.rel (%p6786_p5) target bundleno = 61 (0x3d), region = 108  ;;  %s12223_s19 = sld [smem:[#allocation45_spill]] (!%p6786_p5) }
  0x2d   : > { %v960_v0 = vld [vmem:[%s12221_s27] sm:$0xff] (!%p6786_p5)  ;;  %v961_v4 = vld [vmem:[%s12221_s27 + $0x8] sm:$0xff] (!%p6786_p5)  ;;  %v962_v6 = vld [vmem:[%s12221_s27 + $0x10] sm:$0xff] (!%p6786_p5) }
  0x2e   : > { %v976_v1 = vld [vmem:[%s12222_s29] sm:$0xff] (!%p6786_p5)  ;;  %v977_v5 = vld [vmem:[%s12222_s29 + $0x8] sm:$0xff] (!%p6786_p5)  ;;  %v978_v8 = vld [vmem:[%s12222_s29 + $0x10] sm:$0xff] (!%p6786_p5) }
  0x2f   : > { %v6787_v2 = vld [vmem:[%s12223_s19] ss:$0 sm:$0xff]  ;;  %v984_v3 = vadd.f32 %v976_v1, %v960_v0  ;;  %v985_v7 = vadd.f32 %v977_v5, %v961_v4  ;;  %v963_v9 = vld [vmem:[%s12221_s27 + $0x18] sm:$0xff]  ;;  %v986_v12 = vadd.f32 %v978_v8, %v962_v6  ;;  %v965_v16 = vld [vmem:[%s12221_s27 + $0x28] sm:$0xff] }
  0x30   : > { %v979_v10 = vld [vmem:[%s12222_s29 + $0x18] sm:$0xff]  ;;  %v964_v14 = vld [vmem:[%s12221_s27 + $0x20] sm:$0xff]  ;;  %v981_v19 = vld [vmem:[%s12222_s29 + $0x28] sm:$0xff] }
  0x31   : > { %v1014_v11 = vadd.f32 %v6787_v2, %v984_v3  ;;  %v987_v13 = vadd.f32 %v979_v10, %v963_v9  ;;  %v980_v15 = vld [vmem:[%s12222_s29 + $0x20] sm:$0xff]  ;;  %v1015_v17 = vadd.f32 %v6787_v2, %v985_v7  ;;  %v966_v20 = vld [vmem:[%s12221_s27 + $0x30] sm:$0xff]  ;;  %v1016_v22 = vadd.f32 %v6787_v2, %v986_v12  ;;  %v967_v26 = vld [vmem:[%s12221_s27 + $0x38] sm:$0xff] }
  0x32   : > { %v988_v18 = vadd.f32 %v980_v15, %v964_v14  ;;  %v982_v21 = vld [vmem:[%s12222_s29 + $0x30] sm:$0xff]  ;;  %v989_v24 = vadd.f32 %v981_v19, %v965_v16  ;;  %v983_v27 = vld [vmem:[%s12222_s29 + $0x38] sm:$0xff]  ;;  %v968_v28 = vld [vmem:[%s12221_s27 + $0x40] sm:$0xff] }
  0x33   : > { %1031 = vst.msk [vmem:[#allocation2] sm:$0xff] %vm1030_vm0, %v1014_v11  ;;  %v1017_v23 = vadd.f32 %v6787_v2, %v987_v13  ;;  %v990_v25 = vadd.f32 %v982_v21, %v966_v20  ;;  %1032 = vst.msk [vmem:[#allocation2 + $0x8] sm:$0xff] %vm1030_vm0, %v1015_v17  ;;  %v991_v30 = vadd.f32 %v983_v27, %v967_v26  ;;  %v6788_v32 = vld [vmem:[%s12223_s19 + $0x1] ss:$0 sm:$0xff]  ;;  %v969_v33 = vld [vmem:[%s12221_s27 + $0x48] sm:$0xff] }
  0x34   : > { %v1018_v29 = vadd.f32 %v6787_v2, %v988_v18  ;;  %v992_v31 = vadd.f32 %v976_v1, %v968_v28  ;;  %v970_v34 = vld [vmem:[%s12221_s27 + $0x50] sm:$0xff]  ;;  %1033 = vst.msk [vmem:[#allocation2 + $0x10] sm:$0xff] %vm1030_vm0, %v1016_v22  ;;  %v1019_v35 = vadd.f32 %v6787_v2, %v989_v24  ;;  %v993_v37 = vadd.f32 %v977_v5, %v969_v33  ;;  %v971_v39 = vld [vmem:[%s12221_s27 + $0x58] sm:$0xff]  ;;  %v972_v40 = vld [vmem:[%s12221_s27 + $0x60] sm:$0xff] }
  0x35   : > { %1034 = vst.msk [vmem:[#allocation2 + $0x18] sm:$0xff] %vm1030_vm0, %v1017_v23  ;;  %v1020_v36 = vadd.f32 %v6787_v2, %v990_v25  ;;  %v994_v38 = vadd.f32 %v978_v8, %v970_v34  ;;  %v973_v41 = vld [vmem:[%s12221_s27 + $0x68] sm:$0xff]  ;;  %v1021_v42 = vadd.f32 %v6787_v2, %v991_v30  ;;  %v995_v44 = vadd.f32 %v979_v10, %v971_v39  ;;  %v974_v46 = vld [vmem:[%s12221_s27 + $0x70] sm:$0xff]  ;;  %v975_v47 = vld [vmem:[%s12221_s27 + $0x78] sm:$0xff] }
  0x36   : > { %1035 = vst.msk [vmem:[#allocation2 + $0x20] sm:$0xff] %vm1030_vm0, %v1018_v29  ;;  %v1022_v43 = vadd.f32 %v6788_v32, %v992_v31  ;;  %v996_v45 = vadd.f32 %v980_v15, %v972_v40  ;;  %1036 = vst.msk [vmem:[#allocation2 + $0x28] sm:$0xff] %vm1030_vm0, %v1019_v35  ;;  %v1023_v48 = vadd.f32 %v6788_v32, %v993_v37 }
  0x37   : > { %1037 = vst.msk [vmem:[#allocation2 + $0x30] sm:$0xff] %vm1030_vm0, %v1020_v36  ;;  %v1024_v49 = vadd.f32 %v6788_v32, %v994_v38  ;;  %v997_v50 = vadd.f32 %v981_v19, %v973_v41  ;;  %v998_v51 = vadd.f32 %v982_v21, %v974_v46  ;;  %1038 = vst.msk [vmem:[#allocation2 + $0x38] sm:$0xff] %vm1030_vm0, %v1021_v42 }
  0x38   : > { %1039 = vst.msk [vmem:[#allocation2 + $0x40] sm:$0xff] %vm1030_vm0, %v1022_v43  ;;  %v1025_v52 = vadd.f32 %v6788_v32, %v995_v44  ;;  %v1026_v53 = vadd.f32 %v6788_v32, %v996_v45  ;;  %v999_v54 = vadd.f32 %v983_v27, %v975_v47  ;;  %1040 = vst.msk [vmem:[#allocation2 + $0x48] sm:$0xff] %vm1030_vm0, %v1023_v48 }
  0x39   : > { %1041 = vst.msk [vmem:[#allocation2 + $0x50] sm:$0xff] %vm1030_vm0, %v1024_v49  ;;  %v1027_v55 = vadd.f32 %v6788_v32, %v997_v50  ;;  %v1028_v56 = vadd.f32 %v6788_v32, %v998_v51 }
  0x3a   : > { %1042 = vst.msk [vmem:[#allocation2 + $0x58] sm:$0xff] %vm1030_vm0, %v1025_v52  ;;  %1043 = vst.msk [vmem:[#allocation2 + $0x60] sm:$0xff] %vm1030_vm0, %v1026_v53  ;;  %v1029_v57 = vadd.f32 %v6788_v32, %v999_v54 }
  0x3b   : > { %1044 = vst.msk [vmem:[#allocation2 + $0x68] sm:$0xff] %vm1030_vm0, %v1027_v55  ;;  %1045 = vst.msk [vmem:[#allocation2 + $0x70] sm:$0xff] %vm1030_vm0, %v1028_v56 }
  0x3c   : > { %1046 = vst.msk [vmem:[#allocation2 + $0x78] sm:$0xff] %vm1030_vm0, %v1029_v57 }
  0x3d PF: > { %vm1065_vm1 = vcmask 261120   ;;  %v9515_v10 = vld [vmem:[#allocation2] sm:$0xff]  ;;  %v9517_v11 = vld [vmem:[#allocation2 + $0x8] sm:$0xff]  ;;  %v9523_v14 = vld [vmem:[#allocation2 + $0x10] sm:$0xff]  ;;  %s12224_s0 = sld [smem:[#allocation46_spill]]  ;;  %s12226_s1 = sld [smem:[#allocation47_spill]] }
  0x3e   : > { %v1066_v12 = vsel %vm1065_vm1, %v9515_v10, 0.0  ;;  %v1069_v13 = vsel %vm1065_vm1, %v9517_v11, 0.0  ;;  %v9525_v15 = vld [vmem:[#allocation2 + $0x18] sm:$0xff]  ;;  %v1072_v16 = vsel %vm1065_vm1, %v9523_v14, 0.0  ;;  %v9531_v18 = vld [vmem:[#allocation2 + $0x20] sm:$0xff]  ;;  %v9533_v19 = vld [vmem:[#allocation2 + $0x28] sm:$0xff]  ;;  %s12228_s25 = scalar_lea.vmem %s12126_s6, %s9332_s3  ;;  %s12233_s8 = scalar_lea.vmem %s12130_s10, %s9332_s3 }
  0x3f   : > { %v1055_v58 = vld [vmem:[#allocation2 + $0x40] sm:$0xff]  ;;  %v1056_v60 = vld [vmem:[#allocation2 + $0x48] sm:$0xff]  ;;  %v1075_v17 = vsel %vm1065_vm1, %v9525_v15, 0.0  ;;  %v1078_v20 = vsel %vm1065_vm1, %v9531_v18, 0.0  ;;  %v1081_v21 = vsel %vm1065_vm1, %v9533_v19, 0.0  ;;  %v9539_v22 = vld [vmem:[#allocation2 + $0x30] sm:$0xff]  ;;  %s12324_s26 = scalar_lea.vmem %s12132_s12, %s9332_s3 }
  0x40   : > { %v1057_v59 = vld [vmem:[#allocation2 + $0x50] sm:$0xff]  ;;  %v1090_v61 = vsel %vm1065_vm1, %v1055_v58, 0.0  ;;  %v1093_v0 = vsel %vm1065_vm1, %v1056_v60, 0.0  ;;  %v9541_v23 = vld [vmem:[#allocation2 + $0x38] sm:$0xff]  ;;  %v1084_v24 = vsel %vm1065_vm1, %v9539_v22, 0.0  ;;  %s12229_s20 = sld [smem:[#allocation50_spill]] }
  0x41   : > { %v1096_v62 = vsel %vm1065_vm1, %v1057_v59, 0.0  ;;  %v1058_v63 = vld [vmem:[#allocation2 + $0x58] sm:$0xff]  ;;  %1091 = vadd.xlane.f32.xlu0 %v1090_v61  ;;  %v1059_v2 = vld [vmem:[#allocation2 + $0x60] sm:$0xff]  ;;  %v1087_v25 = vsel %vm1065_vm1, %v9541_v23, 0.0  ;;  %vm2219_vm2 = vcmask 64512   ;;  %s9194_s4 = smov 120  }
  0x42   : > { %1097 = vadd.xlane.f32.xlu1 %v1096_v62  ;;  %v1099_v1 = vsel %vm1065_vm1, %v1058_v63, 0.0  ;;  %v1060_v3 = vld [vmem:[#allocation2 + $0x68] sm:$0xff]  ;;  %v1102_v4 = vsel %vm1065_vm1, %v1059_v2, 0.0  ;;  %v9507_v6 = vld [vmem:[#allocation2 + $0x70] sm:$0xff]  ;;  %vm9857_vm3 = vmpackc.low %vm2219_vm2, %vm2219_vm2  ;;  %s9195_s9 = smov 112   ;;  %vm3380_vm4 = vcmask 523264  }
  0x43   : > { %v1105_v5 = vsel %vm1065_vm1, %v1060_v3, 0.0  ;;  %v9509_v7 = vld [vmem:[#allocation2 + $0x78] sm:$0xff]  ;;  %v1108_v8 = vsel %vm1065_vm1, %v9507_v6, 0.0  ;;  %s12225_s22 = scalar_lea.vmem %s12224_s0, %s9332_s3  ;;  %s12227_s30 = scalar_lea.vmem %s12226_s1, %s9332_s3  ;;  %vm5221_vm5 = vcmask 130048   ;;  %vm5230_vm6 = vcmask 195584  }
  0x44   : > { %v1111_v9 = vsel %vm1065_vm1, %v9509_v7, 0.0  ;;  %s9196_s1 = smov 104   ;;  %s12326_s0 = scalar_lea.vmem %s12134_s14, %s9332_s3 }
  0x45   : > { %1094 = vadd.xlane.f32.xlu0 %v1093_v0 }
  0x46   : > { %1100 = vadd.xlane.f32.xlu1 %v1099_v1 }
  0x49   : > { %1103 = vadd.xlane.f32.xlu0 %v1102_v4 }
  0x4a   : > { %1106 = vadd.xlane.f32.xlu1 %v1105_v5 }
  0x4d   : > { %1109 = vadd.xlane.f32.xlu0 %v1108_v8 }
  0x4e   : > { %1112 = vadd.xlane.f32.xlu1 %v1111_v9 }
  0x51   : > { %1067 = vadd.xlane.f32.xlu0 %v1066_v12 }
  0x52   : > { %1070 = vadd.xlane.f32.xlu1 %v1069_v13 }
  0x55   : > { %1073 = vadd.xlane.f32.xlu0 %v1072_v16 }
  0x56   : > { %1076 = vadd.xlane.f32.xlu1 %v1075_v17 }
  0x59   : > { %1079 = vadd.xlane.f32.xlu0 %v1078_v20 }
  0x5a   : > { %1082 = vadd.xlane.f32.xlu1 %v1081_v21 }
  0x5d   : > { %1085 = vadd.xlane.f32.xlu0 %v1084_v24 }
  0x5e   : > { %1088 = vadd.xlane.f32.xlu1 %v1087_v25 }
  0xce   : > { %v1092_v26 = vpop.xlane.xlu0 %1091 }
  0xcf   : > { %v1098_v27 = vpop.xlane.xlu1 %1097  ;;  %v1123_v28 = vmul.f32 0.03125, %v1092_v26 }
  0xd0   : > { %v1125_v29 = vmul.f32 0.03125, %v1098_v27 }
  0xd1   : > { %v9547_v30 = vsub.f32 %v1055_v58, %v1123_v28 }
  0xd2   : > { %v9549_v31 = vsub.f32 %v1057_v59, %v1125_v29  ;;  %v1095_v32 = vpop.xlane.xlu0 %1094 }
  0xd3   : > { %v1101_v33 = vpop.xlane.xlu1 %1100  ;;  %v1124_v34 = vmul.f32 0.03125, %v1095_v32  ;;  %v1155_v36 = vmul.f32 %v9547_v30, %v9547_v30 }
  0xd4   : > { %v1126_v35 = vmul.f32 0.03125, %v1101_v33  ;;  %v1157_v37 = vmul.f32 %v9549_v31, %v9549_v31 }
  0xd5   : > { %v9555_v38 = vsub.f32 %v1056_v60, %v1124_v34  ;;  %v1187_v40 = vsel %vm1065_vm1, %v1155_v36, 0.0 }
  0xd6   : > { %v9557_v39 = vsub.f32 %v1058_v63, %v1126_v35  ;;  %v1104_v41 = vpop.xlane.xlu0 %1103  ;;  %1188 = vadd.xlane.f32.xlu0 %v1187_v40  ;;  %v1193_v43 = vsel %vm1065_vm1, %v1157_v37, 0.0 }
  0xd7   : > { %v1107_v42 = vpop.xlane.xlu1 %1106  ;;  %v1127_v44 = vmul.f32 0.03125, %v1104_v41  ;;  %v1156_v46 = vmul.f32 %v9555_v38, %v9555_v38 }
  0xd8   : > { %v1128_v45 = vmul.f32 0.03125, %v1107_v42  ;;  %v1158_v47 = vmul.f32 %v9557_v39, %v9557_v39 }
  0xd9   : > { %v9565_v48 = vsub.f32 %v1059_v2, %v1127_v44  ;;  %v1190_v50 = vsel %vm1065_vm1, %v1156_v46, 0.0  ;;  %v1319_v46 = vld [vmem:[%s9350_s21] sm:$0xff] }
  0xda   : > { %v9567_v49 = vsub.f32 %v1060_v3, %v1128_v45  ;;  %v1110_v51 = vpop.xlane.xlu0 %1109  ;;  %1191 = vadd.xlane.f32.xlu1 %v1190_v50  ;;  %1194 = vadd.xlane.f32.xlu0 %v1193_v43  ;;  %v1196_v53 = vsel %vm1065_vm1, %v1158_v47, 0.0  ;;  %v1320_v47 = vld [vmem:[%s9350_s21 + $0x8] sm:$0xff] }
  0xdb   : > { %v1113_v52 = vpop.xlane.xlu1 %1112  ;;  %v1129_v54 = vmul.f32 0.03125, %v1110_v51  ;;  %v1159_v56 = vmul.f32 %v9565_v48, %v9565_v48  ;;  %v8136_v50 = vpack.c.bf16 %v1320_v47, %v1319_v46  ;;  %v1321_v51 = vld [vmem:[%s9350_s21 + $0x10] sm:$0xff] }
  0xdc   : > { %v1130_v55 = vmul.f32 0.03125, %v1113_v52  ;;  %v1160_v57 = vmul.f32 %v9567_v49, %v9567_v49  ;;  %v1322_v52 = vld [vmem:[%s9350_s21 + $0x18] sm:$0xff]  ;;  %s12230_s21 = scalar_lea.vmem %s12229_s20, %s9332_s3  ;;  %s12325_s20 = scalar_lea.vmem %s12133_s13, %s9332_s3 }
  0xdd   : > { %v9576_v58 = vsub.f32 %v9507_v6, %v1129_v54  ;;  %v1199_v60 = vsel %vm1065_vm1, %v1159_v56, 0.0  ;;  %8528 = vmatprep.subr.bf16.mxu1 %v8136_v50  ;;  %8137 = vmatprep.subr.bf16.mxu0 %v8136_v50  ;;  %v1523_v54 = vld [vmem:[%s9355_s2] sm:$0xff] }
  0xde   : > { %v9579_v59 = vsub.f32 %v9509_v7, %v1130_v55  ;;  %1197 = vadd.xlane.f32.xlu1 %v1196_v53  ;;  %1200 = vadd.xlane.f32.xlu0 %v1199_v60  ;;  %v1068_v61 = vpop.xlane.xlu0 %1067  ;;  %v1202_v62 = vsel %vm1065_vm1, %v1160_v57, 0.0  ;;  %v8140_v53 = vpack.c.bf16 %v1322_v52, %v1321_v51  ;;  %v1524_v55 = vld [vmem:[%s9355_s2 + $0x8] sm:$0xff]  ;;  %v1679_v57 = vld [vmem:[%s9364_s23] sm:$0xff]  ;;  %v1525_v52 = vld [vmem:[%s9355_s2 + $0x10] sm:$0xff] }
  0xdf   : > { %v1071_v63 = vpop.xlane.xlu1 %1070  ;;  %v1115_v0 = vmul.f32 0.03125, %v1068_v61  ;;  %v1161_v2 = vmul.f32 %v9576_v58, %v9576_v58  ;;  %8530 = vmatpush3.bf16.msra.mxu1 %v8136_v50  ;;  %8139 = vmatpush3.bf16.msra.mxu0 %v8136_v50  ;;  %v9643_v56 = vpack.c.bf16 %v1524_v55, %v1523_v54  ;;  %v1680_v60 = vld [vmem:[%s9364_s23 + $0x8] sm:$0xff] }
  0xe0   : > { %v1116_v1 = vmul.f32 0.03125, %v1071_v63  ;;  %v1162_v3 = vmul.f32 %v9579_v59, %v9579_v59  ;;  %8529 = vmatprep.subr.bf16.mxu1 %v8140_v53  ;;  %8141 = vmatprep.subr.bf16.mxu0 %v8140_v53  ;;  %v9648_v61 = vpack.c.bf16 %v1680_v60, %v1679_v57 }
  0xe1   : > { %v9588_v4 = vsub.f32 %v9515_v10, %v1115_v0  ;;  %v1205_v6 = vsel %vm1065_vm1, %v1161_v2, 0.0 }
  0xe2   : > { %v9591_v5 = vsub.f32 %v9517_v11, %v1116_v1  ;;  %1203 = vadd.xlane.f32.xlu1 %v1202_v62  ;;  %1206 = vadd.xlane.f32.xlu0 %v1205_v6  ;;  %v1074_v7 = vpop.xlane.xlu0 %1073  ;;  %v1208_v8 = vsel %vm1065_vm1, %v1162_v3, 0.0 }
  0xe3   : > { %v1077_v9 = vpop.xlane.xlu1 %1076  ;;  %v1117_v12 = vmul.f32 0.03125, %v1074_v7  ;;  %v1147_v16 = vmul.f32 %v9588_v4, %v9588_v4  ;;  %8531 = vmatpush3.bf16.msra.mxu1 %v8140_v53  ;;  %8143 = vmatpush3.bf16.msra.mxu0 %v8140_v53  ;;  %v1526_v53 = vld [vmem:[%s9355_s2 + $0x18] sm:$0xff]  ;;  %s9198_s2 = smov 16  }
  0xe4   : > { %v1118_v13 = vmul.f32 0.03125, %v1077_v9  ;;  %v1148_v10 = vmul.f32 %v9591_v5, %v9591_v5  ;;  %8145 = vmatprep.subr.bf16.mxu1 %v9643_v56  ;;  %8153 = vmatprep.subr.bf16.mxu0 %v9648_v61 }
  0xe5   : > { %v9600_v17 = vsub.f32 %v9523_v14, %v1117_v12  ;;  %v1163_v20 = vsel %vm1065_vm1, %v1147_v16, 0.0 }
  0xe6   : > { %v9603_v11 = vsub.f32 %v9525_v15, %v1118_v13  ;;  %1209 = vadd.xlane.f32.xlu1 %v1208_v8  ;;  %1164 = vadd.xlane.f32.xlu0 %v1163_v20  ;;  %v1080_v21 = vpop.xlane.xlu0 %1079  ;;  %v1166_v24 = vsel %vm1065_vm1, %v1148_v10, 0.0 }
  0xe7   : > { %v1083_v25 = vpop.xlane.xlu1 %1082  ;;  %v1119_v26 = vmul.f32 0.03125, %v1080_v21  ;;  %v1149_v28 = vmul.f32 %v9600_v17, %v9600_v17 }
  0xe8   : > { %v1120_v27 = vmul.f32 0.03125, %v1083_v25  ;;  %v1150_v14 = vmul.f32 %v9603_v11, %v9603_v11 }
  0xe9   : > { %v9612_v29 = vsub.f32 %v9531_v18, %v1119_v26  ;;  %v1169_v32 = vsel %vm1065_vm1, %v1149_v28, 0.0 }
  0xea   : > { %v9615_v15 = vsub.f32 %v9533_v19, %v1120_v27  ;;  %1167 = vadd.xlane.f32.xlu1 %v1166_v24  ;;  %1170 = vadd.xlane.f32.xlu0 %v1169_v32  ;;  %v1086_v33 = vpop.xlane.xlu0 %1085  ;;  %v1172_v34 = vsel %vm1065_vm1, %v1150_v14, 0.0  ;;  %v9656_v32 = vld [vmem:[%s12225_s22] ss:$0 sm:$0xff] }
  0xeb   : > { %v1089_v35 = vpop.xlane.xlu1 %1088  ;;  %v1121_v36 = vmul.f32 0.03125, %v1086_v33  ;;  %v1151_v40 = vmul.f32 %v9612_v29, %v9612_v29 }
  0xec   : > { %v1122_v37 = vmul.f32 0.03125, %v1089_v35  ;;  %v1152_v18 = vmul.f32 %v9615_v15, %v9615_v15 }
  0xed   : > { %v9624_v19 = vsub.f32 %v9539_v22, %v1121_v36  ;;  %v1175_v42 = vsel %vm1065_vm1, %v1151_v40, 0.0  ;;  %v9664_v40 = vld [vmem:[%s12227_s30] ss:$0 sm:$0xff]  ;;  %s9197_s30 = smov 8  }
  0xee   : > { %v9627_v41 = vsub.f32 %v9541_v23, %v1122_v37  ;;  %1173 = vadd.xlane.f32.xlu1 %v1172_v34  ;;  %1176 = vadd.xlane.f32.xlu0 %v1175_v42  ;;  %v1178_v43 = vsel %vm1065_vm1, %v1152_v18, 0.0 }
  0xef   : > { %v1153_v44 = vmul.f32 %v9624_v19, %v9624_v19 }
  0xf0   : > { %v1154_v45 = vmul.f32 %v9627_v41, %v9627_v41 }
  0xf1   : > { %v1181_v22 = vsel %vm1065_vm1, %v1153_v44, 0.0 }
  0xf2   : > { %1179 = vadd.xlane.f32.xlu1 %v1178_v43  ;;  %1182 = vadd.xlane.f32.xlu0 %v1181_v22  ;;  %v1184_v23 = vsel %vm1065_vm1, %v1154_v45, 0.0 }
  0xf6   : > { %1185 = vadd.xlane.f32.xlu1 %v1184_v23 }
 0x163   : > { %v1189_v62 = vpop.xlane.xlu0 %1188 }
 0x164   : > { %v1219_v63 = vmul.f32 0.03125, %v1189_v62 }
 0x166   : > { %v1235_v0 = vadd.f32 1e-05, %v1219_v63 }
 0x167   : > { %v1192_v1 = vpop.xlane.xlu1 %1191  ;;  %v1195_v2 = vpop.xlane.xlu0 %1194 }
 0x168   : > { %8802 = vrsqrt.f32 %v1235_v0  ;;  %v1220_v3 = vmul.f32 0.03125, %v1192_v1  ;;  %v1221_v6 = vmul.f32 0.03125, %v1195_v2  ;;  %v8148_v2 = vpack.c.bf16 %v1526_v53, %v1525_v52  ;;  %v1681_v52 = vld [vmem:[%s9364_s23 + $0x10] sm:$0xff]  ;;  %v1682_v53 = vld [vmem:[%s9364_s23 + $0x18] sm:$0xff] }
 0x16a   : > { %v1236_v7 = vadd.f32 1e-05, %v1220_v3  ;;  %v1237_v8 = vadd.f32 1e-05, %v1221_v6 }
 0x16b   : > { %v1198_v9 = vpop.xlane.xlu1 %1197  ;;  %v1201_v12 = vpop.xlane.xlu0 %1200 }
 0x16c   : > { %8804 = vrsqrt.f32 %v1236_v7  ;;  %v1222_v13 = vmul.f32 0.03125, %v1198_v9  ;;  %v1223_v16 = vmul.f32 0.03125, %v1201_v12 }
 0x16d   : > { %8806 = vrsqrt.f32 %v1237_v8 }
 0x16e   : > { %v1238_v10 = vadd.f32 1e-05, %v1222_v13  ;;  %v1239_v20 = vadd.f32 1e-05, %v1223_v16 }
 0x16f   : > { %v1204_v21 = vpop.xlane.xlu1 %1203  ;;  %v1207_v24 = vpop.xlane.xlu0 %1206 }
 0x170   : > { %8808 = vrsqrt.f32 %v1238_v10  ;;  %v1224_v25 = vmul.f32 0.03125, %v1204_v21  ;;  %v1225_v26 = vmul.f32 0.03125, %v1207_v24 }
 0x171   : > { %8810 = vrsqrt.f32 %v1239_v20 }
 0x172   : > { %v8803_v27 = vpop.eup %8802  ;;  %v1240_v28 = vadd.f32 1e-05, %v1224_v25  ;;  %v1241_v14 = vadd.f32 1e-05, %v1225_v26 }
 0x173   : > { %v1210_v33 = vpop.xlane.xlu1 %1209  ;;  %v1165_v34 = vpop.xlane.xlu0 %1164  ;;  %v1267_v35 = vmul.f32 %v8803_v27, %v9547_v30 }
 0x174   : > { %8812 = vrsqrt.f32 %v1240_v28  ;;  %v1226_v36 = vmul.f32 0.03125, %v1210_v33  ;;  %v1211_v37 = vmul.f32 0.03125, %v1165_v34 }
 0x175   : > { %8814 = vrsqrt.f32 %v1241_v14  ;;  %v1289_v18 = vmul.f32 %v9656_v32, %v1267_v35 }
 0x176   : > { %v8805_v42 = vpop.eup %8804  ;;  %v1242_v43 = vadd.f32 1e-05, %v1226_v36  ;;  %v1227_v44 = vadd.f32 1e-05, %v1211_v37 }
 0x177   : > { %v8807_v45 = vpop.eup %8806  ;;  %v1168_v22 = vpop.xlane.xlu1 %1167  ;;  %v9668_v23 = vadd.f32 %v9664_v40, %v1289_v18  ;;  %v1268_v46 = vmul.f32 %v8805_v42, %v9555_v38 }
 0x178   : > { %v1171_v30 = vpop.xlane.xlu0 %1170  ;;  %8816 = vrsqrt.f32 %v1242_v43  ;;  %v1212_v47 = vmul.f32 0.03125, %v1168_v22  ;;  %v1269_v51 = vmul.f32 %v8807_v45, %v9549_v31 }
 0x179   : > { %v1213_v50 = vmul.f32 0.03125, %v1171_v30  ;;  %8818 = vrsqrt.f32 %v1227_v44  ;;  %7492 = vmatprep.mubr.msk.f32.mxu1 %vm1065_vm1, %v9668_v23  ;;  %v1290_v54 = vmul.f32 %v9656_v32, %v1268_v46 }
 0x17a   : > { %v8809_v55 = vpop.eup %8808  ;;  %v1228_v57 = vadd.f32 1e-05, %v1212_v47  ;;  %v1291_v62 = vmul.f32 %v9656_v32, %v1269_v51 }
 0x17b   : > { %v1229_v60 = vadd.f32 1e-05, %v1213_v50  ;;  %v8811_v63 = vpop.eup %8810  ;;  %v1174_v38 = vpop.xlane.xlu1 %1173  ;;  %v9679_v1 = vadd.f32 %v9664_v40, %v1290_v54  ;;  %v1270_v31 = vmul.f32 %v8809_v55, %v9557_v39 }
 0x17c   : > { %v1177_v0 = vpop.xlane.xlu0 %1176  ;;  %8820 = vrsqrt.f32 %v1228_v57  ;;  %v1214_v3 = vmul.f32 0.03125, %v1174_v38  ;;  %v9683_v7 = vadd.f32 %v9664_v40, %v1291_v62  ;;  %v1271_v9 = vmul.f32 %v8811_v63, %v9565_v48 }
 0x17d   : > { %v1215_v6 = vmul.f32 0.03125, %v1177_v0  ;;  %8822 = vrsqrt.f32 %v1229_v60  ;;  %7493 = vmatmul.mubr.msk.f32.vlgmr.msra.gmra.mrb[0].mxu1 %vm1065_vm1, %v9679_v1  ;;  %v1292_v8 = vmul.f32 %v9656_v32, %v1270_v31  ;;  %v8156_v63 = vpack.c.bf16 %v1682_v53, %v1681_v52 }
 0x17e   : > { %v8813_v12 = vpop.eup %8812  ;;  %v1230_v13 = vadd.f32 1e-05, %v1214_v3  ;;  %7495 = vmatprep.mubr.msk.f32.mxu1 %vm1065_vm1, %v9683_v7  ;;  %8147 = vmatpush3.bf16.msra.mxu1 %v9643_v56  ;;  %v1293_v24 = vmul.f32 %v9656_v32, %v1271_v9 }
 0x17f   : > { %v1231_v16 = vadd.f32 1e-05, %v1215_v6  ;;  %v8815_v39 = vpop.eup %8814  ;;  %v1180_v10 = vpop.xlane.xlu1 %1179  ;;  %v9693_v21 = vadd.f32 %v9664_v40, %v1292_v8  ;;  %v1272_v25 = vmul.f32 %v8813_v12, %v9567_v49  ;;  %8149 = vmatprep.subr.bf16.mxu1 %v8148_v2 }
 0x180   : > { %v1183_v20 = vpop.xlane.xlu0 %1182  ;;  %8824 = vrsqrt.f32 %v1230_v13  ;;  %v1216_v48 = vmul.f32 0.03125, %v1180_v10  ;;  %v1273_v27 = vmul.f32 %v8815_v39, %v9576_v58  ;;  %v9701_v56 = vadd.f32 %v9664_v40, %v1293_v24 }
 0x181   : > { %v1217_v26 = vmul.f32 0.03125, %v1183_v20  ;;  %8826 = vrsqrt.f32 %v1231_v16  ;;  %7496 = vmatmul.mubr.msk.f32.gmra.mrb[2].mxu1 %vm1065_vm1, %v9693_v21  ;;  %v1294_v28 = vmul.f32 %v9656_v32, %v1272_v25 }
 0x182   : > { %v8817_v14 = vpop.eup %8816  ;;  %v1232_v33 = vadd.f32 1e-05, %v1216_v48  ;;  %v1295_v49 = vmul.f32 %v9656_v32, %v1273_v27  ;;  %8151 = vmatpush3.bf16.msra.mxu1 %v8148_v2  ;;  %7498 = vmatprep.mubr.msk.f32.mxu1 %vm1065_vm1, %v9701_v56 }
 0x183   : > { %v1233_v34 = vadd.f32 1e-05, %v1217_v26  ;;  %v8819_v35 = vpop.eup %8818  ;;  %v1186_v58 = vpop.xlane.xlu1 %1185  ;;  %v9708_v36 = vadd.f32 %v9664_v40, %v1294_v28  ;;  %v1274_v37 = vmul.f32 %v8817_v14, %v9579_v59  ;;  %v9843_v14 = vld [vmem:[%s12230_s21] ss:$0 sm:$0xff] }
 0x184   : > { %8828 = vrsqrt.f32 %v1232_v33  ;;  %v1218_v18 = vmul.f32 0.03125, %v1186_v58  ;;  %v9712_v42 = vadd.f32 %v9664_v40, %v1295_v49  ;;  %v1259_v43 = vmul.f32 %v8819_v35, %v9588_v4 }
 0x185   : > { %8830 = vrsqrt.f32 %v1233_v34  ;;  %7499 = vmatmul.mubr.msk.f32.gmra.mrb[4].mxu1 %vm1065_vm1, %v9708_v36  ;;  %v1296_v44 = vmul.f32 %v9656_v32, %v1274_v37 }
 0x186   : > { %v8821_v45 = vpop.eup %8820  ;;  %v1234_v22 = vadd.f32 1e-05, %v1218_v18  ;;  %7501 = vmatprep.mubr.msk.f32.mxu1 %vm1065_vm1, %v9712_v42  ;;  %v1281_v59 = vmul.f32 %v9656_v32, %v1259_v43 }
 0x187   : > { %v8823_v30 = vpop.eup %8822  ;;  %v9722_v46 = vadd.f32 %v9664_v40, %v1296_v44  ;;  %v1260_v4 = vmul.f32 %v8821_v45, %v9591_v5 }
 0x188   : > { %8832 = vrsqrt.f32 %v1234_v22  ;;  %v1303_v47 = vadd.f32 %v9664_v40, %v1281_v59  ;;  %v1261_v50 = vmul.f32 %v8823_v30, %v9600_v17 }
 0x189   : > { %7502 = vmatmul.mubr.msk.f32.gmra.mrb[6].mxu1 %vm1065_vm1, %v9722_v46  ;;  %v1282_v51 = vmul.f32 %v9656_v32, %v1260_v4 }
 0x18a   : > { %v8825_v54 = vpop.eup %8824  ;;  %7480 = vmatprep.mubr.msk.f32.mxu0 %vm1065_vm1, %v1303_v47  ;;  %7512 = vmatprep.mubr.msk.f32.mxu1 %vm1065_vm1, %v1303_v47  ;;  %v1283_v55 = vmul.f32 %v9656_v32, %v1261_v50 }
 0x18b   : > { %v8827_v5 = vpop.eup %8826  ;;  %v1304_v57 = vadd.f32 %v9664_v40, %v1282_v51  ;;  %v1262_v60 = vmul.f32 %v8825_v54, %v9603_v11 }
 0x18c   : > { %v1305_v17 = vadd.f32 %v9664_v40, %v1283_v55  ;;  %v1263_v62 = vmul.f32 %v8827_v5, %v9612_v29 }
 0x18d   : > { %7481 = vmatmul.mubr.msk.f32.vlgmr.msra.gmra.mrb[0].mxu0 %vm1065_vm1, %v1304_v57  ;;  %7513 = vmatmul.mubr.msk.f32.vlgmr.msra.gmra.mrb[8].mxu1 %vm1065_vm1, %v1304_v57  ;;  %v1284_v38 = vmul.f32 %v9656_v32, %v1262_v60 }
 0x18e   : > { %v8829_v0 = vpop.eup %8828  ;;  %7483 = vmatprep.mubr.msk.f32.mxu0 %vm1065_vm1, %v1305_v17  ;;  %7515 = vmatprep.mubr.msk.f32.mxu1 %vm1065_vm1, %v1305_v17  ;;  %v1285_v31 = vmul.f32 %v9656_v32, %v1263_v62 }
 0x18f   : > { %v8831_v2 = vpop.eup %8830  ;;  %v1306_v11 = vadd.f32 %v9664_v40, %v1284_v38  ;;  %v1264_v3 = vmul.f32 %v8829_v0, %v9615_v15  ;;  %8155 = vmatpush3.bf16.msra.mxu0 %v9648_v61 }
 0x190   : > { %v1307_v29 = vadd.f32 %v9664_v40, %v1285_v31  ;;  %v1265_v6 = vmul.f32 %v8831_v2, %v9624_v19  ;;  %8157 = vmatprep.subr.bf16.mxu0 %v8156_v63 }
 0x191   : > { %7484 = vmatmul.mubr.msk.f32.gmra.mrb[2].mxu0 %vm1065_vm1, %v1306_v11  ;;  %7516 = vmatmul.mubr.msk.f32.gmra.mrb[10].mxu1 %vm1065_vm1, %v1306_v11  ;;  %v1286_v8 = vmul.f32 %v9656_v32, %v1264_v3 }
 0x192   : > { %v8833_v9 = vpop.eup %8832  ;;  %7486 = vmatprep.mubr.msk.f32.mxu0 %vm1065_vm1, %v1307_v29  ;;  %7518 = vmatprep.mubr.msk.f32.mxu1 %vm1065_vm1, %v1307_v29  ;;  %v1287_v15 = vmul.f32 %v9656_v32, %v1265_v6  ;;  %v9908_v6 = vld [vmem:[%s12233_s8] ss:$0 sm:$0xff]  ;;  %s12327_s8 = scalar_lea.vmem %s12136_s16, %s9332_s3  ;;  %s12328_s3 = sld [smem:[#allocation3_spill]] }
 0x193   : > { %v1308_v61 = vadd.f32 %v9664_v40, %v1286_v8  ;;  %v1266_v12 = vmul.f32 %v8833_v9, %v9627_v41  ;;  %8159 = vmatpush3.bf16.msra.mxu0 %v8156_v63  ;;  %v9812_v41 = vld [vmem:[%s12228_s25] ss:$0 sm:$0xff] }
 0x194   : > { %v1309_v19 = vadd.f32 %v9664_v40, %v1287_v15 }
 0x195   : > { %7487 = vmatmul.mubr.msk.f32.gmra.mrb[4].mxu0 %vm1065_vm1, %v1308_v61  ;;  %7519 = vmatmul.mubr.msk.f32.gmra.mrb[12].mxu1 %vm1065_vm1, %v1308_v61  ;;  %v1288_v13 = vmul.f32 %v9656_v32, %v1266_v12 }
 0x196   : > { %7489 = vmatprep.mubr.msk.f32.mxu0 %vm1065_vm1, %v1309_v19  ;;  %7521 = vmatprep.mubr.msk.f32.mxu1 %vm1065_vm1, %v1309_v19 }
 0x197   : > { %v1310_v16 = vadd.f32 %v9664_v40, %v1288_v13 }
 0x198   : > { %p7071_p6 = scmp.ne.s32.totalorder %s12328_s3, 1 }
 0x199   : > { %7490 = vmatmul.mubr.msk.f32.gmra.mrb[6].mxu0 %vm1065_vm1, %v1310_v16  ;;  %7522 = vmatmul.mubr.msk.f32.gmra.mrb[14].mxu1 %vm1065_vm1, %v1310_v16  ;;  %s12330_s25 = sld [smem:[#allocation54_spill]] (!%p7071_p6)  ;;  %s12331_s11 = sld [smem:[#allocation55_spill]] (!%p7071_p6) }
 0x19a   : > { %7524 = vmatprep.mubr.msk.f32.mxu1 %vm1065_vm1, %v9668_v23  ;;  %7544 = vmatprep.mubr.msk.f32.mxu0 %vm1065_vm1, %v1303_v47 }
 0x19d   : > { %7525 = vmatmul.mubr.msk.f32.gmra.mrb[16].mxu1 %vm1065_vm1, %v9679_v1  ;;  %7545 = vmatmul.mubr.msk.f32.vlgmr.msra.gmra.mrb[8].mxu0 %vm1065_vm1, %v1304_v57 }
 0x19e   : > { %7527 = vmatprep.mubr.msk.f32.mxu1 %vm1065_vm1, %v9683_v7  ;;  %7547 = vmatprep.mubr.msk.f32.mxu0 %vm1065_vm1, %v1305_v17 }
 0x1a1   : > { %7528 = vmatmul.mubr.msk.f32.gmra.mrb[18].mxu1 %vm1065_vm1, %v9693_v21  ;;  %7548 = vmatmul.mubr.msk.f32.gmra.mrb[10].mxu0 %vm1065_vm1, %v1306_v11 }
 0x1a2   : > { %7530 = vmatprep.mubr.msk.f32.mxu1 %vm1065_vm1, %v9701_v56  ;;  %7550 = vmatprep.mubr.msk.f32.mxu0 %vm1065_vm1, %v1307_v29 }
 0x1a5   : > { %7531 = vmatmul.mubr.msk.f32.gmra.mrb[20].mxu1 %vm1065_vm1, %v9708_v36  ;;  %7551 = vmatmul.mubr.msk.f32.gmra.mrb[12].mxu0 %vm1065_vm1, %v1308_v61 }
 0x1a6   : > { %7533 = vmatprep.mubr.msk.f32.mxu1 %vm1065_vm1, %v9712_v42  ;;  %7553 = vmatprep.mubr.msk.f32.mxu0 %vm1065_vm1, %v1309_v19 }
 0x1a9   : > { %7534 = vmatmul.mubr.msk.f32.gmra.mrb[22].mxu1 %vm1065_vm1, %v9722_v46  ;;  %7554 = vmatmul.mubr.msk.f32.gmra.mrb[14].mxu0 %vm1065_vm1, %v1310_v16 }
 0x1aa   : > { %7556 = vmatprep.mubr.msk.f32.mxu0 %vm1065_vm1, %v9668_v23 }
 0x1ad   : > { %7557 = vmatmul.mubr.msk.f32.gmra.mrb[16].mxu0 %vm1065_vm1, %v9679_v1 }
 0x1ae   : > { %7559 = vmatprep.mubr.msk.f32.mxu0 %vm1065_vm1, %v9683_v7 }
 0x1b1   : > { %7560 = vmatmul.mubr.msk.f32.gmra.mrb[18].mxu0 %vm1065_vm1, %v9693_v21 }
 0x1b2   : > { %7562 = vmatprep.mubr.msk.f32.mxu0 %vm1065_vm1, %v9701_v56 }
 0x1b5   : > { %7563 = vmatmul.mubr.msk.f32.gmra.mrb[20].mxu0 %vm1065_vm1, %v9708_v36 }
 0x1b6   : > { %7565 = vmatprep.mubr.msk.f32.mxu0 %vm1065_vm1, %v9712_v42 }
 0x1b9   : > { %7566 = vmatmul.mubr.msk.f32.gmra.mrb[22].mxu0 %vm1065_vm1, %v9722_v46 }
 0x250   : > { %v7494_v32 = vpop.f32.mrb[0].mxu1 }
 0x251   : > { %v9815_v40 = vadd.f32 %v7494_v32, %v9812_v41  ;;  %v1484_v23 = vpop.f32.mrb[1].mxu1 }
 0x252   : > { %v9818_v1 = vadd.f32 %v9812_v41, %v1484_v23 }
 0x254   : > { %v7497_v7 = vpop.f32.mrb[2].mxu1 }
 0x255   : > { %v9821_v39 = vadd.f32 %v7497_v7, %v9812_v41  ;;  %v1494_v10 = vpop.f32.mrb[3].mxu1 }
 0x256   : > { %v9824_v20 = vadd.f32 %v9812_v41, %v1494_v10 }
 0x258   : > { %v7500_v21 = vpop.f32.mrb[4].mxu1 }
 0x259   : > { %v9827_v24 = vadd.f32 %v7500_v21, %v9812_v41  ;;  %v1504_v25 = vpop.f32.mrb[5].mxu1 }
 0x25a   : > { %v9830_v48 = vadd.f32 %v9812_v41, %v1504_v25 }
 0x25c   : > { %v7503_v26 = vpop.f32.mrb[6].mxu1 }
 0x25d   : > { %v9833_v27 = vadd.f32 %v7503_v26, %v9812_v41  ;;  %v1514_v56 = vpop.f32.mrb[7].mxu1 }
 0x25e   : > { %v9836_v28 = vadd.f32 %v9812_v41, %v1514_v56 }
 0x260   : > { %v7482_v33 = vpop.f32.mrb[0].mxu0  ;;  %v7514_v34 = vpop.f32.mrb[8].mxu1 }
 0x261   : > { %v9846_v49 = vadd.f32 %v7482_v33, %v9812_v41  ;;  %v1606_v35 = vadd.f32 %v7514_v34, %v9843_v14  ;;  %v1444_v58 = vpop.f32.mrb[1].mxu0  ;;  %v1600_v36 = vpop.f32.mrb[9].mxu1 }
 0x262   : > { %v9850_v37 = vadd.f32 %v9812_v41, %v1444_v58  ;;  %v1601_v18 = vadd.f32 %v9843_v14, %v1600_v36 }
 0x263   : > { %1845 = vrot.lane.b32.xlu1 %v9846_v49, %s9194_s4 }
 0x264   : > { %v7485_v43 = vpop.f32.mrb[2].mxu0  ;;  %v7517_v44 = vpop.f32.mrb[10].mxu1  ;;  %7584 = vmatprep.mubr.msk.f32.mxu1 %vm2219_vm2, %v9850_v37  ;;  %v9863_v45 = vpack.i.bf16 %v1606_v35, %v1601_v18  ;;  %v8160_v22 = vpack.c.bf16 %v1606_v35, %v1601_v18 }
 0x265   : > { %v9866_v59 = vadd.f32 %v7485_v43, %v9812_v41  ;;  %v1616_v30 = vadd.f32 %v7517_v44, %v9843_v14  ;;  %v1454_v46 = vpop.f32.mrb[3].mxu0  ;;  %v1610_v4 = vpop.f32.mrb[11].mxu1 }
 0x266   : > { %v1611_v47 = vadd.f32 %v9843_v14, %v1610_v4  ;;  %8563 = vrot.lane.b32.xlu0 %v9863_v45, %s9194_s4  ;;  %8162 = vmatprep.subr.msk.bf16.mxu1 %vm9857_vm3, %v8160_v22  ;;  %v9890_v17 = vadd.f32 %v9812_v41, %v1454_v46 }
 0x267   : > { %8165 = vmatpush3.bf16.xpose.msk.msra.mxu1 %vm9857_vm3, %v8160_v22  ;;  %1849 = vrot.lane.b32.xlu1 %v9866_v59, %s9194_s4 }
 0x268   : > { %v7488_v50 = vpop.f32.mrb[4].mxu0  ;;  %v7520_v51 = vpop.f32.mrb[12].mxu1  ;;  %v8166_v52 = vpack.c.bf16 %v1616_v30, %v1611_v47  ;;  %v9878_v53 = vpack.i.bf16 %v1616_v30, %v1611_v47 }
 0x269   : > { %v9881_v54 = vadd.f32 %v7488_v50, %v9812_v41  ;;  %v1626_v55 = vadd.f32 %v7520_v51, %v9843_v14  ;;  %v1464_v5 = vpop.f32.mrb[5].mxu0  ;;  %v1620_v57 = vpop.f32.mrb[13].mxu1 }
 0x26a   : > { %v1621_v60 = vadd.f32 %v9843_v14, %v1620_v57  ;;  %1843 = vrot.lane.b32.xlu0 %v9850_v37, %s9194_s4  ;;  %8168 = vmatprep.subr.msk.bf16.mxu1 %vm9857_vm3, %v8166_v52  ;;  %v9911_v8 = vadd.f32 %v9812_v41, %v1464_v5 }
 0x26b   : > { %1853 = vrot.lane.b32.xlu1 %v9881_v54, %s9194_s4 }
 0x26c   : > { %v7491_v62 = vpop.f32.mrb[6].mxu0  ;;  %v7523_v63 = vpop.f32.mrb[14].mxu1  ;;  %v8172_v38 = vpack.c.bf16 %v1626_v55, %v1621_v60  ;;  %v9894_v0 = vpack.i.bf16 %v1626_v55, %v1621_v60 }
 0x26d   : > { %v9897_v31 = vadd.f32 %v7491_v62, %v9812_v41  ;;  %v1636_v2 = vadd.f32 %v7523_v63, %v9843_v14  ;;  %v1474_v11 = vpop.f32.mrb[7].mxu0  ;;  %v1630_v3 = vpop.f32.mrb[15].mxu1 }
 0x26e   : > { %v1631_v29 = vadd.f32 %v9843_v14, %v1630_v3  ;;  %1847 = vrot.lane.b32.xlu0 %v9890_v17, %s9194_s4  ;;  %v9928_v10 = vadd.f32 %v9812_v41, %v1474_v11 }
 0x26f   : > { %8171 = vmatpush3.bf16.xpose.msk.msra.mxu1 %vm9857_vm3, %v8166_v52  ;;  %1857 = vrot.lane.b32.xlu1 %v9897_v31, %s9194_s4 }
 0x270   : > { %v7526_v9 = vpop.f32.mrb[16].mxu1  ;;  %v7546_v15 = vpop.f32.mrb[8].mxu0  ;;  %8174 = vmatprep.subr.msk.bf16.mxu1 %vm9857_vm3, %v8172_v38  ;;  %v8178_v61 = vpack.c.bf16 %v1636_v2, %v1631_v29  ;;  %v9919_v12 = vpack.i.bf16 %v1636_v2, %v1631_v29 }
 0x271   : > { %v1646_v19 = vadd.f32 %v7526_v9, %v9843_v14  ;;  %v1762_v13 = vadd.f32 %v7546_v15, %v9908_v6  ;;  %v1640_v16 = vpop.f32.mrb[17].mxu1  ;;  %v1756_v32 = vpop.f32.mrb[9].mxu0 }
 0x272   : > { %v1641_v23 = vadd.f32 %v9843_v14, %v1640_v16  ;;  %v1757_v7 = vadd.f32 %v9908_v6, %v1756_v32  ;;  %1851 = vrot.lane.b32.xlu0 %v9911_v8, %s9194_s4 }
 0x273   : > { %1859 = vrot.lane.b32.xlu1 %v9850_v37, %s9195_s9 }
 0x274   : > { %v7529_v21 = vpop.f32.mrb[18].mxu1  ;;  %v7549_v25 = vpop.f32.mrb[10].mxu0  ;;  %v9932_v26 = vpack.i.bf16 %v1646_v19, %v1641_v23  ;;  %v9934_v56 = vpack.i.bf16 %v1762_v13, %v1757_v7  ;;  %v9942_v18 = vpack.c.bf16 %v1646_v19, %v1641_v23  ;;  %v9944_v43 = vpack.c.bf16 %v1762_v13, %v1757_v7 }
 0x275   : > { %v1656_v33 = vadd.f32 %v7529_v21, %v9843_v14  ;;  %v1772_v34 = vadd.f32 %v7549_v25, %v9908_v6  ;;  %v1650_v35 = vpop.f32.mrb[19].mxu1  ;;  %v1766_v58 = vpop.f32.mrb[11].mxu0 }
 0x276   : > { %v1651_v36 = vadd.f32 %v9843_v14, %v1650_v35  ;;  %v1767_v41 = vadd.f32 %v9908_v6, %v1766_v58  ;;  %1855 = vrot.lane.b32.xlu0 %v9928_v10, %s9194_s4 }
 0x277   : > { %8177 = vmatpush3.bf16.xpose.msk.msra.mxu1 %vm9857_vm3, %v8172_v38  ;;  %1875 = vrot.lane.b32.xlu1 %v9850_v37, %s9196_s1 }
 0x278   : > { %v7532_v44 = vpop.f32.mrb[20].mxu1  ;;  %v7552_v22 = vpop.f32.mrb[12].mxu0  ;;  %8180 = vmatprep.subr.msk.bf16.mxu1 %vm9857_vm3, %v8178_v61  ;;  %v9952_v30 = vpack.i.bf16 %v1656_v33, %v1651_v36  ;;  %v9954_v46 = vpack.i.bf16 %v1772_v34, %v1767_v41  ;;  %v9962_v37 = vpack.c.bf16 %v1656_v33, %v1651_v36  ;;  %v9964_v5 = vpack.c.bf16 %v1772_v34, %v1767_v41 }
 0x279   : > { %v1666_v4 = vadd.f32 %v7532_v44, %v9843_v14  ;;  %v1782_v47 = vadd.f32 %v7552_v22, %v9908_v6  ;;  %v1660_v50 = vpop.f32.mrb[21].mxu1  ;;  %v1776_v51 = vpop.f32.mrb[13].mxu0 }
 0x27a   : > { %v1661_v52 = vadd.f32 %v9843_v14, %v1660_v50  ;;  %v1777_v55 = vadd.f32 %v9908_v6, %v1776_v51  ;;  %1861 = vrot.lane.b32.xlu0 %v9846_v49, %s9195_s9 }
 0x27b   : > { %1863 = vrot.lane.b32.xlu1 %v9890_v17, %s9195_s9 }
 0x27c   : > { %v7535_v57 = vpop.f32.mrb[22].mxu1  ;;  %v7555_v60 = vpop.f32.mrb[14].mxu0  ;;  %v9968_v62 = vpack.i.bf16 %v1666_v4, %v1661_v52  ;;  %v9970_v63 = vpack.i.bf16 %v1782_v47, %v1777_v55  ;;  %v9978_v15 = vpack.c.bf16 %v1666_v4, %v1661_v52  ;;  %v9980_v19 = vpack.c.bf16 %v1782_v47, %v1777_v55 }
 0x27d   : > { %v1676_v38 = vadd.f32 %v7535_v57, %v9843_v14  ;;  %v1792_v2 = vadd.f32 %v7555_v60, %v9908_v6  ;;  %v1670_v11 = vpop.f32.mrb[23].mxu1  ;;  %v1786_v3 = vpop.f32.mrb[15].mxu0 }
 0x27e   : > { %v1671_v29 = vadd.f32 %v9843_v14, %v1670_v11  ;;  %v1787_v9 = vadd.f32 %v9908_v6, %v1786_v3  ;;  %8568 = vrot.lane.b32.xlu0 %v9863_v45, %s9195_s9 }
 0x27f   : > { %8183 = vmatpush3.bf16.xpose.msk.msra.mxu1 %vm9857_vm3, %v8178_v61  ;;  %8573 = vrot.lane.b32.xlu1 %v9863_v45, %s9196_s1 }
 0x280   : > { %v7558_v13 = vpop.f32.mrb[16].mxu0  ;;  %v9986_v16 = vpack.i.bf16 %v1676_v38, %v1671_v29  ;;  %v9988_v32 = vpack.i.bf16 %v1792_v2, %v1787_v9  ;;  %v9991_v7 = vpack.c.bf16 %v1676_v38, %v1671_v29  ;;  %v9996_v25 = vpack.c.bf16 %v1792_v2, %v1787_v9 }
 0x281   : > { %v1802_v14 = vadd.f32 %v7558_v13, %v9908_v6  ;;  %v1796_v23 = vpop.f32.mrb[17].mxu0 }
 0x282   : > { %v1797_v21 = vadd.f32 %v9908_v6, %v1796_v23  ;;  %1877 = vrot.lane.b32.xlu0 %v9846_v49, %s9196_s1 }
 0x283   : > { %8578 = vrot.lane.b32.xlu1 %v9878_v53, %s9194_s4 }
 0x284   : > { %v7561_v45 = vpop.f32.mrb[18].mxu0  ;;  %v10000_v61 = vpack.i.bf16 %v1802_v14, %v1797_v21  ;;  %v10002_v33 = vpack.c.bf16 %v1802_v14, %v1797_v21 }
 0x285   : > { %v1812_v34 = vadd.f32 %v7561_v45, %v9908_v6  ;;  %v1806_v35 = vpop.f32.mrb[19].mxu0 }
 0x286   : > { %12234 = vst [vmem:[#allocation7_spill] sm:$0xff] %v10002_v33  ;;  %v1807_v58 = vadd.f32 %v9908_v6, %v1806_v35  ;;  %7585 = vmatmul.mubr.msk.f32.vlgmr.msra.gmra.mrb[24].mxu1 %vm2219_vm2, %v9846_v49  ;;  %8583 = vrot.lane.b32.xlu0 %v9878_v53, %s9195_s9 }
 0x287   : > { %7587 = vmatprep.mubr.msk.f32.mxu1 %vm2219_vm2, %v9890_v17  ;;  %1879 = vrot.lane.b32.xlu1 %v9890_v17, %s9196_s1 }
 0x288   : > { %v7564_v36 = vpop.f32.mrb[20].mxu0  ;;  %v10014_v41 = vpack.i.bf16 %v1812_v34, %v1807_v58  ;;  %v10016_v44 = vpack.c.bf16 %v1812_v34, %v1807_v58 }
 0x289   : > { %v1822_v22 = vadd.f32 %v7564_v36, %v9908_v6  ;;  %v1816_v4 = vpop.f32.mrb[21].mxu0 }
 0x28a   : > { %12235 = vst [vmem:[#allocation8_spill] sm:$0xff] %v10016_v44  ;;  %v1817_v47 = vadd.f32 %v9908_v6, %v1816_v4  ;;  %7588 = vmatmul.mubr.msk.f32.gmra.mrb[26].mxu1 %vm2219_vm2, %v9866_v59  ;;  %1865 = vrot.lane.b32.xlu0 %v9866_v59, %s9195_s9 }
 0x28b   : > { %7590 = vmatprep.mubr.msk.f32.mxu1 %vm2219_vm2, %v9911_v8  ;;  %8588 = vrot.lane.b32.xlu1 %v9878_v53, %s9196_s1 }
 0x28c   : > { %v7567_v49 = vpop.f32.mrb[22].mxu0  ;;  %v10028_v17 = vpack.i.bf16 %v1822_v22, %v1817_v47  ;;  %v10030_v50 = vpack.c.bf16 %v1822_v22, %v1817_v47 }
 0x28d   : > { %v1832_v51 = vadd.f32 %v7567_v49, %v9908_v6  ;;  %v1826_v52 = vpop.f32.mrb[23].mxu0 }
 0x28e   : > { %12236 = vst [vmem:[#allocation9_spill] sm:$0xff] %v10028_v17  ;;  %12237 = vst [vmem:[#allocation10_spill] sm:$0xff] %v10030_v50  ;;  %v1827_v55 = vadd.f32 %v9908_v6, %v1826_v52  ;;  %7591 = vmatmul.mubr.msk.f32.gmra.mrb[28].mxu1 %vm2219_vm2, %v9881_v54  ;;  %8598 = vrot.lane.b32.xlu0 %v9894_v0, %s9195_s9 }
 0x28f   : > { %8593 = vrot.lane.b32.xlu1 %v9894_v0, %s9194_s4  ;;  %7593 = vmatprep.mubr.msk.f32.mxu1 %vm2219_vm2, %v9928_v10 }
 0x290   : > { %v10042_v53 = vpack.i.bf16 %v1832_v51, %v1827_v55  ;;  %v10044_v57 = vpack.c.bf16 %v1832_v51, %v1827_v55 }
 0x292   : > { %12238 = vst [vmem:[#allocation11_spill] sm:$0xff] %v10042_v53  ;;  %12239 = vst [vmem:[#allocation12_spill] sm:$0xff] %v10044_v57  ;;  %1881 = vrot.lane.b32.xlu0 %v9866_v59, %s9196_s1  ;;  %7594 = vmatmul.mubr.msk.f32.gmra.mrb[30].mxu1 %vm2219_vm2, %v9897_v31 }
 0x293   : > { %8603 = vrot.lane.b32.xlu1 %v9894_v0, %s9196_s1 }
 0x296   : > { %8613 = vrot.lane.b32.xlu0 %v9919_v12, %s9195_s9 }
 0x297   : > { %8608 = vrot.lane.b32.xlu1 %v9919_v12, %s9194_s4 }
 0x29a   : > { %1867 = vrot.lane.b32.xlu0 %v9911_v8, %s9195_s9 }
 0x29b   : > { %1869 = vrot.lane.b32.xlu1 %v9881_v54, %s9195_s9 }
 0x29e   : > { %8623 = vrot.lane.b32.xlu0 %v9932_v26, %s9194_s4 }
 0x29f   : > { %8618 = vrot.lane.b32.xlu1 %v9919_v12, %s9196_s1 }
 0x2a2   : > { %1883 = vrot.lane.b32.xlu0 %v9911_v8, %s9196_s1 }
 0x2a3   : > { %1885 = vrot.lane.b32.xlu1 %v9881_v54, %s9196_s1 }
 0x2a6   : > { %1871 = vrot.lane.b32.xlu0 %v9928_v10, %s9195_s9 }
 0x2a7   : > { %1873 = vrot.lane.b32.xlu1 %v9897_v31, %s9195_s9 }
 0x2aa   : > { %1887 = vrot.lane.b32.xlu0 %v9928_v10, %s9196_s1 }
 0x2ab   : > { %1889 = vrot.lane.b32.xlu1 %v9897_v31, %s9196_s1 }
 0x2ae   : > { %8633 = vrot.lane.b32.xlu0 %v9968_v62, %s9194_s4 }
 0x2af   : > { %8628 = vrot.lane.b32.xlu1 %v9952_v30, %s9194_s4 }
 0x2b2   : > { %8638 = vrot.lane.b32.xlu0 %v9932_v26, %s9195_s9 }
 0x2b3   : > { %8643 = vrot.lane.b32.xlu1 %v9932_v26, %s9196_s1 }
 0x2b6   : > { %1899 = vrot.lane.b32.xlu0 %v9818_v1, %s9194_s4 }
 0x2b7   : > { %1901 = vrot.lane.b32.xlu1 %v9815_v40, %s9194_s4 }
 0x2ba   : > { %8648 = vrot.lane.b32.xlu0 %v9952_v30, %s9195_s9 }
 0x2bb   : > { %8653 = vrot.lane.b32.xlu1 %v9952_v30, %s9196_s1 }
 0x2be   : > { %1903 = vrot.lane.b32.xlu0 %v9824_v20, %s9194_s4 }
 0x2bf   : > { %1905 = vrot.lane.b32.xlu1 %v9821_v39, %s9194_s4 }
 0x2c2   : > { %1907 = vrot.lane.b32.xlu0 %v9830_v48, %s9194_s4 }
 0x2c3   : > { %1909 = vrot.lane.b32.xlu1 %v9827_v24, %s9194_s4 }
 0x2c6   : > { %1911 = vrot.lane.b32.xlu0 %v9836_v28, %s9194_s4 }
 0x2c7   : > { %1913 = vrot.lane.b32.xlu1 %v9833_v27, %s9194_s4 }
 0x2ca   : > { %1915 = vrot.lane.b32.xlu0 %v9818_v1, %s9195_s9 }
 0x2cb   : > { %1917 = vrot.lane.b32.xlu1 %v9815_v40, %s9195_s9 }
 0x2ce   : > { %8658 = vrot.lane.b32.xlu0 %v9968_v62, %s9195_s9 }
 0x2cf   : > { %1933 = vrot.lane.b32.xlu1 %v9815_v40, %s9196_s1 }
 0x2d2   : > { %1931 = vrot.lane.b32.xlu0 %v9818_v1, %s9196_s1 }
 0x2d3   : > { %8663 = vrot.lane.b32.xlu1 %v9968_v62, %s9196_s1 }
 0x2d5   : > { %v10116_v59 = vpop.permute.xlu1 %1845 }
 0x2d6   : > { %8673 = vrot.lane.b32.xlu0 %v9986_v16, %s9195_s9 }
 0x2d7   : > { %8668 = vrot.lane.b32.xlu1 %v9986_v16, %s9194_s4 }
 0x2d8   : > { %v8564_v54 = vpop.permute.xlu0 %8563 }
 0x2d9   : > { %v8566_v0 = vunpack.i.h.bf16 %v8564_v54  ;;  %v8565_v31 = vunpack.i.l.bf16 %v8564_v54  ;;  %v10122_v6 = vpop.permute.xlu1 %1849 }
 0x2da   : > { %1919 = vrot.lane.b32.xlu0 %v9824_v20, %s9195_s9 }
 0x2db   : > { %v8184_v8 = vpack.c.bf16 %v8566_v0, %v8565_v31  ;;  %1921 = vrot.lane.b32.xlu1 %v9821_v39, %s9195_s9 }
 0x2dc   : > { %v1844_v12 = vpop.permute.xlu0 %1843 }
 0x2dd   : > { %v10128_v10 = vpop.permute.xlu1 %1853  ;;  %8186 = vmatprep.subr.msk.bf16.mxu0 %vm9857_vm3, %v8184_v8  ;;  %7612 = vmatprep.mubr.msk.f32.mxu0 %vm2219_vm2, %v1844_v12 }
 0x2de   : > { %1935 = vrot.lane.b32.xlu0 %v9824_v20, %s9196_s1  ;;  %8189 = vmatpush3.bf16.xpose.msk.msra.mxu0 %vm9857_vm3, %v8184_v8 }
 0x2df   : > { %1937 = vrot.lane.b32.xlu1 %v9821_v39, %s9196_s1 }
 0x2e0   : > { %v10139_v26 = vpop.permute.xlu0 %1847 }
 0x2e1   : > { %v10141_v30 = vpop.permute.xlu1 %1857 }
 0x2e2   : > { %1923 = vrot.lane.b32.xlu0 %v9830_v48, %s9195_s9 }
 0x2e3   : > { %1925 = vrot.lane.b32.xlu1 %v9827_v24, %s9195_s9 }
 0x2e4   : > { %v10147_v60 = vpop.permute.xlu0 %1851 }
 0x2e5   : > { %v1860_v62 = vpop.permute.xlu1 %1859 }
 0x2e6   : > { %1939 = vrot.lane.b32.xlu0 %v9830_v48, %s9196_s1  ;;  %7640 = vmatprep.mubr.msk.f32.mxu1 %vm2219_vm2, %v1860_v62 }
 0x2e7   : > { %1941 = vrot.lane.b32.xlu1 %v9827_v24, %s9196_s1 }
 0x2e8   : > { %v10154_v38 = vpop.permute.xlu0 %1855 }
 0x2e9   : > { %v10156_v2 = vpop.permute.xlu1 %1875 }
 0x2ea   : > { %1927 = vrot.lane.b32.xlu0 %v9836_v28, %s9195_s9 }
 0x2eb   : > { %1929 = vrot.lane.b32.xlu1 %v9833_v27, %s9195_s9 }
 0x2ec   : > { %v10162_v11 = vpop.permute.xlu0 %1861 }
 0x2ed   : > { %v10164_v3 = vpop.permute.xlu1 %1863 }
 0x2ee   : > { %1943 = vrot.lane.b32.xlu0 %v9836_v28, %s9196_s1 }
 0x2ef   : > { %1945 = vrot.lane.b32.xlu1 %v9833_v27, %s9196_s1 }
 0x2f0   : > { %v8569_v29 = vpop.permute.xlu0 %8568 }
 0x2f1   : > { %v8571_v9 = vunpack.i.h.bf16 %v8569_v29  ;;  %v8570_v13 = vunpack.i.l.bf16 %v8569_v29  ;;  %v10170_v14 = vpop.permute.xlu1 %8573 }
 0x2f2   : > { %8678 = vrot.lane.b32.xlu0 %v9934_v56, %s9194_s4 }
 0x2f3   : > { %v8208_v23 = vpack.c.bf16 %v8571_v9, %v8570_v13  ;;  %8683 = vrot.lane.b32.xlu1 %v9954_v46, %s9194_s4 }
 0x2f4   : > { %v10176_v21 = vpop.permute.xlu0 %1877 }
 0x2f5   : > { %v8579_v45 = vpop.permute.xlu1 %8578  ;;  %8210 = vmatprep.subr.msk.bf16.mxu1 %vm9857_vm3, %v8208_v23 }
 0x2f6   : > { %v8581_v34 = vunpack.i.h.bf16 %v8579_v45  ;;  %v8580_v35 = vunpack.i.l.bf16 %v8579_v45  ;;  %8688 = vrot.lane.b32.xlu0 %v9970_v63, %s9194_s4  ;;  %8213 = vmatpush3.bf16.xpose.msk.msra.mxu1 %vm9857_vm3, %v8208_v23 }
 0x2f7   : > { %8693 = vrot.lane.b32.xlu1 %v9988_v32, %s9194_s4 }
 0x2f8   : > { %v8190_v58 = vpack.c.bf16 %v8581_v34, %v8580_v35  ;;  %v8584_v36 = vpop.permute.xlu0 %8583  ;;  %v8576_v35 = vunpack.i.h.bf16 %v10170_v14 }
 0x2f9   : > { %v8586_v22 = vunpack.i.h.bf16 %v8584_v36  ;;  %v8585_v4 = vunpack.i.l.bf16 %v8584_v36  ;;  %v10186_v47 = vpop.permute.xlu1 %1879 }
 0x2fa   : > { %8698 = vrot.lane.b32.xlu0 %v9934_v56, %s9195_s9  ;;  %8192 = vmatprep.subr.msk.bf16.mxu0 %vm9857_vm3, %v8190_v58 }
 0x2fb   : > { %v8214_v49 = vpack.c.bf16 %v8586_v22, %v8585_v4  ;;  %8703 = vrot.lane.b32.xlu1 %v9934_v56, %s9196_s1  ;;  %8195 = vmatpush3.bf16.xpose.msk.msra.mxu0 %vm9857_vm3, %v8190_v58  ;;  %v8575_v58 = vunpack.i.l.bf16 %v10170_v14 }
 0x2fc   : > { %v10196_v51 = vpop.permute.xlu0 %1865 }
 0x2fd   : > { %v8589_v52 = vpop.permute.xlu1 %8588  ;;  %8216 = vmatprep.subr.msk.bf16.mxu1 %vm9857_vm3, %v8214_v49 }
 0x2fe   : > { %8708 = vrot.lane.b32.xlu0 %v9954_v46, %s9195_s9  ;;  %8219 = vmatpush3.bf16.xpose.msk.msra.mxu1 %vm9857_vm3, %v8214_v49  ;;  %v8232_v49 = vpack.c.bf16 %v8576_v35, %v8575_v58 }
 0x2ff   : > { %8713 = vrot.lane.b32.xlu1 %v9954_v46, %s9196_s1 }
 0x300   : > { %v8599_v55 = vpop.permute.xlu0 %8598 }
 0x301   : > { %v8601_v56 = vunpack.i.h.bf16 %v8599_v55  ;;  %v8600_v54 = vunpack.i.l.bf16 %v8599_v55  ;;  %v8594_v0 = vpop.permute.xlu1 %8593  ;;  %v8591_v55 = vunpack.i.h.bf16 %v8589_v52 }
 0x302   : > { %v8596_v31 = vunpack.i.h.bf16 %v8594_v0  ;;  %v8595_v8 = vunpack.i.l.bf16 %v8594_v0  ;;  %8718 = vrot.lane.b32.xlu0 %v9970_v63, %s9195_s9 }
 0x303   : > { %v8220_v12 = vpack.c.bf16 %v8601_v56, %v8600_v54  ;;  %8723 = vrot.lane.b32.xlu1 %v9986_v16, %s9196_s1  ;;  %v8590_v56 = vunpack.i.l.bf16 %v8589_v52 }
 0x304   : > { %v8196_v62 = vpack.c.bf16 %v8596_v31, %v8595_v8  ;;  %v10210_v29 = vpop.permute.xlu0 %1881 }
 0x305   : > { %v10212_v9 = vpop.permute.xlu1 %8603  ;;  %8222 = vmatprep.subr.msk.bf16.mxu1 %vm9857_vm3, %v8220_v12  ;;  %v8238_v31 = vpack.c.bf16 %v8591_v55, %v8590_v56 }
 0x306   : > { %8733 = vrot.lane.b32.xlu0 %v9988_v32, %s9195_s9  ;;  %8198 = vmatprep.subr.msk.bf16.mxu0 %vm9857_vm3, %v8196_v62 }
 0x307   : > { %8225 = vmatpush3.bf16.xpose.msk.msra.mxu1 %vm9857_vm3, %v8220_v12  ;;  %8728 = vrot.lane.b32.xlu1 %v9970_v63, %s9196_s1 }
 0x308   : > { %8201 = vmatpush3.bf16.xpose.msk.msra.mxu0 %vm9857_vm3, %v8196_v62  ;;  %v8614_v46 = vpop.permute.xlu0 %8613 }
 0x309   : > { %v8616_v16 = vunpack.i.h.bf16 %v8614_v46  ;;  %v8615_v13 = vunpack.i.l.bf16 %v8614_v46  ;;  %v8609_v23 = vpop.permute.xlu1 %8608 }
 0x30a   : > { %v8611_v45 = vunpack.i.h.bf16 %v8609_v23  ;;  %v8610_v34 = vunpack.i.l.bf16 %v8609_v23  ;;  %8743 = vrot.lane.b32.xlu0 %v10000_v61, %s9194_s4 }
 0x30b   : > { %v8226_v36 = vpack.c.bf16 %v8616_v16, %v8615_v13  ;;  %8738 = vrot.lane.b32.xlu1 %v9988_v32, %s9196_s1 }
 0x30c   : > { %v8202_v63 = vpack.c.bf16 %v8611_v45, %v8610_v34  ;;  %v1868_v22 = vpop.permute.xlu0 %1867 }
 0x30d   : > { %v1870_v4 = vpop.permute.xlu1 %1869  ;;  %8228 = vmatprep.subr.msk.bf16.mxu1 %vm9857_vm3, %v8226_v36 }
 0x30e   : > { %8748 = vrot.lane.b32.xlu0 %v10014_v41, %s9194_s4  ;;  %8204 = vmatprep.subr.msk.bf16.mxu0 %vm9857_vm3, %v8202_v63 }
 0x30f   : > { %8231 = vmatpush3.bf16.xpose.msk.msra.mxu1 %vm9857_vm3, %v8226_v36  ;;  %8753 = vrot.lane.b32.xlu1 %v10028_v17, %s9194_s4 }
 0x310   : > { %8207 = vmatpush3.bf16.xpose.msk.msra.mxu0 %vm9857_vm3, %v8202_v63  ;;  %8258 = vmatprep.subr.msk.bf16.mxu1 %vm9857_vm3, %v9942_v18  ;;  %v10247_v32 = vpop.permute.xlu0 %8623 }
 0x311   : > { %8234 = vmatprep.subr.msk.bf16.mxu0 %vm9857_vm3, %v8232_v49  ;;  %v8619_v14 = vpop.permute.xlu1 %8618  ;;  %v8626_v12 = vunpack.i.h.bf16 %v10247_v32  ;;  %v8625_v62 = vunpack.i.l.bf16 %v10247_v32 }
 0x312   : > { %8763 = vrot.lane.b32.xlu0 %v10000_v61, %s9196_s1 }
 0x313   : > { %8758 = vrot.lane.b32.xlu1 %v10000_v61, %s9195_s9  ;;  %v8280_v16 = vpack.c.bf16 %v8626_v12, %v8625_v62 }
 0x314   : > { %v10255_v54 = vpop.permute.xlu0 %1883 }
 0x315   : > { %v10257_v0 = vpop.permute.xlu1 %1885 }
 0x316   : > { %7641 = vmatmul.mubr.msk.f32.vlgmr.msra.gmra.mrb[32].mxu1 %vm2219_vm2, %v10162_v11  ;;  %8778 = vrot.lane.b32.xlu0 %v10042_v53, %s9194_s4 }
 0x317   : > { %7613 = vmatmul.mubr.msk.f32.vlgmr.msra.gmra.mrb[24].mxu0 %vm2219_vm2, %v10116_v59  ;;  %7643 = vmatprep.mubr.msk.f32.mxu1 %vm2219_vm2, %v10164_v3  ;;  %v8605_v59 = vunpack.i.l.bf16 %v10212_v9 }
 0x318   : > { %8261 = vmatpush3.bf16.xpose.msk.msra.mxu1 %vm9857_vm3, %v9942_v18  ;;  %8768 = vrot.lane.b32.xlu1 %v10014_v41, %s9195_s9  ;;  %v1872_v61 = vpop.permute.xlu0 %1871  ;;  %v8606_v18 = vunpack.i.h.bf16 %v10212_v9 }
 0x319   : > { %7615 = vmatprep.mubr.msk.f32.mxu0 %vm2219_vm2, %v10139_v26  ;;  %8237 = vmatpush3.bf16.xpose.msk.msra.mxu0 %vm9857_vm3, %v8232_v49  ;;  %v1874_v11 = vpop.permute.xlu1 %1873 }
 0x31a   : > { %8264 = vmatprep.subr.msk.bf16.mxu1 %vm9857_vm3, %v9962_v37  ;;  %8240 = vmatprep.subr.msk.bf16.mxu0 %vm9857_vm3, %v8238_v31 }
 0x31b   : > { %7644 = vmatmul.mubr.msk.f32.gmra.mrb[34].mxu1 %vm2219_vm2, %v10196_v51  ;;  %7616 = vmatmul.mubr.msk.f32.gmra.mrb[26].mxu0 %vm2219_vm2, %v10122_v6  ;;  %v8244_v6 = vpack.c.bf16 %v8606_v18, %v8605_v59 }
 0x31c   : > { %7646 = vmatprep.mubr.msk.f32.mxu1 %vm2219_vm2, %v1868_v22  ;;  %8773 = vrot.lane.b32.xlu1 %v10014_v41, %s9196_s1  ;;  %v10290_v26 = vpop.permute.xlu0 %1887 }
 0x31d   : > { %7618 = vmatprep.mubr.msk.f32.mxu0 %vm2219_vm2, %v10147_v60  ;;  %v10294_v3 = vpop.permute.xlu1 %1889 }
 0x31f   : > { %7647 = vmatmul.mubr.msk.f32.gmra.mrb[36].mxu1 %vm2219_vm2, %v1870_v4  ;;  %7619 = vmatmul.mubr.msk.f32.gmra.mrb[28].mxu0 %vm2219_vm2, %v10128_v10  ;;  %v8620_v10 = vunpack.i.l.bf16 %v8619_v14 }
 0x320   : > { %7649 = vmatprep.mubr.msk.f32.mxu1 %vm2219_vm2, %v1872_v61  ;;  %8267 = vmatpush3.bf16.xpose.msk.msra.mxu1 %vm9857_vm3, %v9962_v37  ;;  %v10303_v41 = vpop.permute.xlu0 %8633  ;;  %v8621_v37 = vunpack.i.h.bf16 %v8619_v14 }
 0x321   : > { %7621 = vmatprep.mubr.msk.f32.mxu0 %vm2219_vm2, %v10154_v38  ;;  %8243 = vmatpush3.bf16.xpose.msk.msra.mxu0 %vm9857_vm3, %v8238_v31  ;;  %v8629_v60 = vpop.permute.xlu1 %8628 }
 0x322   : > { %8270 = vmatprep.subr.msk.bf16.mxu1 %vm9857_vm3, %v9978_v15  ;;  %8246 = vmatprep.subr.msk.bf16.mxu0 %vm9857_vm3, %v8244_v6  ;;  %v8250_v52 = vpack.c.bf16 %v8621_v37, %v8620_v10  ;;  %v8631_v58 = vunpack.i.h.bf16 %v8629_v60  ;;  %v8630_v36 = vunpack.i.l.bf16 %v8629_v60 }
 0x323   : > { %7650 = vmatmul.mubr.msk.f32.gmra.mrb[38].mxu1 %vm2219_vm2, %v1874_v11  ;;  %7622 = vmatmul.mubr.msk.f32.gmra.mrb[30].mxu0 %vm2219_vm2, %v10141_v30 }
 0x324   : > { %7696 = vmatprep.mubr.msk.f32.mxu1 %vm2219_vm2, %v9818_v1  ;;  %7668 = vmatprep.mubr.msk.f32.mxu0 %vm2219_vm2, %v10156_v2  ;;  %v8639_v38 = vpop.permute.xlu0 %8638  ;;  %v8286_v4 = vpack.c.bf16 %v8631_v58, %v8630_v36 }
 0x325   : > { %v10321_v51 = vpop.permute.xlu1 %8643  ;;  %v8641_v30 = vunpack.i.h.bf16 %v8639_v38  ;;  %v8640_v2 = vunpack.i.l.bf16 %v8639_v38 }
 0x327   : > { %v8304_v46 = vpack.c.bf16 %v8641_v30, %v8640_v2 }
 0x328   : > { %8273 = vmatpush3.bf16.xpose.msk.msra.mxu1 %vm9857_vm3, %v9978_v15  ;;  %v1900_v8 = vpop.permute.xlu0 %1899 }
 0x329   : > { %8249 = vmatpush3.bf16.xpose.msk.msra.mxu0 %vm9857_vm3, %v8244_v6  ;;  %8276 = vmatprep.subr.msk.bf16.mxu1 %vm9857_vm3, %v9991_v7  ;;  %v10331_v1 = vpop.permute.xlu1 %1901 }
 0x32a   : > { %8252 = vmatprep.subr.msk.bf16.mxu0 %vm9857_vm3, %v8250_v52 }
 0x32c   : > { %v8649_v15 = vpop.permute.xlu0 %8648 }
 0x32d   : > { %v10337_v9 = vpop.permute.xlu1 %8653  ;;  %v8651_v45 = vunpack.i.h.bf16 %v8649_v15  ;;  %v8650_v34 = vunpack.i.l.bf16 %v8649_v15 }
 0x32f   : > { %v8310_v63 = vpack.c.bf16 %v8651_v45, %v8650_v34 }
 0x330   : > { %8279 = vmatpush3.bf16.xpose.msk.msra.mxu1 %vm9857_vm3, %v9991_v7  ;;  %v10342_v13 = vpop.permute.xlu0 %1903 }
 0x331   : > { %8255 = vmatpush3.bf16.xpose.msk.msra.mxu0 %vm9857_vm3, %v8250_v52  ;;  %8306 = vmatprep.subr.msk.bf16.mxu1 %vm9857_vm3, %v8304_v46  ;;  %v10348_v23 = vpop.permute.xlu1 %1905  ;;  %v8655_v52 = vunpack.i.l.bf16 %v10337_v9 }
 0x332   : > { %8282 = vmatprep.subr.msk.bf16.mxu0 %vm9857_vm3, %v8280_v16 }
 0x334   : > { %v10352_v35 = vpop.permute.xlu0 %1907 }
 0x335   : > { %v10354_v7 = vpop.permute.xlu1 %1909 }
 0x337   : > { %7697 = vmatmul.mubr.msk.f32.vlgmr.msra.gmra.mrb[40].mxu1 %vm2219_vm2, %v9815_v40 }
 0x338   : > { %7669 = vmatmul.mubr.msk.f32.vlgmr.msra.gmra.mrb[32].mxu0 %vm2219_vm2, %v10176_v21  ;;  %7699 = vmatprep.mubr.msk.f32.mxu1 %vm2219_vm2, %v9824_v20  ;;  %v10362_v22 = vpop.permute.xlu0 %1911  ;;  %v8636_v20 = vunpack.i.h.bf16 %v10303_v41  ;;  %v8635_v21 = vunpack.i.l.bf16 %v10303_v41 }
 0x339   : > { %8309 = vmatpush3.bf16.xpose.msk.msra.mxu1 %vm9857_vm3, %v8304_v46  ;;  %7671 = vmatprep.mubr.msk.f32.mxu0 %vm2219_vm2, %v10186_v47  ;;  %v10368_v49 = vpop.permute.xlu1 %1913 }
 0x33a   : > { %8285 = vmatpush3.bf16.xpose.msk.msra.mxu0 %vm9857_vm3, %v8280_v16  ;;  %8312 = vmatprep.subr.msk.bf16.mxu1 %vm9857_vm3, %v8310_v63 }
 0x33b   : > { %8288 = vmatprep.subr.msk.bf16.mxu0 %vm9857_vm3, %v8286_v4  ;;  %7700 = vmatmul.mubr.msk.f32.gmra.mrb[42].mxu1 %vm2219_vm2, %v9821_v39 }
 0x33c   : > { %7672 = vmatmul.mubr.msk.f32.gmra.mrb[34].mxu0 %vm2219_vm2, %v10210_v29  ;;  %7702 = vmatprep.mubr.msk.f32.mxu1 %vm2219_vm2, %v9830_v48  ;;  %v1916_v40 = vpop.permute.xlu0 %1915  ;;  %v8292_v48 = vpack.c.bf16 %v8636_v20, %v8635_v21 }
 0x33d   : > { %7674 = vmatprep.mubr.msk.f32.mxu0 %vm2219_vm2, %v10255_v54  ;;  %v1918_v47 = vpop.permute.xlu1 %1917 }
 0x33f   : > { %7703 = vmatmul.mubr.msk.f32.gmra.mrb[44].mxu1 %vm2219_vm2, %v9827_v24 }
 0x340   : > { %7675 = vmatmul.mubr.msk.f32.gmra.mrb[36].mxu0 %vm2219_vm2, %v10257_v0  ;;  %7705 = vmatprep.mubr.msk.f32.mxu1 %vm2219_vm2, %v9836_v28  ;;  %v8659_v39 = vpop.permute.xlu0 %8658 }
 0x341   : > { %8315 = vmatpush3.bf16.xpose.msk.msra.mxu1 %vm9857_vm3, %v8310_v63  ;;  %7677 = vmatprep.mubr.msk.f32.mxu0 %vm2219_vm2, %v10290_v26  ;;  %v8661_v29 = vunpack.i.h.bf16 %v8659_v39  ;;  %v8660_v32 = vunpack.i.l.bf16 %v8659_v39  ;;  %v10396_v14 = vpop.permute.xlu1 %1933  ;;  %v8646_v26 = vunpack.i.h.bf16 %v10321_v51 }
 0x342   : > { %8291 = vmatpush3.bf16.xpose.msk.msra.mxu0 %vm9857_vm3, %v8286_v4 }
 0x343   : > { %v8316_v24 = vpack.c.bf16 %v8661_v29, %v8660_v32  ;;  %8294 = vmatprep.subr.msk.bf16.mxu0 %vm9857_vm3, %v8292_v48  ;;  %7706 = vmatmul.mubr.msk.f32.gmra.mrb[46].mxu1 %vm2219_vm2, %v9833_v27 }
 0x344   : > { %7678 = vmatmul.mubr.msk.f32.gmra.mrb[38].mxu0 %vm2219_vm2, %v10294_v3  ;;  %7752 = vmatprep.mubr.msk.f32.mxu1 %vm2219_vm2, %v1916_v40  ;;  %v10407_v28 = vpop.permute.xlu0 %1931  ;;  %v8645_v3 = vunpack.i.l.bf16 %v10321_v51  ;;  %v8656_v51 = vunpack.i.h.bf16 %v10337_v9 }
 0x345   : > { %7724 = vmatprep.mubr.msk.f32.mxu0 %vm2219_vm2, %v1900_v8  ;;  %v10410_v55 = vpop.permute.xlu1 %8663  ;;  %8318 = vmatprep.subr.msk.bf16.mxu1 %vm9857_vm3, %v8316_v24 }
 0x346   : > { %v8328_v60 = vpack.c.bf16 %v8646_v26, %v8645_v3  ;;  %v8334_v12 = vpack.c.bf16 %v8656_v51, %v8655_v52  ;;  %v8666_v45 = vunpack.i.h.bf16 %v10410_v55  ;;  %v8665_v34 = vunpack.i.l.bf16 %v10410_v55 }
 0x348   : > { %v8674_v56 = vpop.permute.xlu0 %8673 }
 0x349   : > { %8321 = vmatpush3.bf16.xpose.msk.msra.mxu1 %vm9857_vm3, %v8316_v24  ;;  %v8676_v54 = vunpack.i.h.bf16 %v8674_v56  ;;  %v8675_v27 = vunpack.i.l.bf16 %v8674_v56  ;;  %v8669_v0 = vpop.permute.xlu1 %8668 }
 0x34a   : > { %8297 = vmatpush3.bf16.xpose.msk.msra.mxu0 %vm9857_vm3, %v8292_v48  ;;  %v8671_v31 = vunpack.i.h.bf16 %v8669_v0  ;;  %v8670_v61 = vunpack.i.l.bf16 %v8669_v0 }
 0x34b   : > { %v8322_v11 = vpack.c.bf16 %v8676_v54, %v8675_v27 }
 0x34c   : > { %v8298_v18 = vpack.c.bf16 %v8671_v31, %v8670_v61  ;;  %v1920_v59 = vpop.permute.xlu0 %1919 }
 0x34d   : > { %v1922_v6 = vpop.permute.xlu1 %1921  ;;  %8324 = vmatprep.subr.msk.bf16.mxu1 %vm9857_vm3, %v8322_v11 }
 0x34e   : > { %8300 = vmatprep.subr.msk.bf16.mxu0 %vm9857_vm3, %v8298_v18 }
 0x350   : > { %v10424_v41 = vpop.permute.xlu0 %1935 }
 0x351   : > { %8327 = vmatpush3.bf16.xpose.msk.msra.mxu1 %vm9857_vm3, %v8322_v11  ;;  %v10428_v37 = vpop.permute.xlu1 %1937 }
 0x352   : > { %8303 = vmatpush3.bf16.xpose.msk.msra.mxu0 %vm9857_vm3, %v8298_v18  ;;  %8353 = vmatprep.subr.bf16.mxu1 %v9944_v43 }
 0x353   : > { %8330 = vmatprep.subr.msk.bf16.mxu0 %vm9857_vm3, %v8328_v60 }
 0x354   : > { %v1924_v10 = vpop.permute.xlu0 %1923 }
 0x355   : > { %v1926_v38 = vpop.permute.xlu1 %1925 }
 0x358   : > { %7753 = vmatmul.mubr.msk.f32.vlgmr.msra.gmra.mrb[48].mxu1 %vm2219_vm2, %v1918_v47  ;;  %v10438_v8 = vpop.permute.xlu0 %1939 }
 0x359   : > { %7725 = vmatmul.mubr.msk.f32.vlgmr.msra.gmra.mrb[40].mxu0 %vm2219_vm2, %v10331_v1  ;;  %7755 = vmatprep.mubr.msk.f32.mxu1 %vm2219_vm2, %v1920_v59  ;;  %v7586_v30 = vpop.f32.mrb[24].mxu1  ;;  %v10443_v2 = vpop.permute.xlu1 %1941 }
 0x35a   : > { %8355 = vmatpush3.bf16.msra.mxu1 %v9944_v43  ;;  %7727 = vmatprep.mubr.msk.f32.mxu0 %vm2219_vm2, %v10342_v13  ;;  %v10448_v62 = vmul.f32 0.35355338, %v7586_v30  ;;  %v2318_v15 = vpop.f32.mrb[25].mxu1 }
 0x35b   : > { %8333 = vmatpush3.bf16.xpose.msk.msra.mxu0 %vm9857_vm3, %v8328_v60  ;;  %8357 = vmatprep.subr.bf16.mxu1 %v9964_v5  ;;  %v10453_v1 = vmul.f32 0.35355338, %v2318_v15 }
 0x35c   : > { %8336 = vmatprep.subr.msk.bf16.mxu0 %vm9857_vm3, %v8334_v12  ;;  %7756 = vmatmul.mubr.msk.f32.gmra.mrb[50].mxu1 %vm2219_vm2, %v1922_v6  ;;  %v1928_v9 = vpop.permute.xlu0 %1927  ;;  %v3384_v43 = vsel %vm3380_vm4, %v10448_v62, -inf }
 0x35d   : > { %7728 = vmatmul.mubr.msk.f32.gmra.mrb[42].mxu0 %vm2219_vm2, %v10348_v23  ;;  %7758 = vmatprep.mubr.msk.f32.mxu1 %vm2219_vm2, %v1924_v10  ;;  %v7589_v46 = vpop.f32.mrb[26].mxu1  ;;  %v1930_v16 = vpop.permute.xlu1 %1929  ;;  %v3381_v13 = vsel %vm3380_vm4, %v10453_v1, -inf }
 0x35e   : > { %8359 = vmatpush3.bf16.msra.mxu1 %v9964_v5  ;;  %7730 = vmatprep.mubr.msk.f32.mxu0 %vm2219_vm2, %v10352_v35  ;;  %v10470_v58 = vmul.f32 0.35355338, %v7589_v46  ;;  %v2328_v36 = vpop.f32.mrb[27].mxu1  ;;  %v8340_v35 = vpack.c.bf16 %v8666_v45, %v8665_v34 }
 0x35f   : > { %8361 = vmatprep.subr.bf16.mxu1 %v9980_v19  ;;  %3385 = vmax.xlane.f32.xlu1 %v3384_v43 }
 0x360   : > { %7759 = vmatmul.mubr.msk.f32.gmra.mrb[52].mxu1 %vm2219_vm2, %v1926_v38  ;;  %3382 = vmax.xlane.f32.xlu0 %v3381_v13  ;;  %v10474_v23 = vpop.permute.xlu0 %1943  ;;  %v3390_v20 = vsel %vm3380_vm4, %v10470_v58, -inf }
 0x361   : > { %7731 = vmatmul.mubr.msk.f32.gmra.mrb[44].mxu0 %vm2219_vm2, %v10354_v7  ;;  %7761 = vmatprep.mubr.msk.f32.mxu1 %vm2219_vm2, %v1928_v9  ;;  %v7592_v5 = vpop.f32.mrb[28].mxu1  ;;  %v10479_v63 = vpop.permute.xlu1 %1945  ;;  %v10491_v7 = vmul.f32 0.35355338, %v2328_v36 }
 0x362   : > { %8363 = vmatpush3.bf16.msra.mxu1 %v9980_v19  ;;  %7733 = vmatprep.mubr.msk.f32.mxu0 %vm2219_vm2, %v10362_v22  ;;  %v10484_v4 = vmul.f32 0.35355338, %v7592_v5  ;;  %v2338_v40 = vpop.f32.mrb[29].mxu1 }
 0x363   : > { %8339 = vmatpush3.bf16.xpose.msk.msra.mxu0 %vm9857_vm3, %v8334_v12  ;;  %8365 = vmatprep.subr.bf16.mxu1 %v9996_v25  ;;  %v10509_v55 = vmul.f32 0.35355338, %v2338_v40 }
 0x364   : > { %8342 = vmatprep.subr.msk.bf16.mxu0 %vm9857_vm3, %v8340_v35  ;;  %7762 = vmatmul.mubr.msk.f32.gmra.mrb[54].mxu1 %vm2219_vm2, %v1930_v16  ;;  %v8679_v19 = vpop.permute.xlu0 %8678  ;;  %v3396_v22 = vsel %vm3380_vm4, %v10484_v4, -inf }
 0x365   : > { %3391 = vmax.xlane.f32.xlu0 %v3390_v20  ;;  %7734 = vmatmul.mubr.msk.f32.gmra.mrb[46].mxu0 %vm2219_vm2, %v10368_v49  ;;  %v8681_v21 = vunpack.i.h.bf16 %v8679_v19  ;;  %v8680_v47 = vunpack.i.l.bf16 %v8679_v19  ;;  %v10500_v39 = vpop.permute.xlu1 %8683  ;;  %v7595_v48 = vpop.f32.mrb[30].mxu1  ;;  %v3387_v49 = vsel %vm3380_vm4, %v10491_v7, -inf  ;;  %v3393_v27 = vsel %vm3380_vm4, %v10509_v55, -inf }
 0x366   : > { %8367 = vmatpush3.bf16.msra.mxu1 %v9996_v25  ;;  %7780 = vmatprep.mubr.msk.f32.mxu0 %vm2219_vm2, %v10407_v28  ;;  %v10505_v29 = vmul.f32 0.35355338, %v7595_v48  ;;  %v2348_v32 = vpop.f32.mrb[31].mxu1 }
 0x367   : > { %3397 = vmax.xlane.f32.xlu1 %v3396_v22  ;;  %v10507_v24 = vpack.c.bf16 %v8681_v21, %v8680_v47  ;;  %v10522_v28 = vmul.f32 0.35355338, %v2348_v32 }
 0x368   : > { %v3402_v56 = vsel %vm3380_vm4, %v10505_v29, -inf  ;;  %v10520_v25 = vpop.permute.xlu0 %8688 }
 0x369   : > { %3388 = vmax.xlane.f32.xlu0 %v3387_v49  ;;  %v10515_v54 = vpop.permute.xlu1 %8693  ;;  %8369 = vmatprep.subr.bf16.mxu1 %v10507_v24  ;;  %v3399_v31 = vsel %vm3380_vm4, %v10522_v28, -inf }
 0x36b   : > { %8345 = vmatpush3.bf16.xpose.msk.msra.mxu0 %vm9857_vm3, %v8340_v35  ;;  %3403 = vmax.xlane.f32.xlu1 %v3402_v56 }
 0x36c   : > { %v8699_v61 = vpop.permute.xlu0 %8698 }
 0x36d   : > { %3394 = vmax.xlane.f32.xlu0 %v3393_v27  ;;  %v10526_v0 = vpop.permute.xlu1 %8703  ;;  %v8701_v59 = vunpack.i.h.bf16 %v8699_v61  ;;  %v8700_v26 = vunpack.i.l.bf16 %v8699_v61 }
 0x36e   : > { %12240 = vst [vmem:[#allocation13_spill] sm:$0xff] %v10526_v0 }
 0x36f   : > { %v8384_v38 = vpack.c.bf16 %v8701_v59, %v8700_v26 }
 0x370   : > { %v8709_v60 = vpop.permute.xlu0 %8708 }
 0x371   : > { %3400 = vmax.xlane.f32.xlu0 %v3399_v31  ;;  %v10530_v11 = vpop.permute.xlu1 %8713  ;;  %v8711_v52 = vunpack.i.h.bf16 %v8709_v60  ;;  %v8710_v30 = vunpack.i.l.bf16 %v8709_v60 }
 0x372   : > { %12241 = vst [vmem:[#allocation14_spill] sm:$0xff] %v10530_v11 }
 0x373   : > { %v8388_v9 = vpack.c.bf16 %v8711_v52, %v8710_v30 }
 0x374   : > { %v8719_v51 = vpop.permute.xlu0 %8718 }
 0x375   : > { %v8724_v18 = vpop.permute.xlu1 %8723  ;;  %v8721_v12 = vunpack.i.h.bf16 %v8719_v51  ;;  %v8720_v15 = vunpack.i.l.bf16 %v8719_v51 }
 0x376   : > { %v8726_v3 = vunpack.i.h.bf16 %v8724_v18  ;;  %v8725_v6 = vunpack.i.l.bf16 %v8724_v18 }
 0x377   : > { %v8392_v42 = vpack.c.bf16 %v8721_v12, %v8720_v15 }
 0x378   : > { %v8346_v10 = vpack.c.bf16 %v8726_v3, %v8725_v6  ;;  %v8734_v43 = vpop.permute.xlu0 %8733 }
 0x379   : > { %v8736_v46 = vunpack.i.h.bf16 %v8734_v43  ;;  %v8735_v16 = vunpack.i.l.bf16 %v8734_v43 }
 0x37a   : > { %8348 = vmatprep.subr.msk.bf16.mxu0 %vm9857_vm3, %v8346_v10 }
 0x37b   : > { %8351 = vmatpush3.bf16.xpose.msk.msra.mxu0 %vm9857_vm3, %v8346_v10 }
 0x37c   : > { %8385 = vmatprep.subr.bf16.mxu0 %v8384_v38  ;;  %v10575_v31 = vpop.permute.xlu0 %8743 }
 0x37d   : > { %12244 = vst [vmem:[#allocation17_spill] sm:$0xff] %v10575_v31 }
 0x380   : > { %v10591_v12 = vpop.permute.xlu0 %8748 }
 0x381   : > { %12246 = vst [vmem:[#allocation19_spill] sm:$0xff] %v10591_v12 }
 0x382   : > { %7781 = vmatmul.mubr.msk.f32.vlgmr.msra.gmra.mrb[48].mxu0 %vm2219_vm2, %v10396_v14  ;;  %v8396_v14 = vpack.c.bf16 %v8736_v46, %v8735_v16 }
 0x383   : > { %7783 = vmatprep.mubr.msk.f32.mxu0 %vm2219_vm2, %v10424_v41  ;;  %8387 = vmatpush3.bf16.msra.mxu0 %v8384_v38  ;;  %v10551_v41 = vpop.permute.xlu1 %8728 }
 0x384   : > { %8389 = vmatprep.subr.bf16.mxu0 %v8388_v9  ;;  %12242 = vst [vmem:[#allocation15_spill] sm:$0xff] %v10551_v41 }
 0x386   : > { %7784 = vmatmul.mubr.msk.f32.gmra.mrb[50].mxu0 %vm2219_vm2, %v10428_v37 }
 0x387   : > { %7786 = vmatprep.mubr.msk.f32.mxu0 %vm2219_vm2, %v10438_v8  ;;  %8391 = vmatpush3.bf16.msra.mxu0 %v8388_v9  ;;  %v10565_v22 = vpop.permute.xlu1 %8738 }
 0x388   : > { %8393 = vmatprep.subr.bf16.mxu0 %v8392_v42  ;;  %12243 = vst [vmem:[#allocation16_spill] sm:$0xff] %v10565_v22 }
 0x38a   : > { %7787 = vmatmul.mubr.msk.f32.gmra.mrb[52].mxu0 %vm2219_vm2, %v10443_v2 }
 0x38b   : > { %7789 = vmatprep.mubr.msk.f32.mxu0 %vm2219_vm2, %v10474_v23  ;;  %8395 = vmatpush3.bf16.msra.mxu0 %v8392_v42  ;;  %v10581_v26 = vpop.permute.xlu1 %8753 }
 0x38c   : > { %8397 = vmatprep.subr.bf16.mxu0 %v8396_v14  ;;  %12245 = vst [vmem:[#allocation18_spill] sm:$0xff] %v10581_v26 }
 0x38e   : > { %7790 = vmatmul.mubr.msk.f32.gmra.mrb[54].mxu0 %vm2219_vm2, %v10479_v63 }
 0x38f   : > { %8399 = vmatpush3.bf16.msra.mxu0 %v8396_v14  ;;  %v10597_v43 = vpop.permute.xlu1 %8758 }
 0x390   : > { %8417 = vmatprep.subr.bf16.mxu0 %v10002_v33  ;;  %12247 = vst [vmem:[#allocation20_spill] sm:$0xff] %v10597_v43 }
 0x3e9   : > { %v7642_v37 = vpop.f32.mrb[32].mxu1 }
 0x3ea   : > { %v7614_v8 = vpop.f32.mrb[24].mxu0  ;;  %v2592_v13 = vpop.f32.mrb[33].mxu1  ;;  %v10557_v36 = vmul.f32 0.35355338, %v7642_v37 }
 0x3eb   : > { %v10553_v45 = vmul.f32 0.35355338, %v7614_v8  ;;  %v2455_v2 = vpop.f32.mrb[25].mxu0  ;;  %v10561_v5 = vmul.f32 0.35355338, %v2592_v13  ;;  %v10607_v37 = vpop.permute.xlu0 %8763 }
 0x3ec   : > { %v10555_v34 = vmul.f32 0.35355338, %v2455_v2  ;;  %v3432_v47 = vsel %vm3380_vm4, %v10557_v36, -inf  ;;  %12248 = vst [vmem:[#allocation21_spill] sm:$0xff] %v10607_v37 }
 0x3ed   : > { %v3408_v23 = vsel %vm3380_vm4, %v10553_v45, -inf  ;;  %v3429_v49 = vsel %vm3380_vm4, %v10561_v5, -inf }
 0x3ee   : > { %v7645_v63 = vpop.f32.mrb[34].mxu1  ;;  %3409 = vmax.xlane.f32.xlu1 %v3408_v23  ;;  %v7617_v35 = vpop.f32.mrb[26].mxu0  ;;  %v3405_v40 = vsel %vm3380_vm4, %v10555_v34, -inf }
 0x3ef   : > { %v2602_v20 = vpop.f32.mrb[35].mxu1  ;;  %3406 = vmax.xlane.f32.xlu0 %v3405_v40  ;;  %v2465_v19 = vpop.f32.mrb[27].mxu0  ;;  %v10567_v21 = vmul.f32 0.35355338, %v7617_v35  ;;  %v10577_v18 = vmul.f32 0.35355338, %v7645_v63 }
 0x3f0   : > { %v10571_v48 = vmul.f32 0.35355338, %v2465_v19  ;;  %v10583_v3 = vmul.f32 0.35355338, %v2602_v20  ;;  %v10617_v63 = vpop.permute.xlu1 %8768  ;;  %v10623_v20 = vpop.permute.xlu0 %8778 }
 0x3f1   : > { %v3414_v59 = vsel %vm3380_vm4, %v10567_v21, -inf  ;;  %v3438_v30 = vsel %vm3380_vm4, %v10577_v18, -inf  ;;  %12249 = vst [vmem:[#allocation22_spill] sm:$0xff] %v10617_v63  ;;  %12250 = vst [vmem:[#allocation23_spill] sm:$0xff] %v10623_v20 }
 0x3f2   : > { %v7648_v32 = vpop.f32.mrb[36].mxu1  ;;  %3433 = vmax.xlane.f32.xlu1 %v3432_v47  ;;  %v7620_v27 = vpop.f32.mrb[28].mxu0  ;;  %v3411_v60 = vsel %vm3380_vm4, %v10571_v48, -inf  ;;  %v3435_v9 = vsel %vm3380_vm4, %v10583_v3, -inf }
 0x3f3   : > { %v2612_v56 = vpop.f32.mrb[37].mxu1  ;;  %3430 = vmax.xlane.f32.xlu0 %v3429_v49  ;;  %v2475_v61 = vpop.f32.mrb[29].mxu0  ;;  %v10587_v52 = vmul.f32 0.35355338, %v7620_v27  ;;  %v10599_v46 = vmul.f32 0.35355338, %v7648_v32 }
 0x3f4   : > { %v10593_v15 = vmul.f32 0.35355338, %v2475_v61  ;;  %v10603_v42 = vmul.f32 0.35355338, %v2612_v56  ;;  %v10629_v32 = vpop.permute.xlu1 %8773  ;;  %v3383_v56 = vpop.xlane.xlu0 %3382 }
 0x3f5   : > { %v3420_v16 = vsel %vm3380_vm4, %v10587_v52, -inf  ;;  %v3444_v13 = vsel %vm3380_vm4, %v10599_v46, -inf  ;;  %12251 = vst [vmem:[#allocation24_spill] sm:$0xff] %v10629_v32 }
 0x3f6   : > { %v7651_v6 = vpop.f32.mrb[38].mxu1  ;;  %3415 = vmax.xlane.f32.xlu1 %v3414_v59  ;;  %v7623_v38 = vpop.f32.mrb[30].mxu0  ;;  %v3417_v14 = vsel %vm3380_vm4, %v10593_v15, -inf  ;;  %v3441_v23 = vsel %vm3380_vm4, %v10603_v42, -inf }
 0x3f7   : > { %v2622_v10 = vpop.f32.mrb[39].mxu1  ;;  %3412 = vmax.xlane.f32.xlu0 %v3411_v60  ;;  %v2485_v51 = vpop.f32.mrb[31].mxu0  ;;  %v10609_v8 = vmul.f32 0.35355338, %v7623_v38  ;;  %v10619_v35 = vmul.f32 0.35355338, %v7651_v6 }
 0x3f8   : > { %v10613_v2 = vmul.f32 0.35355338, %v2485_v51  ;;  %v10625_v19 = vmul.f32 0.35355338, %v2622_v10  ;;  %v3386_v51 = vpop.xlane.xlu1 %3385 }
 0x3f9   : > { %v3426_v40 = vsel %vm3380_vm4, %v10609_v8, -inf  ;;  %v3450_v49 = vsel %vm3380_vm4, %v10619_v35, -inf }
 0x3fa   : > { %3439 = vmax.xlane.f32.xlu1 %v3438_v30  ;;  %v3423_v47 = vsel %vm3380_vm4, %v10613_v2, -inf  ;;  %v3447_v61 = vsel %vm3380_vm4, %v10625_v19, -inf }
 0x3fb   : > { %3436 = vmax.xlane.f32.xlu0 %v3435_v9 }
 0x3fc   : > { %v3398_v57 = vpop.xlane.xlu1 %3397 }
 0x3fe   : > { %3421 = vmax.xlane.f32.xlu1 %v3420_v16 }
 0x3ff   : > { %3418 = vmax.xlane.f32.xlu0 %v3417_v14 }
 0x402   : > { %3445 = vmax.xlane.f32.xlu1 %v3444_v13 }
 0x403   : > { %3442 = vmax.xlane.f32.xlu0 %v3441_v23 }
 0x406   : > { %3427 = vmax.xlane.f32.xlu1 %v3426_v40 }
 0x407   : > { %3424 = vmax.xlane.f32.xlu0 %v3423_v47  ;;  %v3392_v47 = vpop.xlane.xlu0 %3391 }
 0x40a   : > { %v7698_v27 = vpop.f32.mrb[40].mxu1  ;;  %3451 = vmax.xlane.f32.xlu1 %v3450_v49 }
 0x40b   : > { %v2866_v59 = vpop.f32.mrb[41].mxu1  ;;  %v7670_v6 = vpop.f32.mrb[32].mxu0  ;;  %3448 = vmax.xlane.f32.xlu0 %v3447_v61  ;;  %v10639_v30 = vmul.f32 0.35355338, %v7698_v27  ;;  %v3574_v61 = vsub.f32 %v10448_v62, %v3386_v51  ;;  %v3573_v27 = vsub.f32 %v10453_v1, %v3383_v56 }
 0x40c   : > { %v10635_v60 = vmul.f32 0.35355338, %v7670_v6  ;;  %v2729_v10 = vpop.f32.mrb[33].mxu0  ;;  %v10643_v14 = vmul.f32 0.35355338, %v2866_v59  ;;  %v3389_v51 = vpop.xlane.xlu0 %3388 }
 0x40d   : > { %v10637_v38 = vmul.f32 0.35355338, %v2729_v10  ;;  %v3480_v59 = vsel %vm3380_vm4, %v10639_v30, -inf  ;;  %v3639_v26 = vmul.f32 1.442695, %v3574_v61 }
 0x40e   : > { %v7701_v9 = vpop.f32.mrb[42].mxu1  ;;  %v3456_v16 = vsel %vm3380_vm4, %v10635_v60, -inf  ;;  %v3477_v20 = vsel %vm3380_vm4, %v10643_v14, -inf  ;;  %v3637_v62 = vmul.f32 1.442695, %v3573_v27 }
 0x40f   : > { %v2876_v13 = vpop.f32.mrb[43].mxu1  ;;  %3457 = vmax.xlane.f32.xlu1 %v3456_v16  ;;  %v7673_v23 = vpop.f32.mrb[34].mxu0  ;;  %v3453_v40 = vsel %vm3380_vm4, %v10637_v38, -inf  ;;  %v10657_v1 = vmul.f32 0.35355338, %v7701_v9  ;;  %8834 = vpow2.f32 %v3639_v26 }
 0x410   : > { %3454 = vmax.xlane.f32.xlu0 %v3453_v40  ;;  %v2739_v49 = vpop.f32.mrb[35].mxu0  ;;  %v10649_v6 = vmul.f32 0.35355338, %v7673_v23  ;;  %v10661_v63 = vmul.f32 0.35355338, %v2876_v13  ;;  %8836 = vpow2.f32 %v3637_v62  ;;  %v3395_v43 = vpop.xlane.xlu0 %3394 }
 0x411   : > { %v10653_v32 = vmul.f32 0.35355338, %v2739_v49  ;;  %v3486_v9 = vsel %vm3380_vm4, %v10657_v1, -inf }
 0x412   : > { %v7704_v10 = vpop.f32.mrb[44].mxu1  ;;  %v3462_v23 = vsel %vm3380_vm4, %v10649_v6, -inf  ;;  %v3483_v13 = vsel %vm3380_vm4, %v10661_v63, -inf }
 0x413   : > { %v2886_v16 = vpop.f32.mrb[45].mxu1  ;;  %3481 = vmax.xlane.f32.xlu1 %v3480_v59  ;;  %v7676_v37 = vpop.f32.mrb[36].mxu0  ;;  %v3459_v12 = vsel %vm3380_vm4, %v10653_v32, -inf  ;;  %v10675_v26 = vmul.f32 0.35355338, %v7704_v10 }
 0x414   : > { %3478 = vmax.xlane.f32.xlu0 %v3477_v20  ;;  %v2749_v40 = vpop.f32.mrb[37].mxu0  ;;  %v10665_v61 = vmul.f32 0.35355338, %v7676_v37  ;;  %v10679_v62 = vmul.f32 0.35355338, %v2886_v16  ;;  %v3401_v50 = vpop.xlane.xlu0 %3400 }
 0x415   : > { %v10669_v27 = vmul.f32 0.35355338, %v2749_v40  ;;  %v3492_v10 = vsel %vm3380_vm4, %v10675_v26, -inf }
 0x416   : > { %v7707_v56 = vpop.f32.mrb[46].mxu1  ;;  %v3468_v37 = vsel %vm3380_vm4, %v10665_v61, -inf  ;;  %v3489_v16 = vsel %vm3380_vm4, %v10679_v62, -inf }
 0x417   : > { %v2896_v49 = vpop.f32.mrb[47].mxu1  ;;  %3463 = vmax.xlane.f32.xlu1 %v3462_v23  ;;  %v7679_v59 = vpop.f32.mrb[38].mxu0  ;;  %v3576_v23 = vsub.f32 %v10470_v58, %v3392_v47  ;;  %v3465_v40 = vsel %vm3380_vm4, %v10669_v27, -inf  ;;  %v3578_v58 = vsub.f32 %v10484_v4, %v3398_v57 }
 0x418   : > { %3460 = vmax.xlane.f32.xlu0 %v3459_v12  ;;  %v2759_v20 = vpop.f32.mrb[39].mxu0  ;;  %v3575_v12 = vsub.f32 %v10491_v7, %v3389_v51  ;;  %v3577_v7 = vsub.f32 %v10509_v55, %v3395_v43  ;;  %v3579_v55 = vsub.f32 %v10522_v28, %v3401_v50  ;;  %v10695_v43 = vmul.f32 0.35355338, %v7679_v59 }
 0x419   : > { %v10687_v51 = vpop.eup %8834  ;;  %v10707_v28 = vmul.f32 0.35355338, %v2896_v49 }
 0x41a   : > { %v3641_v47 = vmul.f32 1.442695, %v3575_v12  ;;  %v3645_v4 = vmul.f32 1.442695, %v3577_v7  ;;  %v3768_v12 = vsel %vm3380_vm4, %v10687_v51, 0.0  ;;  %v3474_v50 = vsel %vm3380_vm4, %v10695_v43, -inf }
 0x41b   : > { %3487 = vmax.xlane.f32.xlu1 %v3486_v9  ;;  %v3643_v9 = vmul.f32 1.442695, %v3576_v23  ;;  %v3647_v23 = vmul.f32 1.442695, %v3578_v58  ;;  %v3649_v58 = vmul.f32 1.442695, %v3579_v55 }
 0x41c   : > { %3484 = vmax.xlane.f32.xlu0 %v3483_v13  ;;  %v3404_v13 = vpop.xlane.xlu1 %3403 }
 0x41d   : > { %8838 = vpow2.f32 %v3643_v9  ;;  %v3580_v57 = vsub.f32 %v10505_v29, %v3404_v13  ;;  %v10703_v29 = vmul.f32 0.35355338, %v7707_v56 }
 0x41e   : > { %8840 = vpow2.f32 %v3641_v47 }
 0x41f   : > { %3469 = vmax.xlane.f32.xlu1 %v3468_v37  ;;  %v10691_v37 = vpop.eup %8836  ;;  %8842 = vpow2.f32 %v3647_v23  ;;  %v3651_v9 = vmul.f32 1.442695, %v3580_v57  ;;  %v3498_v56 = vsel %vm3380_vm4, %v10703_v29, -inf  ;;  %v3495_v57 = vsel %vm3380_vm4, %v10707_v28, -inf }
 0x420   : > { %3466 = vmax.xlane.f32.xlu0 %v3465_v40  ;;  %v10699_v40 = vmul.f32 0.35355338, %v2759_v20  ;;  %8844 = vpow2.f32 %v3645_v4 }
 0x421   : > { %8846 = vpow2.f32 %v3651_v9 }
 0x422   : > { %v3471_v20 = vsel %vm3380_vm4, %v10699_v40, -inf  ;;  %8848 = vpow2.f32 %v3649_v58 }
 0x423   : > { %3493 = vmax.xlane.f32.xlu1 %v3492_v10  ;;  %v3765_v10 = vsel %vm3380_vm4, %v10691_v37, 0.0 }
 0x424   : > { %3490 = vmax.xlane.f32.xlu0 %v3489_v16 }
 0x427   : > { %3769 = vadd.xlane.f32.xlu1 %v3768_v12  ;;  %v10711_v16 = vpop.eup %8838 }
 0x428   : > { %3766 = vadd.xlane.f32.xlu0 %v3765_v10  ;;  %12252 = vst [vmem:[#allocation25_spill] sm:$0xff] %v10711_v16  ;;  %v10715_v23 = vpop.eup %8840  ;;  %v3774_v10 = vsel %vm3380_vm4, %v10711_v16, 0.0 }
 0x429   : > { %12253 = vst [vmem:[#allocation26_spill] sm:$0xff] %v10715_v23  ;;  %v10721_v9 = vpop.eup %8842 }
 0x42a   : > { %12254 = vst [vmem:[#allocation27_spill] sm:$0xff] %v10721_v9 }
 0x42b   : > { %v7754_v59 = vpop.f32.mrb[48].mxu1  ;;  %3475 = vmax.xlane.f32.xlu1 %v3474_v50  ;;  %v3771_v50 = vsel %vm3380_vm4, %v10715_v23, 0.0 }
 0x42c   : > { %v3140_v47 = vpop.f32.mrb[49].mxu1  ;;  %v7726_v13 = vpop.f32.mrb[40].mxu0  ;;  %3472 = vmax.xlane.f32.xlu0 %v3471_v20 }
 0x42d   : > { %v3003_v7 = vpop.f32.mrb[41].mxu0  ;;  %v10725_v20 = vpop.eup %8844  ;;  %v10735_v16 = vmul.f32 0.35355338, %v7726_v13  ;;  %v10747_v0 = vmul.f32 0.35355338, %v3140_v47 }
 0x42e   : > { %12255 = vst [vmem:[#allocation28_spill] sm:$0xff] %v10725_v20  ;;  %v10729_v33 = vpop.eup %8846  ;;  %v3777_v41 = vsel %vm3380_vm4, %v10725_v20, 0.0  ;;  %v10739_v23 = vmul.f32 0.35355338, %v3003_v7 }
 0x42f   : > { %v7757_v49 = vpop.f32.mrb[50].mxu1  ;;  %3499 = vmax.xlane.f32.xlu1 %v3498_v56  ;;  %v3504_v20 = vsel %vm3380_vm4, %v10735_v16, -inf }
 0x430   : > { %v3150_v4 = vpop.f32.mrb[51].mxu1  ;;  %v7729_v55 = vpop.f32.mrb[42].mxu0  ;;  %3496 = vmax.xlane.f32.xlu0 %v3495_v57  ;;  %v3780_v57 = vsel %vm3380_vm4, %v10721_v9, 0.0  ;;  %v10743_v9 = vmul.f32 0.35355338, %v7754_v59  ;;  %v3525_v59 = vsel %vm3380_vm4, %v10747_v0, -inf }
 0x431   : > { %v3013_v12 = vpop.f32.mrb[43].mxu0  ;;  %v10751_v13 = vmul.f32 0.35355338, %v7729_v55 }
 0x432   : > { %v3528_v7 = vsel %vm3380_vm4, %v10743_v9, -inf }
 0x433   : > { %v7760_v58 = vpop.f32.mrb[52].mxu1  ;;  %3775 = vadd.xlane.f32.xlu1 %v3774_v10  ;;  %v10733_v10 = vpop.eup %8848  ;;  %v3510_v47 = vsel %vm3380_vm4, %v10751_v13, -inf }
 0x434   : > { %v3160_v56 = vpop.f32.mrb[53].mxu1  ;;  %v7732_v31 = vpop.f32.mrb[44].mxu0  ;;  %3772 = vadd.xlane.f32.xlu0 %v3771_v50  ;;  %v3786_v50 = vsel %vm3380_vm4, %v10729_v33, 0.0 }
 0x435   : > { %v3023_v44 = vpop.f32.mrb[45].mxu0 }
 0x437   : > { %v7763_v22 = vpop.f32.mrb[54].mxu1  ;;  %3781 = vadd.xlane.f32.xlu1 %v3780_v57  ;;  %v3783_v57 = vsel %vm3380_vm4, %v10733_v10, 0.0 }
 0x438   : > { %v3170_v11 = vpop.f32.mrb[55].mxu1  ;;  %v7735_v53 = vpop.f32.mrb[46].mxu0  ;;  %3778 = vadd.xlane.f32.xlu0 %v3777_v41  ;;  %v3501_v41 = vsel %vm3380_vm4, %v10739_v23, -inf }
 0x439   : > { %v3033_v17 = vpop.f32.mrb[47].mxu0 }
 0x43b   : > { %3787 = vadd.xlane.f32.xlu1 %v3786_v50  ;;  %v10755_v50 = vmul.f32 0.35355338, %v3013_v12 }
 0x43c   : > { %3784 = vadd.xlane.f32.xlu0 %v3783_v57  ;;  %v10759_v57 = vmul.f32 0.35355338, %v7757_v49 }
 0x43d   : > { %v3507_v55 = vsel %vm3380_vm4, %v10755_v50, -inf }
 0x43e   : > { %v3534_v12 = vsel %vm3380_vm4, %v10759_v57, -inf }
 0x43f   : > { %3505 = vmax.xlane.f32.xlu1 %v3504_v20  ;;  %v10763_v20 = vmul.f32 0.35355338, %v3150_v4 }
 0x440   : > { %3502 = vmax.xlane.f32.xlu0 %v3501_v41  ;;  %v10767_v41 = vmul.f32 0.35355338, %v7732_v31 }
 0x441   : > { %v3531_v49 = vsel %vm3380_vm4, %v10763_v20, -inf }
 0x442   : > { %v3516_v4 = vsel %vm3380_vm4, %v10767_v41, -inf }
 0x443   : > { %3529 = vmax.xlane.f32.xlu1 %v3528_v7  ;;  %v10771_v7 = vmul.f32 0.35355338, %v3023_v44 }
 0x444   : > { %3526 = vmax.xlane.f32.xlu0 %v3525_v59  ;;  %v10775_v59 = vmul.f32 0.35355338, %v7760_v58 }
 0x445   : > { %12256 = vst [vmem:[#allocation29_spill] sm:$0xff] %v10771_v7  ;;  %v3513_v31 = vsel %vm3380_vm4, %v10771_v7, -inf }
 0x446   : > { %v3540_v44 = vsel %vm3380_vm4, %v10775_v59, -inf }
 0x447   : > { %3511 = vmax.xlane.f32.xlu1 %v3510_v47  ;;  %v10779_v47 = vmul.f32 0.35355338, %v3160_v56  ;;  %v10791_v56 = vmul.f32 0.35355338, %v7763_v22 }
 0x448   : > { %3508 = vmax.xlane.f32.xlu0 %v3507_v55  ;;  %v10783_v55 = vmul.f32 0.35355338, %v7735_v53 }
 0x449   : > { %12257 = vst [vmem:[#allocation30_spill] sm:$0xff] %v10779_v47  ;;  %v3537_v58 = vsel %vm3380_vm4, %v10779_v47, -inf  ;;  %12260 = vst [vmem:[#allocation33_spill] sm:$0xff] %v10791_v56 }
 0x44a   : > { %12258 = vst [vmem:[#allocation31_spill] sm:$0xff] %v10783_v55 }
 0x44b   : > { %3535 = vmax.xlane.f32.xlu1 %v3534_v12  ;;  %v10787_v12 = vmul.f32 0.35355338, %v3033_v17 }
 0x44c   : > { %3532 = vmax.xlane.f32.xlu0 %v3531_v49 }
 0x44d   : > { %12259 = vst [vmem:[#allocation32_spill] sm:$0xff] %v10787_v12  ;;  %v3519_v53 = vsel %vm3380_vm4, %v10787_v12, -inf }
 0x44f   : > { %3517 = vmax.xlane.f32.xlu1 %v3516_v4  ;;  %v3522_v4 = vsel %vm3380_vm4, %v10783_v55, -inf }
 0x450   : > { %3514 = vmax.xlane.f32.xlu0 %v3513_v31  ;;  %v10795_v31 = vmul.f32 0.35355338, %v3170_v11 }
 0x452   : > { %12261 = vst [vmem:[#allocation34_spill] sm:$0xff] %v10795_v31  ;;  %v3543_v55 = vsel %vm3380_vm4, %v10795_v31, -inf }
 0x453   : > { %3541 = vmax.xlane.f32.xlu1 %v3540_v44 }
 0x454   : > { %3538 = vmax.xlane.f32.xlu0 %v3537_v58  ;;  %v3546_v58 = vsel %vm3380_vm4, %v10791_v56, -inf }
 0x455   : > { %v7782_v49 = vpop.f32.mrb[48].mxu0 }
 0x456   : > { %v3277_v7 = vpop.f32.mrb[49].mxu0  ;;  %v10799_v44 = vmul.f32 0.35355338, %v7782_v49 }
 0x457   : > { %3523 = vmax.xlane.f32.xlu1 %v3522_v4  ;;  %v10803_v22 = vmul.f32 0.35355338, %v3277_v7 }
 0x458   : > { %3520 = vmax.xlane.f32.xlu0 %v3519_v53  ;;  %12262 = vst [vmem:[#allocation35_spill] sm:$0xff] %v10799_v44  ;;  %v3552_v53 = vsel %vm3380_vm4, %v10799_v44, -inf }
 0x459   : > { %v7785_v17 = vpop.f32.mrb[50].mxu0  ;;  %12263 = vst [vmem:[#allocation36_spill] sm:$0xff] %v10803_v22  ;;  %v3549_v56 = vsel %vm3380_vm4, %v10803_v22, -inf }
 0x45a   : > { %v3287_v47 = vpop.f32.mrb[51].mxu0  ;;  %v10807_v4 = vmul.f32 0.35355338, %v7785_v17 }
 0x45b   : > { %3547 = vmax.xlane.f32.xlu1 %v3546_v58  ;;  %v10811_v49 = vmul.f32 0.35355338, %v3287_v47 }
 0x45c   : > { %3544 = vmax.xlane.f32.xlu0 %v3543_v55  ;;  %12264 = vst [vmem:[#allocation37_spill] sm:$0xff] %v10807_v4  ;;  %v3558_v55 = vsel %vm3380_vm4, %v10807_v4, -inf }
 0x45d   : > { %v7788_v11 = vpop.f32.mrb[52].mxu0  ;;  %12265 = vst [vmem:[#allocation38_spill] sm:$0xff] %v10811_v49  ;;  %v3555_v44 = vsel %vm3380_vm4, %v10811_v49, -inf }
 0x45e   : > { %v3297_v12 = vpop.f32.mrb[53].mxu0  ;;  %v10815_v58 = vmul.f32 0.35355338, %v7788_v11 }
 0x45f   : > { %3553 = vmax.xlane.f32.xlu1 %v3552_v53  ;;  %v10819_v17 = vmul.f32 0.35355338, %v3297_v12 }
 0x460   : > { %3550 = vmax.xlane.f32.xlu0 %v3549_v56  ;;  %12266 = vst [vmem:[#allocation39_spill] sm:$0xff] %v10815_v58  ;;  %v3564_v53 = vsel %vm3380_vm4, %v10815_v58, -inf }
 0x461   : > { %v7791_v7 = vpop.f32.mrb[54].mxu0  ;;  %12267 = vst [vmem:[#allocation40_spill] sm:$0xff] %v10819_v17  ;;  %v3561_v11 = vsel %vm3380_vm4, %v10819_v17, -inf }
 0x462   : > { %v3307_v31 = vpop.f32.mrb[55].mxu0  ;;  %v10823_v47 = vmul.f32 0.35355338, %v7791_v7 }
 0x463   : > { %3559 = vmax.xlane.f32.xlu1 %v3558_v55  ;;  %v10827_v56 = vmul.f32 0.35355338, %v3307_v31 }
 0x464   : > { %3556 = vmax.xlane.f32.xlu0 %v3555_v44  ;;  %12268 = vst [vmem:[#allocation41_spill] sm:$0xff] %v10823_v47  ;;  %v3570_v12 = vsel %vm3380_vm4, %v10823_v47, -inf }
 0x465   : > { %12269 = vst [vmem:[#allocation42_spill] sm:$0xff] %v10827_v56  ;;  %v3567_v55 = vsel %vm3380_vm4, %v10827_v56, -inf }
 0x467   : > { %3565 = vmax.xlane.f32.xlu1 %v3564_v53 }
 0x468   : > { %3562 = vmax.xlane.f32.xlu0 %v3561_v11 }
 0x46b   : > { %3571 = vmax.xlane.f32.xlu1 %v3570_v12 }
 0x46c   : > { %3568 = vmax.xlane.f32.xlu0 %v3567_v55 }
 0x47b   : > { %v3410_v44 = vpop.xlane.xlu1 %3409 }
 0x47c   : > { %v3582_v7 = vsub.f32 %v10553_v45, %v3410_v44  ;;  %v3407_v49 = vpop.xlane.xlu0 %3406 }
 0x47d   : > { %v3581_v31 = vsub.f32 %v10555_v34, %v3407_v49 }
 0x47e   : > { %v3655_v58 = vmul.f32 1.442695, %v3582_v7 }
 0x47f   : > { %v3653_v53 = vmul.f32 1.442695, %v3581_v31  ;;  %v3434_v4 = vpop.xlane.xlu1 %3433 }
 0x480   : > { %8850 = vpow2.f32 %v3655_v58  ;;  %v3590_v11 = vsub.f32 %v10557_v36, %v3434_v4  ;;  %v3431_v17 = vpop.xlane.xlu0 %3430 }
 0x481   : > { %8852 = vpow2.f32 %v3653_v53  ;;  %v3589_v12 = vsub.f32 %v10561_v5, %v3431_v17 }
 0x482   : > { %v3671_v47 = vmul.f32 1.442695, %v3590_v11 }
 0x483   : > { %v3669_v22 = vmul.f32 1.442695, %v3589_v12  ;;  %v3416_v56 = vpop.xlane.xlu1 %3415 }
 0x484   : > { %8854 = vpow2.f32 %v3671_v47  ;;  %v3584_v55 = vsub.f32 %v10567_v21, %v3416_v56  ;;  %v3413_v45 = vpop.xlane.xlu0 %3412 }
 0x485   : > { %8856 = vpow2.f32 %v3669_v22  ;;  %v3583_v34 = vsub.f32 %v10571_v48, %v3413_v45 }
 0x486   : > { %v3659_v49 = vmul.f32 1.442695, %v3584_v55 }
 0x487   : > { %v3657_v44 = vmul.f32 1.442695, %v3583_v34  ;;  %v3440_v7 = vpop.xlane.xlu1 %3439 }
 0x488   : > { %8858 = vpow2.f32 %v3659_v49  ;;  %v3592_v36 = vsub.f32 %v10577_v18, %v3440_v7  ;;  %v3437_v4 = vpop.xlane.xlu0 %3436 }
 0x489   : > { %8860 = vpow2.f32 %v3657_v44  ;;  %v3591_v5 = vsub.f32 %v10583_v3, %v3437_v4 }
 0x48a   : > { %v10843_v58 = vpop.eup %8850  ;;  %v3675_v17 = vmul.f32 1.442695, %v3592_v36 }
 0x48b   : > { %v10845_v47 = vpop.eup %8852  ;;  %v3673_v21 = vmul.f32 1.442695, %v3591_v5  ;;  %v3422_v56 = vpop.xlane.xlu1 %3421  ;;  %v3792_v48 = vsel %vm3380_vm4, %v10843_v58, 0.0 }
 0x48c   : > { %8862 = vpow2.f32 %v3675_v17  ;;  %v3586_v22 = vsub.f32 %v10587_v52, %v3422_v56  ;;  %v3419_v31 = vpop.xlane.xlu0 %3418  ;;  %3793 = vadd.xlane.f32.xlu1 %v3792_v48  ;;  %v3789_v18 = vsel %vm3380_vm4, %v10845_v47, 0.0 }
 0x48d   : > { %v3585_v3 = vsub.f32 %v10593_v15, %v3419_v31  ;;  %3790 = vadd.xlane.f32.xlu0 %v3789_v18  ;;  %8864 = vpow2.f32 %v3673_v21 }
 0x48e   : > { %v10853_v53 = vpop.eup %8854  ;;  %v3663_v11 = vmul.f32 1.442695, %v3586_v22 }
 0x48f   : > { %v10855_v12 = vpop.eup %8856  ;;  %v3661_v55 = vmul.f32 1.442695, %v3585_v3  ;;  %v3446_v45 = vpop.xlane.xlu1 %3445  ;;  %v3816_v34 = vsel %vm3380_vm4, %v10853_v53, 0.0 }
 0x490   : > { %v3594_v52 = vsub.f32 %v10599_v46, %v3446_v45  ;;  %v3443_v49 = vpop.xlane.xlu0 %3442  ;;  %3817 = vadd.xlane.f32.xlu1 %v3816_v34  ;;  %v3813_v44 = vsel %vm3380_vm4, %v10855_v12, 0.0 }
 0x491   : > { %8866 = vpow2.f32 %v3661_v55  ;;  %v3593_v15 = vsub.f32 %v10603_v42, %v3443_v49  ;;  %3814 = vadd.xlane.f32.xlu0 %v3813_v44 }
 0x492   : > { %v10863_v7 = vpop.eup %8858  ;;  %8868 = vpow2.f32 %v3663_v11  ;;  %v3679_v36 = vmul.f32 1.442695, %v3594_v52 }
 0x493   : > { %v10865_v4 = vpop.eup %8860  ;;  %v3677_v5 = vmul.f32 1.442695, %v3593_v15  ;;  %v3428_v17 = vpop.xlane.xlu1 %3427  ;;  %v3798_v46 = vsel %vm3380_vm4, %v10863_v7, 0.0 }
 0x494   : > { %v3588_v21 = vsub.f32 %v10609_v8, %v3428_v17  ;;  %v3425_v56 = vpop.xlane.xlu0 %3424  ;;  %3799 = vadd.xlane.f32.xlu1 %v3798_v46  ;;  %v3795_v48 = vsel %vm3380_vm4, %v10865_v4, 0.0 }
 0x495   : > { %8870 = vpow2.f32 %v3677_v5  ;;  %3796 = vadd.xlane.f32.xlu0 %v3795_v48  ;;  %v3587_v45 = vsub.f32 %v10613_v2, %v3425_v56 }
 0x496   : > { %v10872_v42 = vpop.eup %8862  ;;  %8872 = vpow2.f32 %v3679_v36  ;;  %v3667_v22 = vmul.f32 1.442695, %v3588_v21 }
 0x497   : > { %v3452_v31 = vpop.xlane.xlu1 %3451  ;;  %v3822_v18 = vsel %vm3380_vm4, %v10872_v42, 0.0  ;;  %v10876_v3 = vpop.eup %8864  ;;  %v3665_v2 = vmul.f32 1.442695, %v3587_v45 }
 0x498   : > { %v3596_v11 = vsub.f32 %v10619_v35, %v3452_v31  ;;  %v3449_v8 = vpop.xlane.xlu0 %3448  ;;  %3823 = vadd.xlane.f32.xlu1 %v3822_v18  ;;  %8874 = vpow2.f32 %v3667_v22  ;;  %v3819_v44 = vsel %vm3380_vm4, %v10876_v3, 0.0 }
 0x499   : > { %v3595_v55 = vsub.f32 %v10625_v19, %v3449_v8 }
 0x49a   : > { %v3683_v34 = vmul.f32 1.442695, %v3596_v11 }
 0x49b   : > { %v10881_v52 = vpop.eup %8866  ;;  %v3681_v49 = vmul.f32 1.442695, %v3595_v55 }
 0x49c   : > { %v10885_v15 = vpop.eup %8868  ;;  %v3458_v36 = vpop.xlane.xlu1 %3457  ;;  %3820 = vadd.xlane.f32.xlu1 %v3819_v44  ;;  %v3801_v35 = vsel %vm3380_vm4, %v10881_v52, 0.0 }
 0x49d   : > { %8876 = vpow2.f32 %v3681_v49  ;;  %v3598_v19 = vsub.f32 %v10635_v60, %v3458_v36  ;;  %v3455_v5 = vpop.xlane.xlu0 %3454  ;;  %3802 = vadd.xlane.f32.xlu0 %v3801_v35  ;;  %v3804_v56 = vsel %vm3380_vm4, %v10885_v15, 0.0 }
 0x49e   : > { %8878 = vpow2.f32 %v3683_v34  ;;  %v3597_v17 = vsub.f32 %v10637_v38, %v3455_v5 }
 0x49f   : > { %v10891_v46 = vpop.eup %8870  ;;  %v3687_v21 = vmul.f32 1.442695, %v3598_v19 }
 0x4a0   : > { %v10895_v48 = vpop.eup %8872  ;;  %v3685_v22 = vmul.f32 1.442695, %v3597_v17  ;;  %v3482_v31 = vpop.xlane.xlu1 %3481  ;;  %3805 = vadd.xlane.f32.xlu1 %v3804_v56  ;;  %v3825_v60 = vsel %vm3380_vm4, %v10891_v46, 0.0 }
 0x4a1   : > { %8880 = vpow2.f32 %v3687_v21  ;;  %v3606_v18 = vsub.f32 %v10639_v30, %v3482_v31  ;;  %v3479_v11 = vpop.xlane.xlu0 %3478  ;;  %3826 = vadd.xlane.f32.xlu0 %v3825_v60  ;;  %v3828_v55 = vsel %vm3380_vm4, %v10895_v48, 0.0 }
 0x4a2   : > { %8882 = vpow2.f32 %v3665_v2  ;;  %v3605_v38 = vsub.f32 %v10643_v14, %v3479_v11  ;;  %v10903_v45 = vpop.eup %8874 }
 0x4a3   : > { %8884 = vpow2.f32 %v3685_v22  ;;  %v3703_v8 = vmul.f32 1.442695, %v3606_v18  ;;  %v3810_v14 = vsel %vm3380_vm4, %v10903_v45, 0.0 }
 0x4a4   : > { %v3701_v34 = vmul.f32 1.442695, %v3605_v38  ;;  %v3464_v49 = vpop.xlane.xlu1 %3463  ;;  %3829 = vadd.xlane.f32.xlu1 %v3828_v55 }
 0x4a5   : > { %v3600_v44 = vsub.f32 %v10649_v6, %v3464_v49  ;;  %v3461_v36 = vpop.xlane.xlu0 %3460  ;;  %8886 = vpow2.f32 %v3703_v8 }
 0x4a6   : > { %8888 = vpow2.f32 %v3701_v34  ;;  %v3599_v17 = vsub.f32 %v10653_v32, %v3461_v36 }
 0x4a7   : > { %v10906_v30 = vpop.eup %8876  ;;  %v3691_v35 = vmul.f32 1.442695, %v3600_v44 }
 0x4a8   : > { %v10910_v19 = vpop.eup %8878  ;;  %v3488_v5 = vpop.xlane.xlu1 %3487  ;;  %3811 = vadd.xlane.f32.xlu1 %v3810_v14  ;;  %v3831_v2 = vsel %vm3380_vm4, %v10906_v30, 0.0  ;;  %v3689_v8 = vmul.f32 1.442695, %v3599_v17 }
 0x4a9   : > { %v3608_v6 = vsub.f32 %v10657_v1, %v3488_v5  ;;  %v3485_v21 = vpop.xlane.xlu0 %3484  ;;  %3832 = vadd.xlane.f32.xlu0 %v3831_v2  ;;  %8890 = vpow2.f32 %v3691_v35  ;;  %v3834_v60 = vsel %vm3380_vm4, %v10910_v19, 0.0 }
 0x4aa   : > { %v3607_v56 = vsub.f32 %v10661_v63, %v3485_v21 }
 0x4ab   : > { %v10917_v22 = vpop.eup %8880  ;;  %v3707_v31 = vmul.f32 1.442695, %v3608_v6 }
 0x4ac   : > { %v10921_v18 = vpop.eup %8882  ;;  %v3705_v11 = vmul.f32 1.442695, %v3607_v56  ;;  %v3470_v38 = vpop.xlane.xlu1 %3469  ;;  %3835 = vadd.xlane.f32.xlu1 %v3834_v60  ;;  %v3840_v32 = vsel %vm3380_vm4, %v10917_v22, 0.0 }
 0x4ad   : > { %v10925_v1 = vpop.eup %8884  ;;  %8892 = vpow2.f32 %v3707_v31  ;;  %v3602_v63 = vsub.f32 %v10665_v61, %v3470_v38  ;;  %v3467_v55 = vpop.xlane.xlu0 %3466  ;;  %3841 = vadd.xlane.f32.xlu0 %v3840_v32  ;;  %v3807_v49 = vsel %vm3380_vm4, %v10921_v18, 0.0 }
 0x4ae   : > { %8894 = vpow2.f32 %v3705_v11  ;;  %v3601_v34 = vsub.f32 %v10669_v27, %v3467_v55  ;;  %v3837_v14 = vsel %vm3380_vm4, %v10925_v1, 0.0 }
 0x4af   : > { %v10931_v44 = vpop.eup %8886  ;;  %8896 = vpow2.f32 %v3689_v8  ;;  %v3695_v61 = vmul.f32 1.442695, %v3602_v63 }
 0x4b0   : > { %v3693_v36 = vmul.f32 1.442695, %v3601_v34  ;;  %v3494_v35 = vpop.xlane.xlu1 %3493  ;;  %3808 = vadd.xlane.f32.xlu1 %v3807_v49  ;;  %v10935_v5 = vpop.eup %8888  ;;  %v3864_v6 = vsel %vm3380_vm4, %v10931_v44, 0.0 }
 0x4b1   : > { %v3491_v2 = vpop.xlane.xlu0 %3490  ;;  %3838 = vadd.xlane.f32.xlu0 %v3837_v14  ;;  %v3610_v27 = vsub.f32 %v10675_v26, %v3494_v35  ;;  %v3861_v60 = vsel %vm3380_vm4, %v10935_v5, 0.0 }
 0x4b2   : > { %8898 = vpow2.f32 %v3693_v36  ;;  %v3609_v17 = vsub.f32 %v10679_v62, %v3491_v2 }
 0x4b3   : > { %v10941_v21 = vpop.eup %8890  ;;  %8900 = vpow2.f32 %v3695_v61  ;;  %v3711_v38 = vmul.f32 1.442695, %v3610_v27 }
 0x4b4   : > { %v3709_v56 = vmul.f32 1.442695, %v3609_v17  ;;  %v3770_v31 = vpop.xlane.xlu1 %3769  ;;  %3865 = vadd.xlane.f32.xlu1 %v3864_v6  ;;  %v3846_v26 = vsel %vm3380_vm4, %v10941_v21, 0.0 }
 0x4b5   : > { %v3767_v11 = vpop.xlane.xlu0 %3766  ;;  %3862 = vadd.xlane.f32.xlu0 %v3861_v60 }
 0x4b6   : > { %8902 = vpow2.f32 %v3709_v56 }
 0x4b7   : > { %v10945_v32 = vpop.eup %8892  ;;  %8904 = vrcp.f32 %v3770_v31 }
 0x4b8   : > { %v10949_v62 = vpop.eup %8894  ;;  %8906 = vrcp.f32 %v3767_v11  ;;  %v3476_v8 = vpop.xlane.xlu1 %3475  ;;  %3847 = vadd.xlane.f32.xlu1 %v3846_v26  ;;  %v3870_v14 = vsel %vm3380_vm4, %v10945_v32, 0.0 }
 0x4b9   : > { %v3604_v63 = vsub.f32 %v10695_v43, %v3476_v8  ;;  %v3473_v55 = vpop.xlane.xlu0 %3472  ;;  %v3867_v34 = vsel %vm3380_vm4, %v10949_v62, 0.0  ;;  %8908 = vpow2.f32 %v3711_v38  ;;  %v10955_v36 = vpop.eup %8896 }
 0x4ba   : > { %v3603_v49 = vsub.f32 %v10699_v40, %v3473_v55  ;;  %3868 = vadd.xlane.f32.xlu0 %v3867_v34  ;;  %v3843_v60 = vsel %vm3380_vm4, %v10955_v36, 0.0  ;;  %v8685_v34 = vunpack.i.l.bf16 %v10500_v39 }
 0x4bb   : > { %v3699_v35 = vmul.f32 1.442695, %v3604_v63 }
 0x4bc   : > { %v10959_v61 = vpop.eup %8898  ;;  %v3697_v2 = vmul.f32 1.442695, %v3603_v49  ;;  %v3500_v27 = vpop.xlane.xlu1 %3499  ;;  %3871 = vadd.xlane.f32.xlu1 %v3870_v14 }
 0x4bd   : > { %8910 = vpow2.f32 %v3699_v35  ;;  %v3612_v43 = vsub.f32 %v10703_v29, %v3500_v27  ;;  %v3497_v17 = vpop.xlane.xlu0 %3496  ;;  %v3849_v6 = vsel %vm3380_vm4, %v10959_v61, 0.0  ;;  %v10965_v56 = vpop.eup %8900 }
 0x4be   : > { %8912 = vpow2.f32 %v3697_v2  ;;  %v3611_v40 = vsub.f32 %v10707_v28, %v3497_v17  ;;  %3850 = vadd.xlane.f32.xlu0 %v3849_v6  ;;  %v8686_v28 = vunpack.i.h.bf16 %v10500_v39  ;;  %v3852_v35 = vsel %vm3380_vm4, %v10965_v56, 0.0 }
 0x4bf   : > { %v3715_v31 = vmul.f32 1.442695, %v3612_v43  ;;  %v8691_v39 = vunpack.i.h.bf16 %v10520_v25  ;;  %v8690_v17 = vunpack.i.l.bf16 %v10520_v25 }
 0x4c0   : > { %v10969_v11 = vpop.eup %8902  ;;  %v3776_v38 = vpop.xlane.xlu1 %3775  ;;  %3844 = vadd.xlane.f32.xlu1 %v3843_v60  ;;  %v3713_v29 = vmul.f32 1.442695, %v3611_v40 }
 0x4c1   : > { %v8905_v26 = vpop.eup %8904  ;;  %v3773_v8 = vpop.xlane.xlu0 %3772  ;;  %v3873_v63 = vsel %vm3380_vm4, %v10969_v11, 0.0  ;;  %8914 = vpow2.f32 %v3715_v31 }
 0x4c2   : > { %v8907_v55 = vpop.eup %8906  ;;  %3874 = vadd.xlane.f32.xlu0 %v3873_v63  ;;  %8916 = vrcp.f32 %v3776_v38  ;;  %v4022_v2 = vmul.f32 %v8905_v26, %v10687_v51  ;;  %v8696_v38 = vunpack.i.h.bf16 %v10515_v54  ;;  %v8695_v26 = vunpack.i.l.bf16 %v10515_v54 }
 0x4c3   : > { %v4021_v49 = vmul.f32 %v8907_v55, %v10691_v37  ;;  %v10978_v14 = vpop.eup %8908  ;;  %8918 = vrcp.f32 %v3773_v8  ;;  %v8372_v37 = vpack.c.bf16 %v8686_v28, %v8685_v34 }
 0x4c4   : > { %v3782_v27 = vpop.xlane.xlu1 %3781  ;;  %3853 = vadd.xlane.f32.xlu1 %v3852_v35  ;;  %8920 = vpow2.f32 %v3713_v29  ;;  %v3876_v51 = vsel %vm3380_vm4, %v10978_v14, 0.0  ;;  %v8376_v29 = vpack.c.bf16 %v8691_v39, %v8690_v17  ;;  %v12270_v35 = vld [vmem:[#allocation13_spill] sm:$0xff] }
 0x4c5   : > { %7808 = vmatprep.mubr.msk.f32.mxu1 %vm3380_vm4, %v4021_v49  ;;  %v3779_v43 = vpop.xlane.xlu0 %3778  ;;  %v8706_v54 = vunpack.i.h.bf16 %v12270_v35 }
 0x4c6   : > { %7809 = vmatmul.mubr.msk.f32.vlgmr.msra.gmra.mrb[56].mxu1 %vm3380_vm4, %v4022_v2  ;;  %8922 = vrcp.f32 %v3779_v43  ;;  %v8705_v2 = vunpack.i.l.bf16 %v12270_v35 }
 0x4c7   : > { %v10985_v6 = vpop.eup %8910  ;;  %8371 = vmatpush3.bf16.msra.mxu1 %v10507_v24  ;;  %8924 = vrcp.f32 %v3782_v27  ;;  %v8380_v27 = vpack.c.bf16 %v8696_v38, %v8695_v26 }
 0x4c8   : > { %v10990_v40 = vpop.eup %8912  ;;  %8373 = vmatprep.subr.bf16.mxu1 %v8372_v37  ;;  %v3788_v31 = vpop.xlane.xlu1 %3787  ;;  %3877 = vadd.xlane.f32.xlu1 %v3876_v51  ;;  %v3858_v24 = vsel %vm3380_vm4, %v10985_v6, 0.0 }
 0x4c9   : > { %v3785_v60 = vpop.xlane.xlu0 %3784  ;;  %v3855_v25 = vsel %vm3380_vm4, %v10990_v40, 0.0 }
 0x4ca   : > { %8926 = vrcp.f32 %v3785_v60  ;;  %3856 = vadd.xlane.f32.xlu0 %v3855_v25 }
 0x4cb   : > { %8375 = vmatpush3.bf16.msra.mxu1 %v8372_v37  ;;  %8928 = vrcp.f32 %v3788_v31  ;;  %v10998_v8 = vpop.eup %8914  ;;  %v12271_v37 = vld [vmem:[#allocation26_spill] sm:$0xff] }
 0x4cc   : > { %8377 = vmatprep.subr.bf16.mxu1 %v8376_v29  ;;  %v3506_v63 = vpop.xlane.xlu1 %3505  ;;  %3859 = vadd.xlane.f32.xlu1 %v3858_v24  ;;  %v8917_v55 = vpop.eup %8916  ;;  %v3882_v31 = vsel %vm3380_vm4, %v10998_v8, 0.0 }
 0x4cd   : > { %v3614_v28 = vsub.f32 %v10735_v16, %v3506_v63  ;;  %v3503_v34 = vpop.xlane.xlu0 %3502  ;;  %v8919_v49 = vpop.eup %8918  ;;  %v12272_v16 = vld [vmem:[#allocation25_spill] sm:$0xff] }
 0x4ce   : > { %v11003_v43 = vpop.eup %8920  ;;  %v3613_v17 = vsub.f32 %v10739_v23, %v3503_v34  ;;  %v4023_v51 = vmul.f32 %v8919_v49, %v12271_v37  ;;  %v4024_v25 = vmul.f32 %v8917_v55, %v12272_v16  ;;  %v12274_v37 = vld [vmem:[#allocation27_spill] sm:$0xff] }
 0x4cf   : > { %8379 = vmatpush3.bf16.msra.mxu1 %v8376_v29  ;;  %v3719_v39 = vmul.f32 1.442695, %v3614_v28  ;;  %v12273_v29 = vld [vmem:[#allocation28_spill] sm:$0xff]  ;;  %v11014_v28 = vpack.c.bf16 %v8706_v54, %v8705_v2  ;;  %v3879_v35 = vsel %vm3380_vm4, %v11003_v43, 0.0 }
 0x4d0   : > { %v8923_v60 = vpop.eup %8922  ;;  %8381 = vmatprep.subr.bf16.mxu1 %v8380_v27  ;;  %v3530_v24 = vpop.xlane.xlu1 %3529  ;;  %3883 = vadd.xlane.f32.xlu1 %v3882_v31  ;;  %v3717_v49 = vmul.f32 1.442695, %v3613_v17 }
 0x4d1   : > { %v8925_v63 = vpop.eup %8924  ;;  %8930 = vpow2.f32 %v3719_v39  ;;  %7811 = vmatprep.mubr.msk.f32.mxu1 %vm3380_vm4, %v4023_v51  ;;  %v3622_v38 = vsub.f32 %v10743_v9, %v3530_v24  ;;  %v3527_v26 = vpop.xlane.xlu0 %3526  ;;  %v4025_v23 = vmul.f32 %v8923_v60, %v12273_v29 }
 0x4d2   : > { %7812 = vmatmul.mubr.msk.f32.gmra.mrb[58].mxu1 %vm3380_vm4, %v4024_v25  ;;  %v3621_v34 = vsub.f32 %v10747_v0, %v3527_v26  ;;  %v4026_v51 = vmul.f32 %v8925_v63, %v12274_v37 }
 0x4d3   : > { %8383 = vmatpush3.bf16.msra.mxu1 %v8380_v27  ;;  %v3735_v55 = vmul.f32 1.442695, %v3622_v38  ;;  %7814 = vmatprep.mubr.msk.f32.mxu1 %vm3380_vm4, %v4025_v23 }
 0x4d4   : > { %v8927_v39 = vpop.eup %8926  ;;  %8401 = vmatprep.subr.bf16.mxu1 %v11014_v28  ;;  %v3733_v9 = vmul.f32 1.442695, %v3621_v34  ;;  %v3512_v31 = vpop.xlane.xlu1 %3511  ;;  %3880 = vadd.xlane.f32.xlu1 %v3879_v35 }
 0x4d5   : > { %v8929_v54 = vpop.eup %8928  ;;  %8932 = vpow2.f32 %v3735_v55  ;;  %v3616_v0 = vsub.f32 %v10751_v13, %v3512_v31  ;;  %v3509_v2 = vpop.xlane.xlu0 %3508  ;;  %v4027_v27 = vmul.f32 %v8927_v39, %v10733_v10 }
 0x4d6   : > { %8934 = vpow2.f32 %v3733_v9  ;;  %7815 = vmatmul.mubr.msk.f32.gmra.mrb[60].mxu1 %vm3380_vm4, %v4026_v51  ;;  %v3615_v60 = vsub.f32 %v10755_v50, %v3509_v2  ;;  %v4028_v16 = vmul.f32 %v8929_v54, %v10729_v33  ;;  %v12275_v51 = vld [vmem:[#allocation29_spill] sm:$0xff]  ;;  %v12276_v54 = vld [vmem:[#allocation30_spill] sm:$0xff] }
 0x4d7   : > { %8936 = vpow2.f32 %v3717_v49  ;;  %v3723_v17 = vmul.f32 1.442695, %v3616_v0  ;;  %7817 = vmatprep.mubr.msk.f32.mxu1 %vm3380_vm4, %v4027_v27 }
 0x4d8   : > { %v3536_v25 = vpop.xlane.xlu1 %3535  ;;  %v3721_v38 = vmul.f32 1.442695, %v3615_v60 }
 0x4d9   : > { %8938 = vpow2.f32 %v3723_v17  ;;  %v3624_v24 = vsub.f32 %v10759_v57, %v3536_v25  ;;  %v3533_v63 = vpop.xlane.xlu0 %3532  ;;  %v12277_v25 = vld [vmem:[#allocation31_spill] sm:$0xff] }
 0x4da   : > { %7818 = vmatmul.mubr.msk.f32.gmra.mrb[62].mxu1 %vm3380_vm4, %v4028_v16  ;;  %v3623_v10 = vsub.f32 %v10763_v20, %v3533_v63 }
 0x4db   : > { %v11031_v13 = vpop.eup %8930  ;;  %v3739_v26 = vmul.f32 1.442695, %v3624_v24 }
 0x4dc   : > { %v3737_v29 = vmul.f32 1.442695, %v3623_v10  ;;  %v3518_v23 = vpop.xlane.xlu1 %3517  ;;  %v3888_v50 = vsel %vm3380_vm4, %v11031_v13, 0.0 }
 0x4dd   : > { %8940 = vpow2.f32 %v3739_v26  ;;  %v3618_v33 = vsub.f32 %v10767_v41, %v3518_v23  ;;  %v3515_v34 = vpop.xlane.xlu0 %3514  ;;  %3889 = vadd.xlane.f32.xlu1 %v3888_v50  ;;  %v12278_v23 = vld [vmem:[#allocation32_spill] sm:$0xff] }
 0x4de   : > { %8942 = vpow2.f32 %v3737_v29  ;;  %v3617_v31 = vsub.f32 %v12275_v51, %v3515_v34 }
 0x4df   : > { %v11036_v57 = vpop.eup %8932  ;;  %8944 = vpow2.f32 %v3721_v38  ;;  %v3727_v49 = vmul.f32 1.442695, %v3618_v33 }
 0x4e0   : > { %v11038_v20 = vpop.eup %8934  ;;  %v3542_v55 = vpop.xlane.xlu1 %3541  ;;  %v3912_v35 = vsel %vm3380_vm4, %v11036_v57, 0.0  ;;  %v3725_v10 = vmul.f32 1.442695, %v3617_v31 }
 0x4e1   : > { %v11042_v39 = vpop.eup %8936  ;;  %v3626_v9 = vsub.f32 %v10775_v59, %v3542_v55  ;;  %v3539_v37 = vpop.xlane.xlu0 %3538  ;;  %3913 = vadd.xlane.f32.xlu0 %v3912_v35  ;;  %v3909_v41 = vsel %vm3380_vm4, %v11038_v20, 0.0  ;;  %8946 = vpow2.f32 %v3727_v49  ;;  %v12279_v55 = vld [vmem:[#allocation33_spill] sm:$0xff] }
 0x4e2   : > { %v3625_v0 = vsub.f32 %v12276_v54, %v3539_v37  ;;  %3910 = vadd.xlane.f32.xlu1 %v3909_v41  ;;  %v3885_v16 = vsel %vm3380_vm4, %v11042_v39, 0.0  ;;  %v12280_v41 = vld [vmem:[#allocation34_spill] sm:$0xff] }
 0x4e3   : > { %v11049_v2 = vpop.eup %8938  ;;  %v3743_v27 = vmul.f32 1.442695, %v3626_v9 }
 0x4e4   : > { %v3741_v17 = vmul.f32 1.442695, %v3625_v0  ;;  %v3524_v60 = vpop.xlane.xlu1 %3523  ;;  %v3894_v59 = vsel %vm3380_vm4, %v11049_v2, 0.0 }
 0x4e5   : > { %v3620_v24 = vsub.f32 %v12277_v25, %v3524_v60  ;;  %v3521_v63 = vpop.xlane.xlu0 %3520  ;;  %3886 = vadd.xlane.f32.xlu0 %v3885_v16  ;;  %v12281_v16 = vld [vmem:[#allocation35_spill] sm:$0xff] }
 0x4e6   : > { %8948 = vpow2.f32 %v3741_v17  ;;  %3895 = vadd.xlane.f32.xlu1 %v3894_v59  ;;  %v3619_v50 = vsub.f32 %v12278_v23, %v3521_v63 }
 0x4e7   : > { %v11056_v38 = vpop.eup %8940  ;;  %8950 = vpow2.f32 %v3743_v27  ;;  %v3731_v26 = vmul.f32 1.442695, %v3620_v24  ;;  %v12282_v24 = vld [vmem:[#allocation36_spill] sm:$0xff] }
 0x4e8   : > { %v11058_v29 = vpop.eup %8942  ;;  %v3548_v33 = vpop.xlane.xlu1 %3547  ;;  %v3918_v34 = vsel %vm3380_vm4, %v11056_v38, 0.0  ;;  %v3729_v54 = vmul.f32 1.442695, %v3619_v50 }
 0x4e9   : > { %v11063_v49 = vpop.eup %8944  ;;  %8952 = vpow2.f32 %v3731_v26  ;;  %v3628_v35 = vsub.f32 %v12279_v55, %v3548_v33  ;;  %v3545_v9 = vpop.xlane.xlu0 %3544  ;;  %3919 = vadd.xlane.f32.xlu0 %v3918_v34  ;;  %v3915_v37 = vsel %vm3380_vm4, %v11058_v29, 0.0  ;;  %v12284_v34 = vld [vmem:[#allocation37_spill] sm:$0xff] }
 0x4ea   : > { %8954 = vpow2.f32 %v3725_v10  ;;  %v3627_v51 = vsub.f32 %v12280_v41, %v3545_v9  ;;  %3916 = vadd.xlane.f32.xlu1 %v3915_v37  ;;  %v3891_v17 = vsel %vm3380_vm4, %v11063_v49, 0.0  ;;  %v12285_v37 = vld [vmem:[#allocation38_spill] sm:$0xff] }
 0x4eb   : > { %v3747_v31 = vmul.f32 1.442695, %v3628_v35  ;;  %v11071_v60 = vpop.eup %8946 }
 0x4ec   : > { %v3745_v0 = vmul.f32 1.442695, %v3627_v51  ;;  %v3554_v27 = vpop.xlane.xlu1 %3553  ;;  %v3900_v50 = vsel %vm3380_vm4, %v11071_v60, 0.0 }
 0x4ed   : > { %8956 = vpow2.f32 %v3747_v31  ;;  %v3630_v59 = vsub.f32 %v12281_v16, %v3554_v27  ;;  %v3551_v25 = vpop.xlane.xlu0 %3550  ;;  %3892 = vadd.xlane.f32.xlu0 %v3891_v17 }
 0x4ee   : > { %8958 = vpow2.f32 %v3745_v0  ;;  %v3629_v63 = vsub.f32 %v12282_v24, %v3551_v25  ;;  %v12286_v25 = vld [vmem:[#allocation39_spill] sm:$0xff] }
 0x4ef   : > { %8960 = vpow2.f32 %v3729_v54  ;;  %v3751_v26 = vmul.f32 1.442695, %v3630_v59 }
 0x4f0   : > { %v11075_v10 = vpop.eup %8948  ;;  %v3560_v23 = vpop.xlane.xlu1 %3559  ;;  %v3749_v31 = vmul.f32 1.442695, %v3629_v63 }
 0x4f1   : > { %v11079_v33 = vpop.eup %8950  ;;  %v3632_v55 = vsub.f32 %v12284_v34, %v3560_v23  ;;  %v3557_v35 = vpop.xlane.xlu0 %3556  ;;  %3901 = vadd.xlane.f32.xlu0 %v3900_v50  ;;  %v3921_v9 = vsel %vm3380_vm4, %v11075_v10, 0.0  ;;  %8962 = vpow2.f32 %v3751_v26  ;;  %v12288_v34 = vld [vmem:[#allocation40_spill] sm:$0xff] }
 0x4f2   : > { %12283 = vst [vmem:[#allocation13_spill] sm:$0xff] %v11079_v33  ;;  %v3631_v41 = vsub.f32 %v12285_v37, %v3557_v35  ;;  %3922 = vadd.xlane.f32.xlu1 %v3921_v9  ;;  %v3924_v16 = vsel %vm3380_vm4, %v11079_v33, 0.0 }
 0x4f3   : > { %v11085_v51 = vpop.eup %8952  ;;  %v3755_v54 = vmul.f32 1.442695, %v3632_v55 }
 0x4f4   : > { %v11087_v0 = vpop.eup %8954  ;;  %v3753_v27 = vmul.f32 1.442695, %v3631_v41  ;;  %v3566_v17 = vpop.xlane.xlu1 %3565  ;;  %v3906_v59 = vsel %vm3380_vm4, %v11085_v51, 0.0  ;;  %v12290_v41 = vld [vmem:[#allocation41_spill] sm:$0xff] }
 0x4f5   : > { %8964 = vpow2.f32 %v3755_v54  ;;  %v3634_v24 = vsub.f32 %v12286_v25, %v3566_v17  ;;  %v3563_v23 = vpop.xlane.xlu0 %3562  ;;  %3925 = vadd.xlane.f32.xlu0 %v3924_v16  ;;  %v3897_v63 = vsel %vm3380_vm4, %v11087_v0, 0.0 }
 0x4f6   : > { %3907 = vadd.xlane.f32.xlu1 %v3906_v59  ;;  %8966 = vpow2.f32 %v3753_v27  ;;  %v3633_v55 = vsub.f32 %v12288_v34, %v3563_v23 }
 0x4f7   : > { %v11094_v50 = vpop.eup %8956  ;;  %8968 = vpow2.f32 %v3749_v31  ;;  %v3759_v26 = vmul.f32 1.442695, %v3634_v24 }
 0x4f8   : > { %12287 = vst [vmem:[#allocation26_spill] sm:$0xff] %v11094_v50  ;;  %v3572_v35 = vpop.xlane.xlu1 %3571  ;;  %v3930_v9 = vsel %vm3380_vm4, %v11094_v50, 0.0  ;;  %v11101_v37 = vpop.eup %8958  ;;  %v3757_v16 = vmul.f32 1.442695, %v3633_v55 }
 0x4f9   : > { %12289 = vst [vmem:[#allocation25_spill] sm:$0xff] %v11101_v37  ;;  %v3636_v54 = vsub.f32 %v12290_v41, %v3572_v35  ;;  %3898 = vadd.xlane.f32.xlu0 %v3897_v63  ;;  %v11104_v17 = vpop.eup %8960  ;;  %8970 = vpow2.f32 %v3759_v26  ;;  %v3927_v31 = vsel %vm3380_vm4, %v11101_v37, 0.0 }
 0x4fa   : > { %3931 = vadd.xlane.f32.xlu1 %v3930_v9  ;;  %v3903_v59 = vsel %vm3380_vm4, %v11104_v17, 0.0 }
 0x4fb   : > { %v3763_v27 = vmul.f32 1.442695, %v3636_v54  ;;  %v11110_v25 = vpop.eup %8962 }
 0x4fc   : > { %12291 = vst [vmem:[#allocation28_spill] sm:$0xff] %v11110_v25  ;;  %v3936_v26 = vsel %vm3380_vm4, %v11110_v25, 0.0 }
 0x4fd   : > { %8972 = vpow2.f32 %v3763_v27  ;;  %3928 = vadd.xlane.f32.xlu0 %v3927_v31 }
 0x4fe   : > { %3904 = vadd.xlane.f32.xlu1 %v3903_v59  ;;  %8974 = vpow2.f32 %v3757_v16  ;;  %v11138_v59 = vpop.xlane.xlu0 %3568 }
 0x4ff   : > { %v11112_v24 = vpop.eup %8964 }
 0x500   : > { %12292 = vst [vmem:[#allocation27_spill] sm:$0xff] %v11112_v24  ;;  %v3942_v23 = vsel %vm3380_vm4, %v11112_v24, 0.0  ;;  %v11116_v63 = vpop.eup %8966 }
 0x501   : > { %12293 = vst [vmem:[#allocation29_spill] sm:$0xff] %v11116_v63  ;;  %3943 = vadd.xlane.f32.xlu0 %v3942_v23  ;;  %v11120_v34 = vpop.eup %8968  ;;  %v3939_v55 = vsel %vm3380_vm4, %v11116_v63, 0.0 }
 0x502   : > { %3937 = vadd.xlane.f32.xlu1 %v3936_v26  ;;  %v3933_v35 = vsel %vm3380_vm4, %v11120_v34, 0.0 }
 0x503   : > { %v11126_v9 = vpop.eup %8970 }
 0x504   : > { %12294 = vst [vmem:[#allocation30_spill] sm:$0xff] %v11126_v9  ;;  %v3948_v27 = vsel %vm3380_vm4, %v11126_v9, 0.0 }
 0x505   : > { %3940 = vadd.xlane.f32.xlu0 %v3939_v55 }
 0x506   : > { %3934 = vadd.xlane.f32.xlu1 %v3933_v35 }
 0x507   : > { %v11128_v41 = vpop.eup %8972 }
 0x508   : > { %12295 = vst [vmem:[#allocation31_spill] sm:$0xff] %v11128_v41  ;;  %v3954_v54 = vsel %vm3380_vm4, %v11128_v41, 0.0  ;;  %v11134_v16 = vpop.eup %8974 }
 0x509   : > { %3955 = vadd.xlane.f32.xlu0 %v3954_v54  ;;  %12296 = vst [vmem:[#allocation32_spill] sm:$0xff] %v11134_v16  ;;  %v3945_v31 = vsel %vm3380_vm4, %v11134_v16, 0.0  ;;  %v12297_v54 = vld [vmem:[#allocation9_spill] sm:$0xff] }
 0x50a   : > { %3949 = vadd.xlane.f32.xlu1 %v3948_v27 }
 0x50e   : > { %3946 = vadd.xlane.f32.xlu1 %v3945_v31  ;;  %v12298_v31 = vld [vmem:[#allocation11_spill] sm:$0xff] }
 0x519   : > { %v3794_v23 = vpop.xlane.xlu1 %3793 }
 0x51a   : > { %8976 = vrcp.f32 %v3794_v23  ;;  %v3791_v26 = vpop.xlane.xlu0 %3790 }
 0x51b   : > { %8978 = vrcp.f32 %v3791_v26  ;;  %v12299_v26 = vld [vmem:[#allocation14_spill] sm:$0xff] }
 0x51c   : > { %v8716_v16 = vunpack.i.h.bf16 %v12299_v26 }
 0x51d   : > { %v3818_v55 = vpop.xlane.xlu1 %3817 }
 0x51e   : > { %8980 = vrcp.f32 %v3818_v55  ;;  %v3815_v35 = vpop.xlane.xlu0 %3814  ;;  %v8715_v55 = vunpack.i.l.bf16 %v12299_v26 }
 0x51f   : > { %8788 = vrot.lane.b32.xlu1 %v12297_v54, %s9196_s1  ;;  %8783 = vrot.lane.b32.xlu0 %v12297_v54, %s9195_s9  ;;  %8982 = vrcp.f32 %v3815_v35 }
 0x520   : > { %v8404_v33 = vpack.c.bf16 %v8716_v16, %v8715_v55  ;;  %v12303_v55 = vld [vmem:[#allocation8_spill] sm:$0xff] }
 0x521   : > { %v3800_v27 = vpop.xlane.xlu1 %3799 }
 0x522   : > { %8984 = vrcp.f32 %v3800_v27  ;;  %v3797_v41 = vpop.xlane.xlu0 %3796  ;;  %v12300_v27 = vld [vmem:[#allocation15_spill] sm:$0xff] }
 0x523   : > { %8793 = vrot.lane.b32.xlu1 %v12298_v31, %s9195_s9  ;;  %8986 = vrcp.f32 %v3797_v41  ;;  %v8731_v50 = vunpack.i.h.bf16 %v12300_v27  ;;  %v8730_v37 = vunpack.i.l.bf16 %v12300_v27 }
 0x524   : > { %v8977_v23 = vpop.eup %8976 }
 0x525   : > { %v8979_v9 = vpop.eup %8978  ;;  %v3824_v24 = vpop.xlane.xlu1 %3823  ;;  %v4030_v25 = vmul.f32 %v8977_v23, %v10843_v58  ;;  %v12301_v23 = vld [vmem:[#allocation16_spill] sm:$0xff]  ;;  %v8408_v16 = vpack.c.bf16 %v8731_v50, %v8730_v37  ;;  %v12305_v50 = vld [vmem:[#allocation42_spill] sm:$0xff] }
 0x526   : > { %v4029_v63 = vmul.f32 %v8979_v9, %v10845_v47  ;;  %8988 = vrcp.f32 %v3824_v24  ;;  %v8741_v24 = vunpack.i.h.bf16 %v12301_v23  ;;  %v8740_v27 = vunpack.i.l.bf16 %v12301_v23  ;;  %v12307_v23 = vld [vmem:[#allocation20_spill] sm:$0xff] }
 0x528   : > { %v8981_v54 = vpop.eup %8980  ;;  %7836 = vmatprep.mubr.msk.f32.mxu1 %vm3380_vm4, %v4029_v63 }
 0x529   : > { %v8983_v35 = vpop.eup %8982  ;;  %v3821_v41 = vpop.xlane.xlu1 %3820  ;;  %7837 = vmatmul.mubr.msk.f32.vlgmr.msra.gmra.mrb[64].mxu1 %vm3380_vm4, %v4030_v25  ;;  %v4038_v58 = vmul.f32 %v8981_v54, %v10853_v53 }
 0x52a   : > { %8990 = vrcp.f32 %v3821_v41  ;;  %8403 = vmatpush3.bf16.msra.mxu1 %v11014_v28  ;;  %v3803_v26 = vpop.xlane.xlu0 %3802  ;;  %v4037_v47 = vmul.f32 %v8983_v35, %v10855_v12  ;;  %v12302_v28 = vld [vmem:[#allocation7_spill] sm:$0xff]  ;;  %v12304_v35 = vld [vmem:[#allocation17_spill] sm:$0xff] }
 0x52b   : > { %8405 = vmatprep.subr.bf16.mxu1 %v8404_v33  ;;  %8992 = vrcp.f32 %v3803_v26  ;;  %v8746_v41 = vunpack.i.h.bf16 %v12304_v35  ;;  %v8745_v26 = vunpack.i.l.bf16 %v12304_v35 }
 0x52c   : > { %v8985_v63 = vpop.eup %8984  ;;  %7864 = vmatprep.mubr.msk.f32.mxu0 %vm3380_vm4, %v4037_v47  ;;  %v8412_v47 = vpack.c.bf16 %v8741_v24, %v8740_v27 }
 0x52d   : > { %v8987_v9 = vpop.eup %8986  ;;  %v3806_v25 = vpop.xlane.xlu1 %3805  ;;  %7865 = vmatmul.mubr.msk.f32.vlgmr.msra.gmra.mrb[56].mxu0 %vm3380_vm4, %v4038_v58  ;;  %v4032_v54 = vmul.f32 %v8985_v63, %v10863_v7  ;;  %v12306_v7 = vld [vmem:[#allocation10_spill] sm:$0xff]  ;;  %v11173_v63 = vpack.c.bf16 %v8746_v41, %v8745_v26 }
 0x52e   : > { %8994 = vrcp.f32 %v3806_v25  ;;  %8407 = vmatpush3.bf16.msra.mxu1 %v8404_v33  ;;  %8419 = vmatpush3.bf16.msra.mxu0 %v12302_v28  ;;  %v3827_v12 = vpop.xlane.xlu0 %3826  ;;  %v4031_v53 = vmul.f32 %v8987_v9, %v10865_v4  ;;  %v3635_v33 = vsub.f32 %v12305_v50, %v11138_v59  ;;  %v8761_v25 = vunpack.i.h.bf16 %v12307_v23 }
 0x52f   : > { %8409 = vmatprep.subr.bf16.mxu1 %v8408_v16  ;;  %8421 = vmatprep.subr.bf16.mxu0 %v12303_v55  ;;  %8996 = vrcp.f32 %v3827_v12  ;;  %v8760_v59 = vunpack.i.l.bf16 %v12307_v23 }
 0x530   : > { %7839 = vmatprep.mubr.msk.f32.mxu1 %vm3380_vm4, %v4031_v53  ;;  %v8989_v4 = vpop.eup %8988  ;;  %v3761_v28 = vmul.f32 1.442695, %v3635_v33  ;;  %v12308_v53 = vld [vmem:[#allocation12_spill] sm:$0xff] }
 0x531   : > { %v3830_v37 = vpop.xlane.xlu1 %3829  ;;  %7840 = vmatmul.mubr.msk.f32.gmra.mrb[66].mxu1 %vm3380_vm4, %v4032_v54  ;;  %v11186_v41 = vpack.c.bf16 %v8761_v25, %v8760_v59 }
 0x532   : > { %8998 = vrcp.f32 %v3830_v37  ;;  %8411 = vmatpush3.bf16.msra.mxu1 %v8408_v16  ;;  %8423 = vmatpush3.bf16.msra.mxu0 %v12303_v55  ;;  %v4040_v55 = vmul.f32 %v8989_v4, %v10872_v42 }
 0x533   : > { %8413 = vmatprep.subr.bf16.mxu1 %v8412_v47  ;;  %8425 = vmatprep.subr.bf16.mxu0 %v12306_v7 }
 0x534   : > { %v8991_v58 = vpop.eup %8990 }
 0x535   : > { %v8993_v9 = vpop.eup %8992  ;;  %v3812_v12 = vpop.xlane.xlu1 %3811  ;;  %v4039_v24 = vmul.f32 %v8991_v58, %v10876_v3 }
 0x536   : > { %8415 = vmatpush3.bf16.msra.mxu1 %v8412_v47  ;;  %8427 = vmatpush3.bf16.msra.mxu0 %v12306_v7  ;;  %v3833_v27 = vpop.xlane.xlu0 %3832  ;;  %v4033_v16 = vmul.f32 %v8993_v9, %v10881_v52 }
 0x537   : > { %8429 = vmatprep.subr.bf16.mxu0 %v12308_v53  ;;  %8433 = vmatprep.subr.bf16.mxu1 %v11173_v63  ;;  %9000 = vrcp.f32 %v3833_v27 }
 0x538   : > { %v8995_v54 = vpop.eup %8994  ;;  %7867 = vmatprep.mubr.msk.f32.mxu0 %vm3380_vm4, %v4039_v24  ;;  %7842 = vmatprep.mubr.msk.f32.mxu1 %vm3380_vm4, %v4033_v16  ;;  %9002 = vpow2.f32 %v3761_v28 }
 0x539   : > { %v8997_v35 = vpop.eup %8996  ;;  %7868 = vmatmul.mubr.msk.f32.gmra.mrb[58].mxu0 %vm3380_vm4, %v4040_v55  ;;  %v3836_v3 = vpop.xlane.xlu1 %3835  ;;  %v4034_v52 = vmul.f32 %v8995_v54, %v10885_v15 }
 0x53a   : > { %9004 = vrcp.f32 %v3836_v3  ;;  %8431 = vmatpush3.bf16.msra.mxu0 %v12308_v53  ;;  %v3842_v26 = vpop.xlane.xlu0 %3841  ;;  %v4041_v42 = vmul.f32 %v8997_v35, %v10891_v46  ;;  %v12309_v35 = vld [vmem:[#allocation19_spill] sm:$0xff] }
 0x53b   : > { %8449 = vmatprep.subr.bf16.mxu0 %v11186_v41  ;;  %7843 = vmatmul.mubr.msk.f32.gmra.mrb[68].mxu1 %vm3380_vm4, %v4034_v52  ;;  %9006 = vrcp.f32 %v3812_v12  ;;  %v8751_v3 = vunpack.i.h.bf16 %v12309_v35  ;;  %v8750_v52 = vunpack.i.l.bf16 %v12309_v35 }
 0x53c   : > { %v8999_v50 = vpop.eup %8998  ;;  %7870 = vmatprep.mubr.msk.f32.mxu0 %vm3380_vm4, %v4041_v42  ;;  %v12310_v42 = vld [vmem:[#allocation22_spill] sm:$0xff] }
 0x53d   : > { %v3809_v33 = vpop.xlane.xlu1 %3808  ;;  %v4042_v37 = vmul.f32 %v8999_v50, %v10895_v48  ;;  %v8771_v50 = vunpack.i.h.bf16 %v12310_v42 }
 0x53e   : > { %9008 = vrcp.f32 %v3809_v33  ;;  %v3839_v47 = vpop.xlane.xlu0 %3838 }
 0x53f   : > { %9010 = vrcp.f32 %v3839_v47  ;;  %7871 = vmatmul.mubr.msk.f32.gmra.mrb[60].mxu0 %vm3380_vm4, %v4042_v37 }
 0x540   : > { %9012 = vrcp.f32 %v3842_v26 }
 0x541   : > { %v9001_v15 = vpop.eup %9000  ;;  %v3866_v4 = vpop.xlane.xlu1 %3865 }
 0x542   : > { %9014 = vrcp.f32 %v3866_v4  ;;  %v3863_v46 = vpop.xlane.xlu0 %3862  ;;  %v4043_v7 = vmul.f32 %v9001_v15, %v10906_v30  ;;  %v11197_v58 = vpop.eup %9002  ;;  %v12311_v15 = vld [vmem:[#allocation18_spill] sm:$0xff] }
 0x543   : > { %9016 = vrcp.f32 %v3863_v46  ;;  %v3951_v25 = vsel %vm3380_vm4, %v11197_v58, 0.0  ;;  %v8756_v4 = vunpack.i.h.bf16 %v12311_v15  ;;  %v8755_v46 = vunpack.i.l.bf16 %v12311_v15 }
 0x544   : > { %v9005_v9 = vpop.eup %9004  ;;  %7873 = vmatprep.mubr.msk.f32.mxu0 %vm3380_vm4, %v4043_v7  ;;  %v8436_v7 = vpack.c.bf16 %v8751_v3, %v8750_v52 }
 0x545   : > { %v3848_v23 = vpop.xlane.xlu1 %3847  ;;  %v4044_v48 = vmul.f32 %v9005_v9, %v10910_v19  ;;  %v9007_v59 = vpop.eup %9006 }
 0x546   : > { %v4036_v16 = vmul.f32 %v9007_v59, %v10903_v45 }
 0x547   : > { %3952 = vadd.xlane.f32.xlu1 %v3951_v25  ;;  %v3869_v28 = vpop.xlane.xlu0 %3868  ;;  %7874 = vmatmul.mubr.msk.f32.gmra.mrb[62].mxu0 %vm3380_vm4, %v4044_v48  ;;  %v12312_v48 = vld [vmem:[#allocation23_spill] sm:$0xff] }
 0x548   : > { %v9009_v12 = vpop.eup %9008  ;;  %9018 = vrcp.f32 %v3869_v28  ;;  %v8781_v25 = vunpack.i.h.bf16 %v12312_v48  ;;  %v8780_v59 = vunpack.i.l.bf16 %v12312_v48  ;;  %v8440_v28 = vpack.c.bf16 %v8756_v4, %v8755_v46 }
 0x549   : > { %v9011_v30 = vpop.eup %9010  ;;  %v3872_v24 = vpop.xlane.xlu1 %3871  ;;  %v4035_v27 = vmul.f32 %v9009_v12, %v10921_v18  ;;  %v8770_v18 = vunpack.i.l.bf16 %v12310_v42 }
 0x54a   : > { %9020 = vrcp.f32 %v3872_v24  ;;  %v4045_v53 = vmul.f32 %v9011_v30, %v10925_v1  ;;  %v9013_v19 = vpop.eup %9012  ;;  %v12313_v24 = vld [vmem:[#allocation21_spill] sm:$0xff] }
 0x54b   : > { %v3851_v55 = vpop.xlane.xlu0 %3850  ;;  %7845 = vmatprep.mubr.msk.f32.mxu1 %vm3380_vm4, %v4035_v27  ;;  %9022 = vrcp.f32 %v3848_v23  ;;  %v4046_v1 = vmul.f32 %v9013_v19, %v10917_v22  ;;  %v8766_v27 = vunpack.i.h.bf16 %v12313_v24 }
 0x54c   : > { %v9015_v54 = vpop.eup %9014  ;;  %7846 = vmatmul.mubr.msk.f32.gmra.mrb[70].mxu1 %vm3380_vm4, %v4036_v16  ;;  %v8765_v16 = vunpack.i.l.bf16 %v12313_v24 }
 0x54d   : > { %v9017_v26 = vpop.eup %9016  ;;  %v3845_v45 = vpop.xlane.xlu1 %3844  ;;  %7892 = vmatprep.mubr.msk.f32.mxu1 %vm3380_vm4, %v4045_v53  ;;  %v4054_v37 = vmul.f32 %v9015_v54, %v10931_v44  ;;  %v8444_v53 = vpack.c.bf16 %v8781_v25, %v8780_v59 }
 0x54e   : > { %9024 = vrcp.f32 %v3845_v45  ;;  %v4053_v33 = vmul.f32 %v9017_v26, %v10935_v5  ;;  %v8452_v5 = vpack.c.bf16 %v8771_v50, %v8770_v18  ;;  %v8464_v26 = vpack.c.bf16 %v8766_v27, %v8765_v16 }
 0x54f   : > { %9026 = vrcp.f32 %v3851_v55  ;;  %v3875_v47 = vpop.xlane.xlu0 %3874 }
 0x550   : > { %9028 = vrcp.f32 %v3875_v47  ;;  %7893 = vmatmul.mubr.msk.f32.vlgmr.msra.gmra.mrb[72].mxu1 %vm3380_vm4, %v4046_v1  ;;  %7920 = vmatprep.mubr.msk.f32.mxu0 %vm3380_vm4, %v4053_v33 }
 0x551   : > { %8435 = vmatpush3.bf16.msra.mxu1 %v11173_v63  ;;  %v3854_v22 = vpop.xlane.xlu1 %3853  ;;  %7921 = vmatmul.mubr.msk.f32.vlgmr.msra.gmra.mrb[64].mxu0 %vm3380_vm4, %v4054_v37 }
 0x552   : > { %v9019_v9 = vpop.eup %9018  ;;  %9030 = vrcp.f32 %v3854_v22  ;;  %8437 = vmatprep.subr.bf16.mxu1 %v8436_v7  ;;  %8451 = vmatpush3.bf16.msra.mxu0 %v11186_v41 }
 0x553   : > { %8453 = vmatprep.subr.bf16.mxu0 %v8452_v5  ;;  %v4055_v44 = vmul.f32 %v9019_v9, %v10949_v62 }
 0x554   : > { %v9021_v23 = vpop.eup %9020 }
 0x555   : > { %7923 = vmatprep.mubr.msk.f32.mxu0 %vm3380_vm4, %v4055_v44  ;;  %8439 = vmatpush3.bf16.msra.mxu1 %v8436_v7  ;;  %v3878_v63 = vpop.xlane.xlu1 %3877  ;;  %v4056_v12 = vmul.f32 %v9021_v23, %v10945_v32  ;;  %v9023_v30 = vpop.eup %9022  ;;  %v12314_v44 = vld [vmem:[#allocation24_spill] sm:$0xff] }
 0x556   : > { %9032 = vrcp.f32 %v3878_v63  ;;  %8441 = vmatprep.subr.bf16.mxu1 %v8440_v28  ;;  %8455 = vmatpush3.bf16.msra.mxu0 %v8452_v5  ;;  %v4048_v35 = vmul.f32 %v9023_v30, %v10941_v21  ;;  %v8776_v23 = vunpack.i.h.bf16 %v12314_v44  ;;  %v8775_v48 = vunpack.i.l.bf16 %v12314_v44 }
 0x557   : > { %v3857_v41 = vpop.xlane.xlu0 %3856  ;;  %7924 = vmatmul.mubr.msk.f32.gmra.mrb[66].mxu0 %vm3380_vm4, %v4056_v12 }
 0x558   : > { %v9025_v62 = vpop.eup %9024  ;;  %9034 = vrcp.f32 %v3857_v41  ;;  %8798 = vrot.lane.b32.xlu1 %v12298_v31, %s9196_s1  ;;  %v8468_v12 = vpack.c.bf16 %v8776_v23, %v8775_v48 }
 0x559   : > { %v9027_v19 = vpop.eup %9026  ;;  %8443 = vmatpush3.bf16.msra.mxu1 %v8440_v28  ;;  %v3860_v32 = vpop.xlane.xlu1 %3859  ;;  %v4047_v55 = vmul.f32 %v9025_v62, %v10955_v36 }
 0x55a   : > { %v9029_v54 = vpop.eup %9028  ;;  %9036 = vrcp.f32 %v3860_v32  ;;  %8445 = vmatprep.subr.bf16.mxu1 %v8444_v53  ;;  %v4049_v31 = vmul.f32 %v9027_v19, %v10959_v61 }
 0x55b   : > { %7895 = vmatprep.mubr.msk.f32.mxu1 %vm3380_vm4, %v4047_v55  ;;  %v4057_v3 = vmul.f32 %v9029_v54, %v10969_v11 }
 0x55c   : > { %v9031_v52 = vpop.eup %9030  ;;  %7896 = vmatmul.mubr.msk.f32.gmra.mrb[74].mxu1 %vm3380_vm4, %v4048_v35 }
 0x55d   : > { %7926 = vmatprep.mubr.msk.f32.mxu0 %vm3380_vm4, %v4057_v3  ;;  %8447 = vmatpush3.bf16.msra.mxu1 %v8444_v53  ;;  %v3884_v42 = vpop.xlane.xlu1 %3883  ;;  %v4050_v36 = vmul.f32 %v9031_v52, %v10965_v56 }
 0x55e   : > { %7898 = vmatprep.mubr.msk.f32.mxu1 %vm3380_vm4, %v4049_v31  ;;  %8465 = vmatprep.subr.bf16.mxu1 %v8464_v26  ;;  %9038 = vrcp.f32 %v3884_v42 }
 0x560   : > { %v9033_v21 = vpop.eup %9032  ;;  %7899 = vmatmul.mubr.msk.f32.gmra.mrb[76].mxu1 %vm3380_vm4, %v4050_v36 }
 0x561   : > { %v3881_v11 = vpop.xlane.xlu1 %3880  ;;  %v4058_v50 = vmul.f32 %v9033_v21, %v10978_v14 }
 0x562   : > { %v9035_v18 = vpop.eup %9034  ;;  %9040 = vrcp.f32 %v3881_v11 }
 0x563   : > { %7927 = vmatmul.mubr.msk.f32.gmra.mrb[68].mxu0 %vm3380_vm4, %v4058_v50  ;;  %v4051_v61 = vmul.f32 %v9035_v18, %v10990_v40 }
 0x564   : > { %v9037_v45 = vpop.eup %9036 }
 0x565   : > { %7901 = vmatprep.mubr.msk.f32.mxu1 %vm3380_vm4, %v4051_v61  ;;  %v4052_v56 = vmul.f32 %v9037_v45, %v10985_v6 }
 0x567   : > { %7902 = vmatmul.mubr.msk.f32.gmra.mrb[78].mxu1 %vm3380_vm4, %v4052_v56 }
 0x568   : > { %v9039_v33 = vpop.eup %9038 }
 0x569   : > { %v4060_v14 = vmul.f32 %v9039_v33, %v10998_v8 }
 0x56a   : > { %v3890_v1 = vpop.xlane.xlu1 %3889 }
 0x56c   : > { %v9041_v37 = vpop.eup %9040 }
 0x56d   : > { %v4059_v47 = vmul.f32 %v9041_v37, %v11003_v43 }
 0x56e   : > { %v11251_v15 = vpop.xlane.xlu0 %3913 }
 0x56f   : > { %v3911_v4 = vpop.xlane.xlu1 %3910  ;;  %7929 = vmatprep.mubr.msk.f32.mxu0 %vm3380_vm4, %v4059_v47 }
 0x570   : > { %9042 = vrcp.f32 %v3911_v4  ;;  %7930 = vmatmul.mubr.msk.f32.gmra.mrb[70].mxu0 %vm3380_vm4, %v4060_v14 }
 0x571   : > { %9044 = vrcp.f32 %v3890_v1 }
 0x572   : > { %v3887_v40 = vpop.xlane.xlu0 %3886 }
 0x573   : > { %9046 = vrcp.f32 %v3887_v40  ;;  %v3896_v6 = vpop.xlane.xlu1 %3895 }
 0x574   : > { %9048 = vrcp.f32 %v3896_v6 }
 0x576   : > { %v11256_v46 = vpop.xlane.xlu0 %3919 }
 0x577   : > { %v3917_v43 = vpop.xlane.xlu1 %3916 }
 0x57a   : > { %v9043_v7 = vpop.eup %9042  ;;  %v3893_v22 = vpop.xlane.xlu0 %3892 }
 0x57b   : > { %9050 = vrcp.f32 %v3893_v22  ;;  %v4069_v5 = vmul.f32 %v9043_v7, %v11038_v20  ;;  %v9045_v8 = vpop.eup %9044 }
 0x57c   : > { %v4062_v28 = vmul.f32 %v9045_v8, %v11031_v13 }
 0x57d   : > { %v9047_v9 = vpop.eup %9046  ;;  %7976 = vmatprep.mubr.msk.f32.mxu0 %vm3380_vm4, %v4069_v5 }
 0x57e   : > { %v3902_v25 = vpop.xlane.xlu0 %3901  ;;  %v4061_v59 = vmul.f32 %v9047_v9, %v11042_v39  ;;  %v9049_v41 = vpop.eup %9048 }
 0x57f   : > { %v3923_v63 = vpop.xlane.xlu1 %3922  ;;  %9052 = vrcp.f32 %v3902_v25  ;;  %v4064_v13 = vmul.f32 %v9049_v41, %v11049_v2 }
 0x580   : > { %7948 = vmatprep.mubr.msk.f32.mxu1 %vm3380_vm4, %v4061_v59 }
 0x581   : > { %7949 = vmatmul.mubr.msk.f32.vlgmr.msra.gmra.mrb[80].mxu1 %vm3380_vm4, %v4062_v28 }
 0x582   : > { %8467 = vmatpush3.bf16.msra.mxu1 %v8464_v26  ;;  %v3926_v20 = vpop.xlane.xlu0 %3925 }
 0x583   : > { %8469 = vmatprep.subr.bf16.mxu1 %v8468_v12  ;;  %v3908_v30 = vpop.xlane.xlu1 %3907 }
 0x585   : > { %v9051_v62 = vpop.eup %9050 }
 0x586   : > { %8471 = vmatpush3.bf16.msra.mxu1 %v8468_v12  ;;  %v3899_v24 = vpop.xlane.xlu0 %3898  ;;  %v4063_v27 = vmul.f32 %v9051_v62, %v11063_v49  ;;  %v12316_v12 = vld [vmem:[#allocation25_spill] sm:$0xff] }
 0x587   : > { %9054 = vrcp.f32 %v3899_v24  ;;  %v3932_v39 = vpop.xlane.xlu1 %3931 }
 0x588   : > { %7951 = vmatprep.mubr.msk.f32.mxu1 %vm3380_vm4, %v4063_v27  ;;  %9056 = vrcp.f32 %v3908_v30  ;;  %v12317_v30 = vld [vmem:[#allocation26_spill] sm:$0xff] }
 0x589   : > { %7952 = vmatmul.mubr.msk.f32.gmra.mrb[82].mxu1 %vm3380_vm4, %v4064_v13  ;;  %v9053_v55 = vpop.eup %9052 }
 0x58a   : > { %v3929_v16 = vpop.xlane.xlu0 %3928  ;;  %v4066_v2 = vmul.f32 %v9053_v55, %v11071_v60  ;;  %v12319_v55 = vld [vmem:[#allocation29_spill] sm:$0xff] }
 0x58b   : > { %v3905_v53 = vpop.xlane.xlu1 %3904 }
 0x58c   : > { %9058 = vrcp.f32 %v3905_v53 }
 0x58e   : > { %v11270_v19 = vpop.xlane.xlu0 %3943 }
 0x58f   : > { %v11272_v32 = vpop.xlane.xlu1 %3937 }
 0x591   : > { %v9055_v54 = vpop.eup %9054 }
 0x592   : > { %v11274_v35 = vpop.xlane.xlu0 %3940  ;;  %v4065_v49 = vmul.f32 %v9055_v54, %v11087_v0  ;;  %v9057_v52 = vpop.eup %9056 }
 0x593   : > { %v3935_v3 = vpop.xlane.xlu1 %3934  ;;  %v4068_v21 = vmul.f32 %v9057_v52, %v11085_v51 }
 0x594   : > { %9060 = vrcp.f32 %v3935_v3  ;;  %7954 = vmatprep.mubr.msk.f32.mxu1 %vm3380_vm4, %v4065_v49 }
 0x595   : > { %7955 = vmatmul.mubr.msk.f32.gmra.mrb[84].mxu1 %vm3380_vm4, %v4066_v2  ;;  %9062 = vrcp.f32 %v11251_v15  ;;  %v12321_v2 = vld [vmem:[#allocation32_spill] sm:$0xff] }
 0x596   : > { %v9059_v31 = vpop.eup %9058  ;;  %v11280_v26 = vpop.xlane.xlu0 %3955  ;;  %9064 = vrcp.f32 %v3917_v43 }
 0x597   : > { %v11282_v42 = vpop.xlane.xlu1 %3949  ;;  %v4067_v36 = vmul.f32 %v9059_v31, %v11104_v17  ;;  %9066 = vrcp.f32 %v11256_v46 }
 0x598   : > { %9068 = vrcp.f32 %v3923_v63 }
 0x599   : > { %v11286_v11 = vpop.f32.mrb[56].mxu1  ;;  %7957 = vmatprep.mubr.msk.f32.mxu1 %vm3380_vm4, %v4067_v36  ;;  %9070 = vrcp.f32 %v3926_v20 }
 0x59a   : > { %v11289_v60 = vpop.f32.mrb[57].mxu1  ;;  %7958 = vmatmul.mubr.msk.f32.gmra.mrb[86].mxu1 %vm3380_vm4, %v4068_v21  ;;  %v8784_v0 = vpop.permute.xlu0 %8783  ;;  %9072 = vrcp.f32 %v3929_v16  ;;  %v12318_v16 = vld [vmem:[#allocation28_spill] sm:$0xff] }
 0x59b   : > { %v8786_v50 = vunpack.i.h.bf16 %v8784_v0  ;;  %v8785_v18 = vunpack.i.l.bf16 %v8784_v0  ;;  %v3947_v61 = vpop.xlane.xlu1 %3946  ;;  %9074 = vrcp.f32 %v3932_v39  ;;  %v12323_v0 = vld [vmem:[#allocation31_spill] sm:$0xff] }
 0x59c   : > { %9076 = vrcp.f32 %v11272_v32 }
 0x59d   : > { %v8456_v45 = vpack.c.bf16 %v8786_v50, %v8785_v18  ;;  %9078 = vrcp.f32 %v11274_v35  ;;  %v12320_v35 = vld [vmem:[#allocation27_spill] sm:$0xff] }
 0x59e   : > { %v9061_v56 = vpop.eup %9060  ;;  %9080 = vrcp.f32 %v11270_v19 }
 0x59f   : > { %v8789_v17 = vpop.permute.xlu1 %8788  ;;  %8457 = vmatprep.subr.bf16.mxu0 %v8456_v45  ;;  %v4077_v51 = vmul.f32 %v9061_v56, %v11120_v34  ;;  %v9063_v6 = vpop.eup %9062  ;;  %9082 = vrcp.f32 %v3947_v61 }
 0x5a0   : > { %v8791_v1 = vunpack.i.h.bf16 %v8789_v17  ;;  %v8790_v33 = vunpack.i.l.bf16 %v8789_v17  ;;  %8459 = vmatpush3.bf16.msra.mxu0 %v8456_v45  ;;  %v9065_v7 = vpop.eup %9064  ;;  %v4070_v22 = vmul.f32 %v9063_v6, %v11036_v57  ;;  %9084 = vrcp.f32 %v11282_v42 }
 0x5a1   : > { %8004 = vmatprep.mubr.msk.f32.mxu1 %vm3380_vm4, %v4077_v51  ;;  %v9067_v5 = vpop.eup %9066  ;;  %v4071_v8 = vmul.f32 %v9065_v7, %v11058_v29  ;;  %v12315_v29 = vld [vmem:[#allocation13_spill] sm:$0xff] }
 0x5a2   : > { %v8472_v37 = vpack.c.bf16 %v8791_v1, %v8790_v33  ;;  %v9069_v9 = vpop.eup %9068  ;;  %v4072_v48 = vmul.f32 %v9067_v5, %v11056_v38  ;;  %v5361_v5 = vld [vmem:[%s9373_s28 + $0x10] sm:$0xff] }
 0x5a3   : > { %v8794_v47 = vpop.permute.xlu1 %8793  ;;  %v9071_v25 = vpop.eup %9070  ;;  %v4073_v59 = vmul.f32 %v9069_v9, %v11075_v10 }
 0x5a4   : > { %v8796_v14 = vunpack.i.h.bf16 %v8794_v47  ;;  %v8795_v4 = vunpack.i.l.bf16 %v8794_v47  ;;  %8473 = vmatprep.subr.bf16.mxu1 %v8472_v37  ;;  %v9073_v57 = vpop.eup %9072  ;;  %v4074_v28 = vmul.f32 %v9071_v25, %v12315_v29 }
 0x5a5   : > { %v11296_v15 = vpop.f32.mrb[58].mxu1  ;;  %8475 = vmatpush3.bf16.msra.mxu1 %v8472_v37  ;;  %v9075_v63 = vpop.eup %9074  ;;  %v4075_v20 = vmul.f32 %v9073_v57, %v12316_v12 }
 0x5a6   : > { %v8460_v40 = vpack.c.bf16 %v8796_v14, %v8795_v4  ;;  %v11298_v34 = vpop.f32.mrb[59].mxu1  ;;  %v4076_v41 = vmul.f32 %v9075_v63, %v12317_v30  ;;  %v9077_v39 = vpop.eup %9076  ;;  %v5359_v4 = vld [vmem:[%s9373_s28] sm:$0xff] }
 0x5a7   : > { %v9079_v13 = vpop.eup %9078  ;;  %v4078_v53 = vmul.f32 %v9077_v39, %v12318_v16 }
 0x5a8   : > { %8461 = vmatprep.subr.bf16.mxu0 %v8460_v40  ;;  %v9081_v32 = vpop.eup %9080  ;;  %v4079_v54 = vmul.f32 %v9079_v13, %v12319_v55 }
 0x5a9   : > { %v11300_v46 = vpop.f32.mrb[60].mxu1  ;;  %8463 = vmatpush3.bf16.msra.mxu0 %v8460_v40  ;;  %v9083_v19 = vpop.eup %9082  ;;  %v4080_v49 = vmul.f32 %v9081_v32, %v12320_v35  ;;  %v5360_v40 = vld [vmem:[%s9373_s28 + $0x8] sm:$0xff] }
 0x5aa   : > { %v11303_v43 = vpop.f32.mrb[61].mxu1  ;;  %v9085_v3 = vpop.eup %9084  ;;  %v4081_v52 = vmul.f32 %v9083_v19, %v12321_v2  ;;  %v8480_v6 = vpack.c.bf16 %v5360_v40, %v5359_v4 }
 0x5ac   : > { %7977 = vmatmul.mubr.msk.f32.vlgmr.msra.gmra.mrb[72].mxu0 %vm3380_vm4, %v4070_v22  ;;  %8481 = vmatprep.subr.bf16.mxu0 %v8480_v6 }
 0x5ad   : > { %v11307_v44 = vpop.f32.mrb[62].mxu1  ;;  %7979 = vmatprep.mubr.msk.f32.mxu0 %vm3380_vm4, %v4071_v8  ;;  %8483 = vmatpush3.bf16.msra.mxu0 %v8480_v6  ;;  %v5362_v8 = vld [vmem:[%s9373_s28 + $0x18] sm:$0xff]  ;;  %s9199_s28 = smov 24  }
 0x5ae   : > { %v11310_v23 = vpop.f32.mrb[63].mxu1  ;;  %v8484_v9 = vpack.c.bf16 %v5362_v8, %v5361_v5 }
 0x5b0   : > { %7980 = vmatmul.mubr.msk.f32.gmra.mrb[74].mxu0 %vm3380_vm4, %v4072_v48  ;;  %8485 = vmatprep.subr.bf16.mxu0 %v8484_v9 }
 0x5b1   : > { %7982 = vmatprep.mubr.msk.f32.mxu0 %vm3380_vm4, %v4073_v59  ;;  %8487 = vmatpush3.bf16.msra.mxu0 %v8484_v9 }
 0x5b4   : > { %7983 = vmatmul.mubr.msk.f32.gmra.mrb[76].mxu0 %vm3380_vm4, %v4074_v28 }
 0x5b5   : > { %7985 = vmatprep.mubr.msk.f32.mxu0 %vm3380_vm4, %v4075_v20 }
 0x5b8   : > { %7986 = vmatmul.mubr.msk.f32.gmra.mrb[78].mxu0 %vm3380_vm4, %v4076_v41 }
 0x5d4   : > { %v3953_v38 = vpop.xlane.xlu1 %3952 }
 0x5d5   : > { %9086 = vrcp.f32 %v3953_v38 }
 0x5d6   : > { %9088 = vrcp.f32 %v11280_v26  ;;  %v12322_v26 = vld [vmem:[#allocation30_spill] sm:$0xff] }
 0x5d7   : > { %v4082_v42 = vmul.f32 %v9085_v3, %v12322_v26 }
 0x5d8   : > { %v8799_v10 = vpop.permute.xlu1 %8798 }
 0x5d9   : > { %v8801_v62 = vunpack.i.h.bf16 %v8799_v10  ;;  %v8800_v24 = vunpack.i.l.bf16 %v8799_v10 }
 0x5db   : > { %v8476_v27 = vpack.c.bf16 %v8801_v62, %v8800_v24 }
 0x5dd   : > { %8477 = vmatprep.subr.bf16.mxu1 %v8476_v27 }
 0x5de   : > { %8479 = vmatpush3.bf16.msra.mxu1 %v8476_v27 }
 0x5df   : > { %v9087_v31 = vpop.eup %9086 }
 0x5e0   : > { %v9089_v36 = vpop.eup %9088  ;;  %v4083_v21 = vmul.f32 %v9087_v31, %v11197_v58 }
 0x5e1   : > { %8005 = vmatmul.mubr.msk.f32.vlgmr.msra.gmra.mrb[88].mxu1 %vm3380_vm4, %v4078_v53  ;;  %v4084_v50 = vmul.f32 %v9089_v36, %v12323_v0 }
 0x5e2   : > { %8007 = vmatprep.mubr.msk.f32.mxu1 %vm3380_vm4, %v4079_v54 }
 0x5e5   : > { %8008 = vmatmul.mubr.msk.f32.gmra.mrb[90].mxu1 %vm3380_vm4, %v4080_v49 }
 0x5e6   : > { %8010 = vmatprep.mubr.msk.f32.mxu1 %vm3380_vm4, %v4081_v52 }
 0x5e9   : > { %8011 = vmatmul.mubr.msk.f32.gmra.mrb[92].mxu1 %vm3380_vm4, %v4082_v42 }
 0x5ea   : > { %8013 = vmatprep.mubr.msk.f32.mxu1 %vm3380_vm4, %v4083_v21 }
 0x5ed   : > { %8014 = vmatmul.mubr.msk.f32.gmra.mrb[94].mxu1 %vm3380_vm4, %v4084_v50 }
 0x5fc   : > { %v7838_v18 = vpop.f32.mrb[64].mxu1 }
 0x5fd   : > { %5127 = vrot.lane.b32.xlu1 %v7838_v18, %s9197_s30  ;;  %v4304_v61 = vpop.f32.mrb[65].mxu1 }
 0x600   : > { %v7866_v45 = vpop.f32.mrb[56].mxu0 }
 0x601   : > { %5125 = vrot.lane.b32.xlu1 %v4304_v61, %s9197_s30  ;;  %5159 = vrot.lane.b32.xlu0 %v7866_v45, %s9198_s2  ;;  %v4433_v58 = vpop.f32.mrb[57].mxu0 }
 0x604   : > { %v7841_v56 = vpop.f32.mrb[66].mxu1 }
 0x605   : > { %5157 = vrot.lane.b32.xlu1 %v4433_v58, %s9198_s2  ;;  %5131 = vrot.lane.b32.xlu0 %v7841_v56, %s9197_s30  ;;  %v4314_v17 = vpop.f32.mrb[67].mxu1 }
 0x609   : > { %5129 = vrot.lane.b32.xlu1 %v4314_v17, %s9197_s30 }
 0x60c   : > { %v7869_v51 = vpop.f32.mrb[58].mxu0 }
 0x60d   : > { %v4443_v1 = vpop.f32.mrb[59].mxu0  ;;  %5163 = vrot.lane.b32.xlu0 %v7869_v51, %s9198_s2 }
 0x60e   : > { %5161 = vrot.lane.b32.xlu1 %v4443_v1, %s9198_s2  ;;  %v7844_v33 = vpop.f32.mrb[68].mxu1 }
 0x60f   : > { %v4324_v37 = vpop.f32.mrb[69].mxu1 }
 0x611   : > { %5135 = vrot.lane.b32.xlu0 %v7844_v33, %s9197_s30 }
 0x612   : > { %5133 = vrot.lane.b32.xlu1 %v4324_v37, %s9197_s30  ;;  %v7872_v47 = vpop.f32.mrb[60].mxu0 }
 0x613   : > { %v4453_v14 = vpop.f32.mrb[61].mxu0 }
 0x615   : > { %5167 = vrot.lane.b32.xlu0 %v7872_v47, %s9198_s2 }
 0x616   : > { %5165 = vrot.lane.b32.xlu1 %v4453_v14, %s9198_s2 }
 0x61a   : > { %v7875_v7 = vpop.f32.mrb[62].mxu0 }
 0x61b   : > { %v4463_v22 = vpop.f32.mrb[63].mxu0 }
 0x61f   : > { %v7847_v48 = vpop.f32.mrb[70].mxu1 }
 0x620   : > { %v4334_v25 = vpop.f32.mrb[71].mxu1  ;;  %5139 = vrot.lane.b32.xlu0 %v7847_v48, %s9197_s30 }
 0x621   : > { %5137 = vrot.lane.b32.xlu1 %v4334_v25, %s9197_s30 }
 0x623   : > { %v7894_v59 = vpop.f32.mrb[72].mxu1 }
 0x624   : > { %5171 = vrot.lane.b32.xlu0 %v7875_v7, %s9198_s2  ;;  %v4562_v57 = vpop.f32.mrb[73].mxu1  ;;  %v11360_v29 = vpop.f32.mrb[64].mxu0 }
 0x625   : > { %5169 = vrot.lane.b32.xlu1 %v4463_v22, %s9198_s2  ;;  %v11363_v28 = vpop.f32.mrb[65].mxu0 }
 0x628   : > { %5191 = vrot.lane.b32.xlu0 %v7894_v59, %s9199_s28 }
 0x629   : > { %5189 = vrot.lane.b32.xlu1 %v4562_v57, %s9199_s28 }
 0x62a   : > { %v11367_v63 = vpop.f32.mrb[66].mxu0 }
 0x62b   : > { %v11369_v12 = vpop.f32.mrb[67].mxu0 }
 0x62f   : > { %v7897_v20 = vpop.f32.mrb[74].mxu1 }
 0x630   : > { %5195 = vrot.lane.b32.xlu0 %v7897_v20, %s9199_s28  ;;  %v4572_v30 = vpop.f32.mrb[75].mxu1 }
 0x631   : > { %5193 = vrot.lane.b32.xlu1 %v4572_v30, %s9199_s28 }
 0x633   : > { %v7900_v41 = vpop.f32.mrb[76].mxu1 }
 0x634   : > { %5199 = vrot.lane.b32.xlu0 %v7900_v41, %s9199_s28  ;;  %v4582_v38 = vpop.f32.mrb[77].mxu1 }
 0x635   : > { %5197 = vrot.lane.b32.xlu1 %v4582_v38, %s9199_s28 }
 0x636   : > { %v11375_v10 = vpop.f32.mrb[68].mxu0 }
 0x637   : > { %v11377_v62 = vpop.f32.mrb[69].mxu0 }
 0x63a   : > { %v7903_v24 = vpop.f32.mrb[78].mxu1 }
 0x63b   : > { %5203 = vrot.lane.b32.xlu0 %v7903_v24, %s9199_s28  ;;  %v4592_v27 = vpop.f32.mrb[79].mxu1 }
 0x63c   : > { %5201 = vrot.lane.b32.xlu1 %v4592_v27, %s9199_s28 }
 0x643   : > { %v11381_v39 = vpop.f32.mrb[70].mxu0 }
 0x644   : > { %v11383_v13 = vpop.f32.mrb[71].mxu0 }
 0x654   : > { %v7950_v16 = vpop.f32.mrb[80].mxu1 }
 0x655   : > { %5249 = vrot.lane.b32.xlu0 %v7950_v16, %s9197_s30  ;;  %v4820_v53 = vpop.f32.mrb[81].mxu1 }
 0x656   : > { %5247 = vrot.lane.b32.xlu1 %v4820_v53, %s9197_s30 }
 0x65c   : > { %v7953_v32 = vpop.f32.mrb[82].mxu1 }
 0x65d   : > { %v4830_v55 = vpop.f32.mrb[83].mxu1 }
 0x668   : > { %v7956_v54 = vpop.f32.mrb[84].mxu1 }
 0x669   : > { %v4840_v19 = vpop.f32.mrb[85].mxu1 }
 0x66d   : > { %v7959_v35 = vpop.f32.mrb[86].mxu1 }
 0x66e   : > { %v4850_v49 = vpop.f32.mrb[87].mxu1 }
 0x66f   : > { %v5128_v3 = vpop.permute.xlu1 %5127 }
 0x670   : > { %v5214_v22 = vsel %vm2219_vm2, %v11286_v11, %v5128_v3 }
 0x673   : > { %v5126_v2 = vpop.permute.xlu1 %5125  ;;  %v5160_v31 = vpop.permute.xlu0 %5159 }
 0x674   : > { %v5213_v6 = vsel %vm2219_vm2, %v11289_v60, %v5126_v2  ;;  %v5223_v9 = vsel %vm5221_vm5, %v5214_v22, %v5160_v31 }
 0x677   : > { %v5158_v52 = vpop.permute.xlu1 %5157  ;;  %v5132_v42 = vpop.permute.xlu0 %5131 }
 0x678   : > { %v5222_v5 = vsel %vm5221_vm5, %v5213_v6, %v5158_v52  ;;  %v5216_v11 = vsel %vm2219_vm2, %v11296_v15, %v5132_v42 }
 0x67b   : > { %v5130_v26 = vpop.permute.xlu1 %5129 }
 0x67c   : > { %v5215_v60 = vsel %vm2219_vm2, %v11298_v34, %v5130_v26 }
 0x67f   : > { %v7978_v36 = vpop.f32.mrb[72].mxu0  ;;  %v5164_v0 = vpop.permute.xlu0 %5163 }
 0x680   : > { %5281 = vrot.lane.b32.xlu0 %v7978_v36, %s9198_s2  ;;  %v4949_v21 = vpop.f32.mrb[73].mxu0  ;;  %v5162_v50 = vpop.permute.xlu1 %5161  ;;  %v5225_v30 = vsel %vm5221_vm5, %v5216_v11, %v5164_v0 }
 0x681   : > { %5279 = vrot.lane.b32.xlu1 %v4949_v21, %s9198_s2  ;;  %v5224_v57 = vsel %vm5221_vm5, %v5215_v60, %v5162_v50 }
 0x683   : > { %v7981_v18 = vpop.f32.mrb[74].mxu0  ;;  %v5136_v58 = vpop.permute.xlu0 %5135 }
 0x684   : > { %5253 = vrot.lane.b32.xlu0 %v7953_v32, %s9197_s30  ;;  %v4959_v61 = vpop.f32.mrb[75].mxu0  ;;  %v5134_v17 = vpop.permute.xlu1 %5133  ;;  %v5218_v15 = vsel %vm2219_vm2, %v11300_v46, %v5136_v58 }
 0x685   : > { %5251 = vrot.lane.b32.xlu1 %v4830_v55, %s9197_s30  ;;  %v5217_v24 = vsel %vm2219_vm2, %v11303_v43, %v5134_v17 }
 0x687   : > { %v7984_v45 = vpop.f32.mrb[76].mxu0  ;;  %v5168_v33 = vpop.permute.xlu0 %5167 }
 0x688   : > { %5285 = vrot.lane.b32.xlu0 %v7981_v18, %s9198_s2  ;;  %v4969_v56 = vpop.f32.mrb[77].mxu0  ;;  %v5166_v37 = vpop.permute.xlu1 %5165  ;;  %v5227_v53 = vsel %vm5221_vm5, %v5218_v15, %v5168_v33 }
 0x689   : > { %5283 = vrot.lane.b32.xlu1 %v4959_v61, %s9198_s2  ;;  %v5226_v34 = vsel %vm5221_vm5, %v5217_v24, %v5166_v37 }
 0x68b   : > { %v7987_v51 = vpop.f32.mrb[78].mxu0 }
 0x68c   : > { %5257 = vrot.lane.b32.xlu0 %v7956_v54, %s9197_s30  ;;  %v4979_v1 = vpop.f32.mrb[79].mxu0 }
 0x68d   : > { %5255 = vrot.lane.b32.xlu1 %v4840_v19, %s9197_s30 }
 0x690   : > { %5289 = vrot.lane.b32.xlu0 %v7984_v45, %s9198_s2 }
 0x691   : > { %5287 = vrot.lane.b32.xlu1 %v4969_v56, %s9198_s2 }
 0x692   : > { %v5140_v47 = vpop.permute.xlu0 %5139 }
 0x693   : > { %v5138_v14 = vpop.permute.xlu1 %5137  ;;  %v5220_v46 = vsel %vm2219_vm2, %v11307_v44, %v5140_v47 }
 0x694   : > { %5261 = vrot.lane.b32.xlu0 %v7959_v35, %s9197_s30  ;;  %v5219_v43 = vsel %vm2219_vm2, %v11310_v23, %v5138_v14 }
 0x695   : > { %5259 = vrot.lane.b32.xlu1 %v4850_v49, %s9197_s30 }
 0x696   : > { %v5172_v4 = vpop.permute.xlu0 %5171 }
 0x697   : > { %v5170_v40 = vpop.permute.xlu1 %5169  ;;  %v5229_v49 = vsel %vm5221_vm5, %v5220_v46, %v5172_v4 }
 0x698   : > { %5293 = vrot.lane.b32.xlu0 %v7987_v51, %s9198_s2  ;;  %v5228_v19 = vsel %vm5221_vm5, %v5219_v43, %v5170_v40 }
 0x699   : > { %5291 = vrot.lane.b32.xlu1 %v4979_v1, %s9198_s2  ;;  %s12329_s2 = sld [smem:[#allocation53_spill]] (!%p7071_p6) }
 0x69a   : > { %v5192_v7 = vpop.permute.xlu0 %5191 }
 0x69b   : > { %v5190_v8 = vpop.permute.xlu1 %5189  ;;  %v5232_v25 = vsel %vm5230_vm6, %v5223_v9, %v5192_v7 }
 0x69c   : > { %v5231_v48 = vsel %vm5230_vm6, %v5222_v5, %v5190_v8 }
 0x69d   : > { %8024 = vmatprep.mubr.msk.f32.mxu0 %vm1065_vm1, %v5231_v48 }
 0x69e   : > { %8025 = vmatmul.mubr.msk.f32.vlgmr.msra.gmra.mrb[80].mxu0 %vm1065_vm1, %v5232_v25 }
 0x6a2   : > { %v5196_v59 = vpop.permute.xlu0 %5195 }
 0x6a3   : > { %v5194_v20 = vpop.permute.xlu1 %5193  ;;  %v5234_v38 = vsel %vm5230_vm6, %v5225_v30, %v5196_v59 }
 0x6a4   : > { %v5233_v41 = vsel %vm5230_vm6, %v5224_v57, %v5194_v20 }
 0x6a5   : > { %8027 = vmatprep.mubr.msk.f32.mxu0 %vm1065_vm1, %v5233_v41 }
 0x6a6   : > { %v5200_v27 = vpop.permute.xlu0 %5199  ;;  %8028 = vmatmul.mubr.msk.f32.gmra.mrb[82].mxu0 %vm1065_vm1, %v5234_v38 }
 0x6a7   : > { %v5198_v16 = vpop.permute.xlu1 %5197  ;;  %v5236_v55 = vsel %vm5230_vm6, %v5227_v53, %v5200_v27 }
 0x6a8   : > { %v5235_v32 = vsel %vm5230_vm6, %v5226_v34, %v5198_v16 }
 0x6a9   : > { %8030 = vmatprep.mubr.msk.f32.mxu0 %vm1065_vm1, %v5235_v32 }
 0x6aa   : > { %8031 = vmatmul.mubr.msk.f32.gmra.mrb[84].mxu0 %vm1065_vm1, %v5236_v55 }
 0x6ad   : > { %v5204_v54 = vpop.permute.xlu0 %5203 }
 0x6ae   : > { %v5202_v35 = vpop.permute.xlu1 %5201  ;;  %v5238_v2 = vsel %vm5230_vm6, %v5229_v49, %v5204_v54  ;;  %v9122_v49 = vld [vmem:[#allocation2 + $0x8] sm:$0xff] }
 0x6af   : > { %v5237_v3 = vsel %vm5230_vm6, %v5228_v19, %v5202_v35 }
 0x6b0   : > { %8033 = vmatprep.mubr.msk.f32.mxu0 %vm1065_vm1, %v5237_v3 }
 0x6b1   : > { %8034 = vmatmul.mubr.msk.f32.gmra.mrb[86].mxu0 %vm1065_vm1, %v5238_v2  ;;  %v9123_v2 = vld [vmem:[#allocation2] sm:$0xff] }
 0x6b4   : > { %v8006_v52 = vpop.f32.mrb[88].mxu1 }
 0x6b5   : > { %v5078_v31 = vpop.f32.mrb[89].mxu1  ;;  %5313 = vrot.lane.b32.xlu0 %v8006_v52, %s9199_s28 }
 0x6b6   : > { %5311 = vrot.lane.b32.xlu1 %v5078_v31, %s9199_s28 }
 0x6b8   : > { %v8009_v44 = vpop.f32.mrb[90].mxu1 }
 0x6b9   : > { %v5088_v23 = vpop.f32.mrb[91].mxu1  ;;  %5317 = vrot.lane.b32.xlu0 %v8009_v44, %s9199_s28 }
 0x6ba   : > { %5315 = vrot.lane.b32.xlu1 %v5088_v23, %s9199_s28 }
 0x6bc   : > { %v8012_v26 = vpop.f32.mrb[92].mxu1 }
 0x6bd   : > { %v5098_v42 = vpop.f32.mrb[93].mxu1  ;;  %5321 = vrot.lane.b32.xlu0 %v8012_v26, %s9199_s28 }
 0x6be   : > { %5319 = vrot.lane.b32.xlu1 %v5098_v42, %s9199_s28 }
 0x6c0   : > { %v8015_v36 = vpop.f32.mrb[94].mxu1 }
 0x6c1   : > { %v5108_v21 = vpop.f32.mrb[95].mxu1  ;;  %5325 = vrot.lane.b32.xlu0 %v8015_v36, %s9199_s28 }
 0x6c2   : > { %5323 = vrot.lane.b32.xlu1 %v5108_v21, %s9199_s28  ;;  %v9124_v21 = vld [vmem:[#allocation2 + $0x18] sm:$0xff] }
 0x6c7   : > { %v5250_v0 = vpop.permute.xlu0 %5249 }
 0x6c8   : > { %v5248_v50 = vpop.permute.xlu1 %5247  ;;  %v5336_v22 = vsel %vm2219_vm2, %v11360_v29, %v5250_v0 }
 0x6c9   : > { %v5335_v6 = vsel %vm2219_vm2, %v11363_v28, %v5248_v50  ;;  %v9125_v50 = vld [vmem:[#allocation2 + $0x10] sm:$0xff] }
 0x6f2   : > { %v5282_v18 = vpop.permute.xlu0 %5281 }
 0x6f3   : > { %v5280_v61 = vpop.permute.xlu1 %5279  ;;  %v5344_v9 = vsel %vm5221_vm5, %v5336_v22, %v5282_v18 }
 0x6f4   : > { %v5343_v5 = vsel %vm5221_vm5, %v5335_v6, %v5280_v61 }
 0x6f6   : > { %v5254_v45 = vpop.permute.xlu0 %5253 }
 0x6f7   : > { %v5252_v58 = vpop.permute.xlu1 %5251  ;;  %v5338_v29 = vsel %vm2219_vm2, %v11367_v63, %v5254_v45 }
 0x6f8   : > { %v5337_v60 = vsel %vm2219_vm2, %v11369_v12, %v5252_v58 }
 0x6fa   : > { %v5286_v56 = vpop.permute.xlu0 %5285 }
 0x6fb   : > { %v5284_v17 = vpop.permute.xlu1 %5283  ;;  %v5346_v57 = vsel %vm5221_vm5, %v5338_v29, %v5286_v56 }
 0x6fc   : > { %v5345_v28 = vsel %vm5221_vm5, %v5337_v60, %v5284_v17 }
 0x6fe   : > { %v5258_v51 = vpop.permute.xlu0 %5257 }
 0x6ff   : > { %v5256_v1 = vpop.permute.xlu1 %5255  ;;  %v5340_v63 = vsel %vm2219_vm2, %v11375_v10, %v5258_v51 }
 0x700   : > { %v5339_v12 = vsel %vm2219_vm2, %v11377_v62, %v5256_v1  ;;  %v9126_v1 = vld [vmem:[#allocation2 + $0x28] sm:$0xff] }
 0x702   : > { %v5290_v33 = vpop.permute.xlu0 %5289 }
 0x703   : > { %v5288_v37 = vpop.permute.xlu1 %5287  ;;  %v5348_v27 = vsel %vm5221_vm5, %v5340_v63, %v5290_v33 }
 0x704   : > { %v5347_v38 = vsel %vm5221_vm5, %v5339_v12, %v5288_v37  ;;  %v9127_v37 = vld [vmem:[#allocation2 + $0x20] sm:$0xff] }
 0x706   : > { %v5262_v47 = vpop.permute.xlu0 %5261 }
 0x707   : > { %v5260_v14 = vpop.permute.xlu1 %5259  ;;  %v5342_v10 = vsel %vm2219_vm2, %v11381_v39, %v5262_v47 }
 0x708   : > { %v5341_v62 = vsel %vm2219_vm2, %v11383_v13, %v5260_v14  ;;  %v11494_v13 = vld [vmem:[%s12324_s26] ss:$0 sm:$0xff] }
 0x70a   : > { %v5294_v4 = vpop.permute.xlu0 %5293 }
 0x70b   : > { %v5292_v40 = vpop.permute.xlu1 %5291  ;;  %v5350_v55 = vsel %vm5221_vm5, %v5342_v10, %v5294_v4 }
 0x70c   : > { %v5349_v53 = vsel %vm5221_vm5, %v5341_v62, %v5292_v40  ;;  %v9132_v62 = vld [vmem:[#allocation2 + $0x58] sm:$0xff] }
 0x727   : > { %v5314_v7 = vpop.permute.xlu0 %5313 }
 0x728   : > { %v5312_v8 = vpop.permute.xlu1 %5311  ;;  %v5352_v25 = vsel %vm5230_vm6, %v5344_v9, %v5314_v7  ;;  %v9129_v9 = vld [vmem:[#allocation2 + $0x30] sm:$0xff] }
 0x729   : > { %v5351_v48 = vsel %vm5230_vm6, %v5343_v5, %v5312_v8  ;;  %v9128_v5 = vld [vmem:[#allocation2 + $0x38] sm:$0xff] }
 0x72a   : > { %8036 = vmatprep.mubr.msk.f32.mxu0 %vm1065_vm1, %v5351_v48 }
 0x72b   : > { %v5318_v59 = vpop.permute.xlu0 %5317  ;;  %8037 = vmatmul.mubr.msk.f32.gmra.mrb[88].mxu0 %vm1065_vm1, %v5352_v25 }
 0x72c   : > { %v5316_v11 = vpop.permute.xlu1 %5315  ;;  %v5354_v30 = vsel %vm5230_vm6, %v5346_v57, %v5318_v59  ;;  %v9130_v57 = vld [vmem:[#allocation2 + $0x48] sm:$0xff] }
 0x72d   : > { %v5353_v20 = vsel %vm5230_vm6, %v5345_v28, %v5316_v11 }
 0x72e   : > { %8039 = vmatprep.mubr.msk.f32.mxu0 %vm1065_vm1, %v5353_v20 }
 0x72f   : > { %v5322_v41 = vpop.permute.xlu0 %5321  ;;  %8040 = vmatmul.mubr.msk.f32.gmra.mrb[90].mxu0 %vm1065_vm1, %v5354_v30  ;;  %v9131_v30 = vld [vmem:[#allocation2 + $0x40] sm:$0xff] }
 0x730   : > { %v5320_v24 = vpop.permute.xlu1 %5319  ;;  %v5356_v34 = vsel %vm5230_vm6, %v5348_v27, %v5322_v41 }
 0x731   : > { %v5355_v15 = vsel %vm5230_vm6, %v5347_v38, %v5320_v24 }
 0x732   : > { %8042 = vmatprep.mubr.msk.f32.mxu0 %vm1065_vm1, %v5355_v15 }
 0x733   : > { %v5326_v16 = vpop.permute.xlu0 %5325  ;;  %8043 = vmatmul.mubr.msk.f32.gmra.mrb[92].mxu0 %vm1065_vm1, %v5356_v34 }
 0x734   : > { %v5324_v32 = vpop.permute.xlu1 %5323  ;;  %v5358_v54 = vsel %vm5230_vm6, %v5350_v55, %v5326_v16 }
 0x735   : > { %v5357_v43 = vsel %vm5230_vm6, %v5349_v53, %v5324_v32  ;;  %v9133_v53 = vld [vmem:[#allocation2 + $0x50] sm:$0xff] }
 0x736   : > { %8045 = vmatprep.mubr.msk.f32.mxu0 %vm1065_vm1, %v5357_v43 }
 0x737   : > { %8046 = vmatmul.mubr.msk.f32.gmra.mrb[94].mxu0 %vm1065_vm1, %v5358_v54 }
 0x771   : > { %v8026_v39 = vpop.f32.mrb[80].mxu0 }
 0x772   : > { %v5490_v46 = vadd.f32 %v8026_v39, %v11494_v13  ;;  %v5484_v19 = vpop.f32.mrb[81].mxu0 }
 0x773   : > { %v5485_v35 = vadd.f32 %v11494_v13, %v5484_v19 }
 0x774   : > { %v11498_v3 = vadd.f32 %v9122_v49, %v5490_v46 }
 0x775   : > { %v11500_v52 = vadd.f32 %v9123_v2, %v5485_v35  ;;  %v9134_v2 = vld [vmem:[#allocation2 + $0x68] sm:$0xff] }
 0x776   : > { %v5584_v31 = vsel %vm1065_vm1, %v11498_v3, 0.0 }
 0x777   : > { %5585 = vadd.xlane.f32.xlu0 %v5584_v31  ;;  %v5581_v44 = vsel %vm1065_vm1, %v11500_v52, 0.0 }
 0x778   : > { %5582 = vadd.xlane.f32.xlu1 %v5581_v44  ;;  %v9135_v44 = vld [vmem:[#allocation2 + $0x60] sm:$0xff] }
 0x779   : > { %v8029_v23 = vpop.f32.mrb[82].mxu0 }
 0x77a   : > { %v5500_v26 = vadd.f32 %v8029_v23, %v11494_v13  ;;  %v5494_v42 = vpop.f32.mrb[83].mxu0 }
 0x77b   : > { %v5495_v36 = vadd.f32 %v11494_v13, %v5494_v42 }
 0x77c   : > { %v11508_v0 = vadd.f32 %v9124_v21, %v5500_v26 }
 0x77d   : > { %v11510_v18 = vadd.f32 %v9125_v50, %v5495_v36  ;;  %v8032_v61 = vpop.f32.mrb[84].mxu0 }
 0x77e   : > { %v5510_v45 = vadd.f32 %v8032_v61, %v11494_v13  ;;  %v5504_v58 = vpop.f32.mrb[85].mxu0  ;;  %v5590_v56 = vsel %vm1065_vm1, %v11508_v0, 0.0 }
 0x77f   : > { %v5505_v17 = vadd.f32 %v11494_v13, %v5504_v58  ;;  %5591 = vadd.xlane.f32.xlu1 %v5590_v56  ;;  %v5587_v51 = vsel %vm1065_vm1, %v11510_v18, 0.0 }
 0x780   : > { %v11518_v33 = vadd.f32 %v9126_v1, %v5510_v45  ;;  %5588 = vadd.xlane.f32.xlu0 %v5587_v51 }
 0x781   : > { %v11520_v47 = vadd.f32 %v9127_v37, %v5505_v17  ;;  %v9136_v17 = vld [vmem:[#allocation2 + $0x78] sm:$0xff] }
 0x782   : > { %v5596_v14 = vsel %vm1065_vm1, %v11518_v33, 0.0 }
 0x783   : > { %5597 = vadd.xlane.f32.xlu1 %v5596_v14  ;;  %v5593_v4 = vsel %vm1065_vm1, %v11520_v47, 0.0  ;;  %v9137_v14 = vld [vmem:[#allocation2 + $0x70] sm:$0xff] }
 0x784   : > { %v8035_v40 = vpop.f32.mrb[86].mxu0  ;;  %5594 = vadd.xlane.f32.xlu0 %v5593_v4 }
 0x785   : > { %v5520_v6 = vadd.f32 %v8035_v40, %v11494_v13  ;;  %v5514_v7 = vpop.f32.mrb[87].mxu0 }
 0x786   : > { %v5515_v22 = vadd.f32 %v11494_v13, %v5514_v7 }
 0x787   : > { %v11528_v8 = vadd.f32 %v9128_v5, %v5520_v6 }
 0x788   : > { %v11530_v48 = vadd.f32 %v9129_v9, %v5515_v22 }
 0x789   : > { %v5602_v25 = vsel %vm1065_vm1, %v11528_v8, 0.0 }
 0x78a   : > { %5603 = vadd.xlane.f32.xlu1 %v5602_v25  ;;  %v5599_v60 = vsel %vm1065_vm1, %v11530_v48, 0.0 }
 0x78b   : > { %5600 = vadd.xlane.f32.xlu0 %v5599_v60 }
 0x7fe   : > { %v8038_v59 = vpop.f32.mrb[88].mxu0 }
 0x7ff   : > { %v5530_v29 = vadd.f32 %v8038_v59, %v11494_v13  ;;  %v5524_v28 = vpop.f32.mrb[89].mxu0 }
 0x800   : > { %v5525_v11 = vadd.f32 %v11494_v13, %v5524_v28 }
 0x801   : > { %v11538_v20 = vadd.f32 %v9130_v57, %v5530_v29 }
 0x802   : > { %v11540_v12 = vadd.f32 %v9131_v30, %v5525_v11  ;;  %v8041_v41 = vpop.f32.mrb[90].mxu0 }
 0x803   : > { %v5540_v63 = vadd.f32 %v8041_v41, %v11494_v13  ;;  %v5534_v38 = vpop.f32.mrb[91].mxu0  ;;  %v5608_v24 = vsel %vm1065_vm1, %v11538_v20, 0.0 }
 0x804   : > { %v5535_v27 = vadd.f32 %v11494_v13, %v5534_v38  ;;  %5609 = vadd.xlane.f32.xlu1 %v5608_v24  ;;  %v5586_v15 = vpop.xlane.xlu0 %5585  ;;  %v5605_v34 = vsel %vm1065_vm1, %v11540_v12, 0.0 }
 0x805   : > { %v11548_v16 = vadd.f32 %v9132_v62, %v5540_v63  ;;  %5606 = vadd.xlane.f32.xlu0 %v5605_v34  ;;  %v5583_v10 = vpop.xlane.xlu1 %5582  ;;  %v5630_v43 = vmul.f32 0.03125, %v5586_v15 }
 0x806   : > { %v11550_v32 = vadd.f32 %v9133_v53, %v5535_v27  ;;  %v8044_v55 = vpop.f32.mrb[92].mxu0  ;;  %v5629_v19 = vmul.f32 0.03125, %v5583_v10 }
 0x807   : > { %v5550_v54 = vadd.f32 %v8044_v55, %v11494_v13  ;;  %v5544_v39 = vpop.f32.mrb[93].mxu0  ;;  %v5614_v46 = vsel %vm1065_vm1, %v11548_v16, 0.0  ;;  %v11563_v42 = vsub.f32 %v11498_v3, %v5630_v43 }
 0x808   : > { %v5545_v35 = vadd.f32 %v11494_v13, %v5544_v39  ;;  %5615 = vadd.xlane.f32.xlu1 %v5614_v46  ;;  %v5611_v49 = vsel %vm1065_vm1, %v11550_v32, 0.0  ;;  %v11569_v61 = vsub.f32 %v11500_v52, %v5629_v19 }
 0x809   : > { %v11558_v31 = vadd.f32 %v9134_v2, %v5550_v54  ;;  %5612 = vadd.xlane.f32.xlu0 %v5611_v49  ;;  %v5662_v7 = vmul.f32 %v11563_v42, %v11563_v42  ;;  %v5833_v2 = vld [vmem:[%s9390_s24] sm:$0xff] }
 0x80a   : > { %v11560_v23 = vadd.f32 %v9135_v44, %v5545_v35  ;;  %v8047_v26 = vpop.f32.mrb[94].mxu0  ;;  %v5661_v25 = vmul.f32 %v11569_v61, %v11569_v61  ;;  %v5834_v44 = vld [vmem:[%s9390_s24 + $0x8] sm:$0xff] }
 0x80b   : > { %v5560_v36 = vadd.f32 %v8047_v26, %v11494_v13  ;;  %v5554_v21 = vpop.f32.mrb[95].mxu0  ;;  %v5620_v50 = vsel %vm1065_vm1, %v11558_v31, 0.0  ;;  %v5680_v11 = vsel %vm1065_vm1, %v5662_v7, 0.0  ;;  %v8488_v26 = vpack.c.bf16 %v5834_v44, %v5833_v2 }
 0x80c   : > { %v5555_v45 = vadd.f32 %v11494_v13, %v5554_v21  ;;  %5621 = vadd.xlane.f32.xlu1 %v5620_v50  ;;  %v5617_v58 = vsel %vm1065_vm1, %v11560_v23, 0.0  ;;  %v5592_v56 = vpop.xlane.xlu1 %5591  ;;  %v5677_v41 = vsel %vm1065_vm1, %v5661_v25, 0.0  ;;  %v5836_v21 = vld [vmem:[%s9390_s24 + $0x18] sm:$0xff] }
 0x80d   : > { %v11574_v51 = vadd.f32 %v9136_v17, %v5560_v36  ;;  %5618 = vadd.xlane.f32.xlu0 %v5617_v58  ;;  %v5632_v1 = vmul.f32 0.03125, %v5592_v56  ;;  %v5589_v37 = vpop.xlane.xlu0 %5588  ;;  %8489 = vmatprep.subr.bf16.mxu1 %v8488_v26  ;;  %v5835_v36 = vld [vmem:[%s9390_s24 + $0x10] sm:$0xff] }
 0x80e   : > { %v11576_v4 = vadd.f32 %v9137_v14, %v5555_v45  ;;  %v5631_v40 = vmul.f32 0.03125, %v5589_v37  ;;  %8491 = vmatpush3.bf16.msra.mxu1 %v8488_v26  ;;  %v8492_v50 = vpack.c.bf16 %v5836_v21, %v5835_v36 }
 0x80f   : > { %v11579_v6 = vsub.f32 %v11508_v0, %v5632_v1  ;;  %v5626_v13 = vsel %vm1065_vm1, %v11574_v51, 0.0 }
 0x810   : > { %v11586_v22 = vsub.f32 %v11510_v18, %v5631_v40  ;;  %5627 = vadd.xlane.f32.xlu1 %v5626_v13  ;;  %v5623_v5 = vsel %vm1065_vm1, %v11576_v4, 0.0  ;;  %v5598_v9 = vpop.xlane.xlu1 %5597  ;;  %8493 = vmatprep.subr.bf16.mxu1 %v8492_v50 }
 0x811   : > { %5624 = vadd.xlane.f32.xlu0 %v5623_v5  ;;  %v5634_v60 = vmul.f32 0.03125, %v5598_v9  ;;  %v5595_v59 = vpop.xlane.xlu0 %5594  ;;  %v5664_v57 = vmul.f32 %v11579_v6, %v11579_v6 }
 0x812   : > { %v5633_v29 = vmul.f32 0.03125, %v5595_v59  ;;  %v5663_v63 = vmul.f32 %v11586_v22, %v11586_v22  ;;  %8495 = vmatpush3.bf16.msra.mxu1 %v8492_v50 }
 0x813   : > { %v11593_v28 = vsub.f32 %v11518_v33, %v5634_v60  ;;  %v5686_v38 = vsel %vm1065_vm1, %v5664_v57, 0.0 }
 0x814   : > { %v11599_v30 = vsub.f32 %v11520_v47, %v5633_v29  ;;  %5681 = vadd.xlane.f32.xlu1 %v5680_v11  ;;  %v5683_v62 = vsel %vm1065_vm1, %v5663_v63, 0.0 }
 0x815   : > { %5678 = vadd.xlane.f32.xlu0 %v5677_v41  ;;  %v5666_v27 = vmul.f32 %v11593_v28, %v11593_v28 }
 0x816   : > { %v5665_v10 = vmul.f32 %v11599_v30, %v11599_v30 }
 0x817   : > { %v5604_v24 = vpop.xlane.xlu1 %5603  ;;  %v5692_v54 = vsel %vm1065_vm1, %v5666_v27, 0.0 }
 0x818   : > { %5687 = vadd.xlane.f32.xlu1 %v5686_v38  ;;  %v5636_v15 = vmul.f32 0.03125, %v5604_v24  ;;  %v5601_v34 = vpop.xlane.xlu0 %5600  ;;  %v5689_v39 = vsel %vm1065_vm1, %v5665_v10, 0.0 }
 0x819   : > { %v5635_v53 = vmul.f32 0.03125, %v5601_v34  ;;  %5684 = vadd.xlane.f32.xlu0 %v5683_v62 }
 0x81a   : > { %v11611_v55 = vsub.f32 %v11528_v8, %v5636_v15 }
 0x81b   : > { %v11614_v43 = vsub.f32 %v11530_v48, %v5635_v53 }
 0x81c   : > { %5693 = vadd.xlane.f32.xlu1 %v5692_v54  ;;  %v5668_v46 = vmul.f32 %v11611_v55, %v11611_v55 }
 0x81d   : > { %5690 = vadd.xlane.f32.xlu0 %v5689_v39  ;;  %v5667_v19 = vmul.f32 %v11614_v43, %v11614_v43 }
 0x81e   : > { %v5698_v35 = vsel %vm1065_vm1, %v5668_v46, 0.0 }
 0x81f   : > { %v5695_v49 = vsel %vm1065_vm1, %v5667_v19, 0.0 }
 0x820   : > { %5699 = vadd.xlane.f32.xlu1 %v5698_v35 }
 0x821   : > { %5696 = vadd.xlane.f32.xlu0 %v5695_v49 }
 0x891   : > { %v5610_v45 = vpop.xlane.xlu1 %5609 }
 0x892   : > { %v5638_v58 = vmul.f32 0.03125, %v5610_v45  ;;  %v5607_v56 = vpop.xlane.xlu0 %5606 }
 0x893   : > { %v5637_v17 = vmul.f32 0.03125, %v5607_v56 }
 0x894   : > { %v11629_v1 = vsub.f32 %v11538_v20, %v5638_v58 }
 0x895   : > { %v11632_v37 = vsub.f32 %v11540_v12, %v5637_v17  ;;  %v5616_v14 = vpop.xlane.xlu1 %5615 }
 0x896   : > { %v5640_v40 = vmul.f32 0.03125, %v5616_v14  ;;  %v5613_v13 = vpop.xlane.xlu0 %5612  ;;  %v5670_v7 = vmul.f32 %v11629_v1, %v11629_v1 }
 0x897   : > { %v5639_v5 = vmul.f32 0.03125, %v5613_v13  ;;  %v5669_v9 = vmul.f32 %v11632_v37, %v11632_v37 }
 0x898   : > { %v11639_v25 = vsub.f32 %v11548_v16, %v5640_v40  ;;  %v5704_v60 = vsel %vm1065_vm1, %v5670_v7, 0.0 }
 0x899   : > { %v11643_v59 = vsub.f32 %v11550_v32, %v5639_v5  ;;  %5705 = vadd.xlane.f32.xlu1 %v5704_v60  ;;  %v5622_v29 = vpop.xlane.xlu1 %5621  ;;  %v5701_v11 = vsel %vm1065_vm1, %v5669_v9, 0.0 }
 0x89a   : > { %v5642_v57 = vmul.f32 0.03125, %v5622_v29  ;;  %v5619_v41 = vpop.xlane.xlu0 %5618  ;;  %5702 = vadd.xlane.f32.xlu0 %v5701_v11  ;;  %v5672_v63 = vmul.f32 %v11639_v25, %v11639_v25 }
 0x89b   : > { %v5641_v38 = vmul.f32 0.03125, %v5619_v41  ;;  %v5671_v24 = vmul.f32 %v11643_v59, %v11643_v59 }
 0x89c   : > { %v11651_v27 = vsub.f32 %v11558_v31, %v5642_v57  ;;  %v5710_v15 = vsel %vm1065_vm1, %v5672_v63, 0.0 }
 0x89d   : > { %v11655_v34 = vsub.f32 %v11560_v23, %v5641_v38  ;;  %5711 = vadd.xlane.f32.xlu1 %v5710_v15  ;;  %v5628_v62 = vpop.xlane.xlu1 %5627  ;;  %v5707_v10 = vsel %vm1065_vm1, %v5671_v24, 0.0 }
 0x89e   : > { %v5644_v53 = vmul.f32 0.03125, %v5628_v62  ;;  %v5625_v54 = vpop.xlane.xlu0 %5624  ;;  %5708 = vadd.xlane.f32.xlu0 %v5707_v10  ;;  %v5674_v39 = vmul.f32 %v11651_v27, %v11651_v27 }
 0x89f   : > { %v5643_v46 = vmul.f32 0.03125, %v5625_v54  ;;  %v5673_v19 = vmul.f32 %v11655_v34, %v11655_v34 }
 0x8a0   : > { %v11663_v35 = vsub.f32 %v11574_v51, %v5644_v53  ;;  %v5716_v49 = vsel %vm1065_vm1, %v5674_v39, 0.0  ;;  %v11681_v39 = vld [vmem:[%s12325_s20] ss:$0 sm:$0xff] }
 0x8a1   : > { %v11667_v2 = vsub.f32 %v11576_v4, %v5643_v46  ;;  %5717 = vadd.xlane.f32.xlu1 %v5716_v49  ;;  %v5682_v44 = vpop.xlane.xlu1 %5681  ;;  %v5713_v26 = vsel %vm1065_vm1, %v5673_v19, 0.0 }
 0x8a2   : > { %v5726_v36 = vmul.f32 0.03125, %v5682_v44  ;;  %5714 = vadd.xlane.f32.xlu0 %v5713_v26  ;;  %v5679_v21 = vpop.xlane.xlu0 %5678  ;;  %v5676_v50 = vmul.f32 %v11663_v35, %v11663_v35 }
 0x8a3   : > { %v5725_v45 = vmul.f32 0.03125, %v5679_v21  ;;  %v5675_v58 = vmul.f32 %v11667_v2, %v11667_v2 }
 0x8a4   : > { %v5742_v56 = vadd.f32 1e-05, %v5726_v36  ;;  %v5722_v17 = vsel %vm1065_vm1, %v5676_v50, 0.0  ;;  %v11690_v36 = vld [vmem:[%s12326_s0] ss:$0 sm:$0xff] }
 0x8a5   : > { %v5741_v14 = vadd.f32 1e-05, %v5725_v45  ;;  %5723 = vadd.xlane.f32.xlu1 %v5722_v17  ;;  %v5688_v40 = vpop.xlane.xlu1 %5687  ;;  %v5719_v13 = vsel %vm1065_vm1, %v5675_v58, 0.0 }
 0x8a6   : > { %9090 = vrsqrt.f32 %v5742_v56  ;;  %v5728_v7 = vmul.f32 0.03125, %v5688_v40  ;;  %5720 = vadd.xlane.f32.xlu0 %v5719_v13  ;;  %v5685_v5 = vpop.xlane.xlu0 %5684 }
 0x8a7   : > { %9092 = vrsqrt.f32 %v5741_v14  ;;  %v5727_v9 = vmul.f32 0.03125, %v5685_v5 }
 0x8a8   : > { %v5744_v60 = vadd.f32 1e-05, %v5728_v7 }
 0x8a9   : > { %v5743_v29 = vadd.f32 1e-05, %v5727_v9  ;;  %v5694_v11 = vpop.xlane.xlu1 %5693 }
 0x8aa   : > { %9094 = vrsqrt.f32 %v5744_v60  ;;  %v5730_v57 = vmul.f32 0.03125, %v5694_v11  ;;  %v5691_v41 = vpop.xlane.xlu0 %5690 }
 0x8ab   : > { %9096 = vrsqrt.f32 %v5743_v29  ;;  %v5729_v63 = vmul.f32 0.03125, %v5691_v41 }
 0x8ac   : > { %v5746_v38 = vadd.f32 1e-05, %v5730_v57 }
 0x8ad   : > { %v5745_v24 = vadd.f32 1e-05, %v5729_v63  ;;  %v5700_v15 = vpop.xlane.xlu1 %5699 }
 0x8ae   : > { %9098 = vrsqrt.f32 %v5746_v38  ;;  %v5732_v62 = vmul.f32 0.03125, %v5700_v15  ;;  %v5697_v10 = vpop.xlane.xlu0 %5696 }
 0x8af   : > { %9100 = vrsqrt.f32 %v5745_v24  ;;  %v5731_v53 = vmul.f32 0.03125, %v5697_v10  ;;  %v6055_v10 = vld [vmem:[%s9400_s7 + $0x10] sm:$0xff] }
 0x8b0   : > { %v9091_v54 = vpop.eup %9090  ;;  %v5748_v46 = vadd.f32 1e-05, %v5732_v62  ;;  %v6054_v62 = vld [vmem:[%s9400_s7 + $0x8] sm:$0xff] }
 0x8b1   : > { %v9093_v19 = vpop.eup %9092  ;;  %v5774_v49 = vmul.f32 %v9091_v54, %v11563_v42  ;;  %v5747_v44 = vadd.f32 1e-05, %v5731_v53  ;;  %v6056_v54 = vld [vmem:[%s9400_s7 + $0x18] sm:$0xff] }
 0x8b2   : > { %9102 = vrsqrt.f32 %v5748_v46  ;;  %v5773_v26 = vmul.f32 %v9093_v19, %v11569_v61  ;;  %v8500_v46 = vpack.c.bf16 %v6056_v54, %v6055_v10  ;;  %v6057_v19 = vld [vmem:[%s9400_s7 + $0x20] sm:$0xff] }
 0x8b3   : > { %v5796_v21 = vmul.f32 %v11681_v39, %v5774_v49  ;;  %9104 = vrsqrt.f32 %v5747_v44  ;;  %v6058_v49 = vld [vmem:[%s9400_s7 + $0x28] sm:$0xff] }
 0x8b4   : > { %v9095_v50 = vpop.eup %9094  ;;  %v5795_v45 = vmul.f32 %v11681_v39, %v5773_v26  ;;  %v8504_v44 = vpack.c.bf16 %v6058_v49, %v6057_v19  ;;  %v6059_v26 = vld [vmem:[%s9400_s7 + $0x30] sm:$0xff] }
 0x8b5   : > { %v9097_v58 = vpop.eup %9096  ;;  %v5776_v56 = vmul.f32 %v9095_v50, %v11579_v6  ;;  %v5818_v61 = vadd.f32 %v11690_v36, %v5796_v21  ;;  %v6060_v21 = vld [vmem:[%s9400_s7 + $0x38] sm:$0xff] }
 0x8b6   : > { %v5817_v42 = vadd.f32 %v11690_v36, %v5795_v45  ;;  %v5775_v17 = vmul.f32 %v9097_v58, %v11586_v22  ;;  %v8508_v50 = vpack.c.bf16 %v6060_v21, %v6059_v26  ;;  %v6061_v45 = vld [vmem:[%s9400_s7 + $0x40] sm:$0xff]  ;;  %v6062_v58 = vld [vmem:[%s9400_s7 + $0x48] sm:$0xff] }
 0x8b7   : > { %v5798_v14 = vmul.f32 %v11681_v39, %v5776_v56  ;;  %v8512_v56 = vpack.c.bf16 %v6062_v58, %v6061_v45 }
 0x8b8   : > { %v9099_v40 = vpop.eup %9098  ;;  %8056 = vmatprep.mubr.msk.f32.mxu1 %vm1065_vm1, %v5817_v42  ;;  %v5797_v13 = vmul.f32 %v11681_v39, %v5775_v17  ;;  %v6063_v42 = vld [vmem:[%s9400_s7 + $0x50] sm:$0xff]  ;;  %v6064_v17 = vld [vmem:[%s9400_s7 + $0x58] sm:$0xff] }
 0x8b9   : > { %v9101_v7 = vpop.eup %9100  ;;  %8057 = vmatmul.mubr.msk.f32.vlgmr.msra.gmra.mrb[96].mxu1 %vm1065_vm1, %v5818_v61  ;;  %v5778_v5 = vmul.f32 %v9099_v40, %v11593_v28  ;;  %v5820_v22 = vadd.f32 %v11690_v36, %v5798_v14  ;;  %v8516_v61 = vpack.c.bf16 %v6064_v17, %v6063_v42  ;;  %v6065_v14 = vld [vmem:[%s9400_s7 + $0x60] sm:$0xff]  ;;  %v6066_v40 = vld [vmem:[%s9400_s7 + $0x68] sm:$0xff] }
 0x8ba   : > { %v5819_v6 = vadd.f32 %v11690_v36, %v5797_v13  ;;  %v5777_v9 = vmul.f32 %v9101_v7, %v11599_v30  ;;  %v8520_v13 = vpack.c.bf16 %v6066_v40, %v6065_v14  ;;  %v6067_v7 = vld [vmem:[%s9400_s7 + $0x70] sm:$0xff] }
 0x8bb   : > { %v5800_v60 = vmul.f32 %v11681_v39, %v5778_v5  ;;  %v6068_v5 = vld [vmem:[%s9400_s7 + $0x78] sm:$0xff] }
 0x8bc   : > { %v9103_v29 = vpop.eup %9102  ;;  %8059 = vmatprep.mubr.msk.f32.mxu1 %vm1065_vm1, %v5819_v6  ;;  %v5799_v11 = vmul.f32 %v11681_v39, %v5777_v9  ;;  %v8524_v6 = vpack.c.bf16 %v6068_v5, %v6067_v7 }
 0x8bd   : > { %v9105_v57 = vpop.eup %9104  ;;  %8060 = vmatmul.mubr.msk.f32.gmra.mrb[98].mxu1 %vm1065_vm1, %v5820_v22  ;;  %v5780_v28 = vmul.f32 %v9103_v29, %v11611_v55  ;;  %v5822_v63 = vadd.f32 %v11690_v36, %v5800_v60 }
 0x8be   : > { %v5821_v30 = vadd.f32 %v11690_v36, %v5799_v11  ;;  %v5779_v41 = vmul.f32 %v9105_v57, %v11614_v43  ;;  %v6053_v43 = vld [vmem:[%s9400_s7] sm:$0xff] }
 0x8bf   : > { %v5802_v38 = vmul.f32 %v11681_v39, %v5780_v28  ;;  %v8496_v53 = vpack.c.bf16 %v6054_v62, %v6053_v43 }
 0x8c0   : > { %8062 = vmatprep.mubr.msk.f32.mxu1 %vm1065_vm1, %v5821_v30  ;;  %v5801_v24 = vmul.f32 %v11681_v39, %v5779_v41 }
 0x8c1   : > { %8063 = vmatmul.mubr.msk.f32.gmra.mrb[100].mxu1 %vm1065_vm1, %v5822_v63  ;;  %v5824_v55 = vadd.f32 %v11690_v36, %v5802_v38  ;;  %8497 = vmatprep.subr.bf16.mxu0 %v8496_v53 }
 0x8c2   : > { %v5823_v15 = vadd.f32 %v11690_v36, %v5801_v24  ;;  %8499 = vmatpush3.bf16.msra.mxu0 %v8496_v53 }
 0x8c3   : > { %8501 = vmatprep.subr.bf16.mxu0 %v8500_v46 }
 0x8c4   : > { %8065 = vmatprep.mubr.msk.f32.mxu1 %vm1065_vm1, %v5823_v15 }
 0x8c5   : > { %8066 = vmatmul.mubr.msk.f32.gmra.mrb[102].mxu1 %vm1065_vm1, %v5824_v55 }
 0x8c6   : > { %8503 = vmatpush3.bf16.msra.mxu0 %v8500_v46 }
 0x8c7   : > { %8505 = vmatprep.subr.bf16.mxu0 %v8504_v44 }
 0x8ca   : > { %8507 = vmatpush3.bf16.msra.mxu0 %v8504_v44 }
 0x8cb   : > { %8509 = vmatprep.subr.bf16.mxu0 %v8508_v50 }
 0x8ce   : > { %8511 = vmatpush3.bf16.msra.mxu0 %v8508_v50 }
 0x8cf   : > { %8513 = vmatprep.subr.bf16.mxu0 %v8512_v56 }
 0x8d2   : > { %8515 = vmatpush3.bf16.msra.mxu0 %v8512_v56 }
 0x8d3   : > { %8517 = vmatprep.subr.bf16.mxu0 %v8516_v61 }
 0x8d6   : > { %8519 = vmatpush3.bf16.msra.mxu0 %v8516_v61 }
 0x8d7   : > { %8521 = vmatprep.subr.bf16.mxu0 %v8520_v13 }
 0x8da   : > { %8523 = vmatpush3.bf16.msra.mxu0 %v8520_v13 }
 0x8db   : > { %8525 = vmatprep.subr.bf16.mxu0 %v8524_v6 }
 0x8de   : > { %8527 = vmatpush3.bf16.msra.mxu0 %v8524_v6 }
 0x926   : > { %v5706_v9 = vpop.xlane.xlu1 %5705 }
 0x927   : > { %v5734_v22 = vmul.f32 0.03125, %v5706_v9  ;;  %v5703_v60 = vpop.xlane.xlu0 %5702 }
 0x928   : > { %v5733_v29 = vmul.f32 0.03125, %v5703_v60 }
 0x929   : > { %v5750_v11 = vadd.f32 1e-05, %v5734_v22 }
 0x92a   : > { %v5749_v57 = vadd.f32 1e-05, %v5733_v29  ;;  %v5712_v28 = vpop.xlane.xlu1 %5711 }
 0x92b   : > { %9106 = vrsqrt.f32 %v5750_v11  ;;  %v5736_v30 = vmul.f32 0.03125, %v5712_v28  ;;  %v5709_v41 = vpop.xlane.xlu0 %5708 }
 0x92c   : > { %9108 = vrsqrt.f32 %v5749_v57  ;;  %v5735_v63 = vmul.f32 0.03125, %v5709_v41 }
 0x92d   : > { %v5752_v38 = vadd.f32 1e-05, %v5736_v30 }
 0x92e   : > { %v5751_v24 = vadd.f32 1e-05, %v5735_v63  ;;  %v5718_v15 = vpop.xlane.xlu1 %5717 }
 0x92f   : > { %9110 = vrsqrt.f32 %v5752_v38  ;;  %v5738_v55 = vmul.f32 0.03125, %v5718_v15  ;;  %v5715_v43 = vpop.xlane.xlu0 %5714 }
 0x930   : > { %9112 = vrsqrt.f32 %v5751_v24  ;;  %v5737_v62 = vmul.f32 0.03125, %v5715_v43 }
 0x931   : > { %v5754_v10 = vadd.f32 1e-05, %v5738_v55 }
 0x932   : > { %v5753_v53 = vadd.f32 1e-05, %v5737_v62  ;;  %v5724_v54 = vpop.xlane.xlu1 %5723 }
 0x933   : > { %9114 = vrsqrt.f32 %v5754_v10  ;;  %v5740_v46 = vmul.f32 0.03125, %v5724_v54  ;;  %v5721_v19 = vpop.xlane.xlu0 %5720 }
 0x934   : > { %9116 = vrsqrt.f32 %v5753_v53  ;;  %v5739_v49 = vmul.f32 0.03125, %v5721_v19 }
 0x935   : > { %v9107_v44 = vpop.eup %9106  ;;  %v5756_v26 = vadd.f32 1e-05, %v5740_v46 }
 0x936   : > { %v9109_v21 = vpop.eup %9108  ;;  %v5755_v50 = vadd.f32 1e-05, %v5739_v49  ;;  %v5782_v45 = vmul.f32 %v9107_v44, %v11629_v1 }
 0x937   : > { %9118 = vrsqrt.f32 %v5756_v26  ;;  %v5781_v58 = vmul.f32 %v9109_v21, %v11632_v37 }
 0x938   : > { %9120 = vrsqrt.f32 %v5755_v50  ;;  %v5804_v56 = vmul.f32 %v11681_v39, %v5782_v45 }
 0x939   : > { %v9111_v42 = vpop.eup %9110  ;;  %v5803_v17 = vmul.f32 %v11681_v39, %v5781_v58 }
 0x93a   : > { %v9113_v61 = vpop.eup %9112  ;;  %v5784_v14 = vmul.f32 %v9111_v42, %v11639_v25  ;;  %v5826_v7 = vadd.f32 %v11690_v36, %v5804_v56 }
 0x93b   : > { %v5825_v40 = vadd.f32 %v11690_v36, %v5803_v17  ;;  %v5783_v13 = vmul.f32 %v9113_v61, %v11643_v59 }
 0x93c   : > { %v5806_v1 = vmul.f32 %v11681_v39, %v5784_v14 }
 0x93d   : > { %v9115_v5 = vpop.eup %9114  ;;  %8068 = vmatprep.mubr.msk.f32.mxu1 %vm1065_vm1, %v5825_v40  ;;  %v5805_v37 = vmul.f32 %v11681_v39, %v5783_v13 }
 0x93e   : > { %v9117_v6 = vpop.eup %9116  ;;  %8069 = vmatmul.mubr.msk.f32.gmra.mrb[104].mxu1 %vm1065_vm1, %v5826_v7  ;;  %v5786_v9 = vmul.f32 %v9115_v5, %v11651_v27  ;;  %v5828_v59 = vadd.f32 %v11690_v36, %v5806_v1 }
 0x93f   : > { %v5827_v25 = vadd.f32 %v11690_v36, %v5805_v37  ;;  %v5785_v22 = vmul.f32 %v9117_v6, %v11655_v34 }
 0x940   : > { %v5808_v60 = vmul.f32 %v11681_v39, %v5786_v9 }
 0x941   : > { %v9119_v29 = vpop.eup %9118  ;;  %8071 = vmatprep.mubr.msk.f32.mxu1 %vm1065_vm1, %v5827_v25  ;;  %v5807_v11 = vmul.f32 %v11681_v39, %v5785_v22 }
 0x942   : > { %v9121_v57 = vpop.eup %9120  ;;  %8072 = vmatmul.mubr.msk.f32.gmra.mrb[106].mxu1 %vm1065_vm1, %v5828_v59  ;;  %v5788_v28 = vmul.f32 %v9119_v29, %v11663_v35  ;;  %v5830_v34 = vadd.f32 %v11690_v36, %v5808_v60  ;;  %v7053_v35 = vld [vmem:[%s12327_s8] ss:$0 sm:$0xff] }
 0x943   : > { %v5829_v27 = vadd.f32 %v11690_v36, %v5807_v11  ;;  %v5787_v30 = vmul.f32 %v9121_v57, %v11667_v2 }
 0x944   : > { %v5810_v41 = vmul.f32 %v11681_v39, %v5788_v28 }
 0x945   : > { %8074 = vmatprep.mubr.msk.f32.mxu1 %vm1065_vm1, %v5829_v27  ;;  %v5809_v63 = vmul.f32 %v11681_v39, %v5787_v30 }
 0x946   : > { %8075 = vmatmul.mubr.msk.f32.gmra.mrb[108].mxu1 %vm1065_vm1, %v5830_v34  ;;  %v5832_v24 = vadd.f32 %v11690_v36, %v5810_v41 }
 0x947   : > { %v5831_v38 = vadd.f32 %v11690_v36, %v5809_v63 }
 0x949   : > { %8077 = vmatprep.mubr.msk.f32.mxu1 %vm1065_vm1, %v5831_v38 }
 0x94a   : > { %8078 = vmatmul.mubr.msk.f32.gmra.mrb[110].mxu1 %vm1065_vm1, %v5832_v24 }
 0x98c   : > { %v8058_v2 = vpop.f32.mrb[96].mxu1 }
 0x98d   : > { %v5964_v15 = vadd.f32 %v8058_v2, %v7053_v35  ;;  %v5958_v55 = vpop.f32.mrb[97].mxu1 }
 0x98e   : > { %v5959_v43 = vadd.f32 %v7053_v35, %v5958_v55 }
 0x98f   : > { %v6038_v10 = vmax.f32 %v5964_v15, 0.0  ;;  %v7070_v15 = vld [vmem:[%s948_s5] ss:$0 sm:$0xff] }
 0x990   : > { %v6037_v39 = vmax.f32 %v5959_v43, 0.0  ;;  %v8061_v62 = vpop.f32.mrb[98].mxu1 }
 0x991   : > { %v5974_v53 = vadd.f32 %v8061_v62, %v7053_v35  ;;  %v5968_v54 = vpop.f32.mrb[99].mxu1 }
 0x992   : > { %v5969_v46 = vadd.f32 %v7053_v35, %v5968_v54  ;;  %8112 = vmatprep.mubr.f32.mxu0 %v6037_v39 }
 0x993   : > { %8113 = vmatmul.mubr.f32.vlgmr.msra.gmra.mrb[96].mxu0 %v6038_v10  ;;  %v6040_v49 = vmax.f32 %v5974_v53, 0.0 }
 0x994   : > { %v6039_v36 = vmax.f32 %v5969_v46, 0.0  ;;  %v8064_v19 = vpop.f32.mrb[100].mxu1 }
 0x995   : > { %v5984_v44 = vadd.f32 %v8064_v19, %v7053_v35  ;;  %v5978_v26 = vpop.f32.mrb[101].mxu1 }
 0x996   : > { %v5979_v21 = vadd.f32 %v7053_v35, %v5978_v26  ;;  %8115 = vmatprep.mubr.f32.mxu0 %v6039_v36 }
 0x997   : > { %8116 = vmatmul.mubr.f32.gmra.mrb[98].mxu0 %v6040_v49  ;;  %v6042_v58 = vmax.f32 %v5984_v44, 0.0 }
 0x998   : > { %v6041_v50 = vmax.f32 %v5979_v21, 0.0  ;;  %v8067_v45 = vpop.f32.mrb[102].mxu1 }
 0x999   : > { %v5994_v56 = vadd.f32 %v8067_v45, %v7053_v35  ;;  %v5988_v42 = vpop.f32.mrb[103].mxu1 }
 0x99a   : > { %v5989_v17 = vadd.f32 %v7053_v35, %v5988_v42  ;;  %8118 = vmatprep.mubr.f32.mxu0 %v6041_v50 }
 0x99b   : > { %8119 = vmatmul.mubr.f32.gmra.mrb[100].mxu0 %v6042_v58  ;;  %v6044_v14 = vmax.f32 %v5994_v56, 0.0 }
 0x99c   : > { %v6043_v61 = vmax.f32 %v5989_v17, 0.0 }
 0x99e   : > { %8121 = vmatprep.mubr.f32.mxu0 %v6043_v61 }
 0x99f   : > { %8122 = vmatmul.mubr.f32.gmra.mrb[102].mxu0 %v6044_v14 }
 0xa11   : > { %v8070_v40 = vpop.f32.mrb[104].mxu1 }
 0xa12   : > { %v6004_v13 = vadd.f32 %v8070_v40, %v7053_v35  ;;  %v5998_v7 = vpop.f32.mrb[105].mxu1 }
 0xa13   : > { %v5999_v1 = vadd.f32 %v7053_v35, %v5998_v7 }
 0xa14   : > { %v6046_v6 = vmax.f32 %v6004_v13, 0.0 }
 0xa15   : > { %v6045_v5 = vmax.f32 %v5999_v1, 0.0  ;;  %v8073_v37 = vpop.f32.mrb[106].mxu1 }
 0xa16   : > { %v6014_v9 = vadd.f32 %v8073_v37, %v7053_v35  ;;  %v6008_v25 = vpop.f32.mrb[107].mxu1 }
 0xa17   : > { %v6009_v22 = vadd.f32 %v7053_v35, %v6008_v25  ;;  %8124 = vmatprep.mubr.f32.mxu0 %v6045_v5 }
 0xa18   : > { %8125 = vmatmul.mubr.f32.gmra.mrb[104].mxu0 %v6046_v6  ;;  %v6048_v29 = vmax.f32 %v6014_v9, 0.0 }
 0xa19   : > { %v6047_v59 = vmax.f32 %v6009_v22, 0.0  ;;  %v8076_v60 = vpop.f32.mrb[108].mxu1 }
 0xa1a   : > { %v6024_v11 = vadd.f32 %v8076_v60, %v7053_v35  ;;  %v6018_v57 = vpop.f32.mrb[109].mxu1 }
 0xa1b   : > { %v6019_v28 = vadd.f32 %v7053_v35, %v6018_v57  ;;  %8127 = vmatprep.mubr.f32.mxu0 %v6047_v59 }
 0xa1c   : > { %8128 = vmatmul.mubr.f32.gmra.mrb[106].mxu0 %v6048_v29  ;;  %v6050_v34 = vmax.f32 %v6024_v11, 0.0 }
 0xa1d   : > { %v6049_v27 = vmax.f32 %v6019_v28, 0.0  ;;  %v8079_v30 = vpop.f32.mrb[110].mxu1 }
 0xa1e   : > { %v6034_v41 = vadd.f32 %v8079_v30, %v7053_v35  ;;  %v6028_v63 = vpop.f32.mrb[111].mxu1 }
 0xa1f   : > { %v6029_v38 = vadd.f32 %v7053_v35, %v6028_v63  ;;  %8130 = vmatprep.mubr.f32.mxu0 %v6049_v27 }
 0xa20   : > { %8131 = vmatmul.mubr.f32.gmra.mrb[108].mxu0 %v6050_v34  ;;  %v6052_v2 = vmax.f32 %v6034_v41, 0.0 }
 0xa21   : > { %v6051_v24 = vmax.f32 %v6029_v38, 0.0 }
 0xa23   : > { %8133 = vmatprep.mubr.f32.mxu0 %v6051_v24 }
 0xa24   : > { %8134 = vmatmul.mubr.f32.gmra.mrb[110].mxu0 %v6052_v2 }
 0xa66   : > { %v8114_v55 = vpop.f32.mrb[96].mxu0 }
 0xa67   : > { %v6148_v43 = vadd.f32 %v8114_v55, %v7070_v15  ;;  %v6142_v39 = vpop.f32.mrb[97].mxu0 }
 0xa68   : > { %v6143_v62 = vadd.f32 %v7070_v15, %v6142_v39 }
 0xa69   : > { %v11781_v10 = vadd.f32 %v6148_v43, %v11498_v3 }
 0xa6a   : > { %v11784_v35 = vadd.f32 %v6143_v62, %v11500_v52  ;;  %v8117_v53 = vpop.f32.mrb[98].mxu0 }
 0xa6b   : > { %6238 = vst.msk [vmem:[#allocation2 + $0x8] sm:$0xff] %vm1065_vm1, %v11781_v10  ;;  %v6158_v54 = vadd.f32 %v8117_v53, %v7070_v15  ;;  %v6152_v46 = vpop.f32.mrb[99].mxu0 }
 0xa6c   : > { %6237 = vst.msk [vmem:[#allocation2] sm:$0xff] %vm1065_vm1, %v11784_v35  ;;  %v6153_v36 = vadd.f32 %v7070_v15, %v6152_v46 }
 0xa6d   : > { %v11791_v19 = vadd.f32 %v6158_v54, %v11508_v0 }
 0xa6e   : > { %v11794_v49 = vadd.f32 %v6153_v36, %v11510_v18  ;;  %v8120_v3 = vpop.f32.mrb[100].mxu0 }
 0xa6f   : > { %6240 = vst.msk [vmem:[#allocation2 + $0x18] sm:$0xff] %vm1065_vm1, %v11791_v19  ;;  %v6168_v52 = vadd.f32 %v8120_v3, %v7070_v15  ;;  %v6162_v44 = vpop.f32.mrb[101].mxu0 }
 0xa70   : > { %6239 = vst.msk [vmem:[#allocation2 + $0x10] sm:$0xff] %vm1065_vm1, %v11794_v49  ;;  %v6163_v26 = vadd.f32 %v7070_v15, %v6162_v44 }
 0xa71   : > { %v11801_v21 = vadd.f32 %v6168_v52, %v11518_v33 }
 0xa72   : > { %v11804_v50 = vadd.f32 %v6163_v26, %v11520_v47  ;;  %v8123_v0 = vpop.f32.mrb[102].mxu0 }
 0xa73   : > { %6242 = vst.msk [vmem:[#allocation2 + $0x28] sm:$0xff] %vm1065_vm1, %v11801_v21  ;;  %v6178_v18 = vadd.f32 %v8123_v0, %v7070_v15  ;;  %v6172_v45 = vpop.f32.mrb[103].mxu0  ;;  %v6274_v57 = vsel (!%p7071_p6), %vm1065_vm1, %v11801_v21, 0.0 }
 0xa74   : > { %6241 = vst.msk [vmem:[#allocation2 + $0x20] sm:$0xff] %vm1065_vm1, %v11804_v50  ;;  %v6173_v58 = vadd.f32 %v7070_v15, %v6172_v45  ;;  %v6271_v11 = vsel (!%p7071_p6), %vm1065_vm1, %v11804_v50, 0.0 }
 0xa75   : > { %v11811_v56 = vadd.f32 %v6178_v18, %v11528_v8 }
 0xa76   : > { %v11814_v42 = vadd.f32 %v6173_v58, %v11530_v48 }
 0xa77   : > { %6244 = vst.msk [vmem:[#allocation2 + $0x38] sm:$0xff] %vm1065_vm1, %v11811_v56  ;;  %v6280_v27 = vsel (!%p7071_p6), %vm1065_vm1, %v11811_v56, 0.0 }
 0xa78   : > { %6243 = vst.msk [vmem:[#allocation2 + $0x30] sm:$0xff] %vm1065_vm1, %v11814_v42  ;;  %v6277_v28 = vsel (!%p7071_p6), %vm1065_vm1, %v11814_v42, 0.0 }
 0xaeb   : > { %v8126_v33 = vpop.f32.mrb[104].mxu0 }
 0xaec   : > { %v6188_v47 = vadd.f32 %v8126_v33, %v7070_v15  ;;  %v6182_v17 = vpop.f32.mrb[105].mxu0 }
 0xaed   : > { %v6183_v61 = vadd.f32 %v7070_v15, %v6182_v17 }
 0xaee   : > { %v11821_v14 = vadd.f32 %v6188_v47, %v11538_v20 }
 0xaef   : > { %v11824_v40 = vadd.f32 %v6183_v61, %v11540_v12  ;;  %v8129_v8 = vpop.f32.mrb[106].mxu0 }
 0xaf0   : > { %6246 = vst.msk [vmem:[#allocation2 + $0x48] sm:$0xff] %vm1065_vm1, %v11821_v14  ;;  %v6198_v48 = vadd.f32 %v8129_v8, %v7070_v15  ;;  %v6192_v13 = vpop.f32.mrb[107].mxu0  ;;  %v6286_v34 = vsel (!%p7071_p6), %vm1065_vm1, %v11821_v14, 0.0 }
 0xaf1   : > { %6245 = vst.msk [vmem:[#allocation2 + $0x40] sm:$0xff] %vm1065_vm1, %v11824_v40  ;;  %v6193_v7 = vadd.f32 %v7070_v15, %v6192_v13  ;;  %v6283_v30 = vsel (!%p7071_p6), %vm1065_vm1, %v11824_v40, 0.0 }
 0xaf2   : > { %v11831_v1 = vadd.f32 %v6198_v48, %v11548_v16 }
 0xaf3   : > { %v11834_v5 = vadd.f32 %v6193_v7, %v11550_v32  ;;  %v8132_v20 = vpop.f32.mrb[108].mxu0 }
 0xaf4   : > { %6248 = vst.msk [vmem:[#allocation2 + $0x58] sm:$0xff] %vm1065_vm1, %v11831_v1  ;;  %v6208_v12 = vadd.f32 %v8132_v20, %v7070_v15  ;;  %v6202_v37 = vpop.f32.mrb[109].mxu0  ;;  %v6292_v63 = vsel (!%p7071_p6), %vm1065_vm1, %v11831_v1, 0.0 }
 0xaf5   : > { %6247 = vst.msk [vmem:[#allocation2 + $0x50] sm:$0xff] %vm1065_vm1, %v11834_v5  ;;  %v6203_v6 = vadd.f32 %v7070_v15, %v6202_v37  ;;  %v6289_v41 = vsel (!%p7071_p6), %vm1065_vm1, %v11834_v5, 0.0 }
 0xaf6   : > { %v11841_v9 = vadd.f32 %v6208_v12, %v11558_v31  ;;  %v6259_v31 = vsel (!%p7071_p6), %vm1065_vm1, %v11784_v35, 0.0 }
 0xaf7   : > { %v11844_v25 = vadd.f32 %v6203_v6, %v11560_v23  ;;  %v8135_v16 = vpop.f32.mrb[110].mxu0  ;;  %6256 = sbr.rel (%p7071_p6) target bundleno = 3152 (0xc50), region = 112  ;;  %v6265_v23 = vsel (!%p7071_p6), %vm1065_vm1, %v11794_v49, 0.0  ;;  %6260 = vadd.xlane.f32.xlu0 (!%p7071_p6), %v6259_v31 }
 0xaf8   : > { %6250 = vst.msk [vmem:[#allocation2 + $0x68] sm:$0xff] %vm1065_vm1, %v11841_v9  ;;  %v6218_v32 = vadd.f32 %v8135_v16, %v7070_v15  ;;  %v6212_v22 = vpop.f32.mrb[111].mxu0  ;;  %6266 = vadd.xlane.f32.xlu1 (!%p7071_p6), %v6265_v23  ;;  %v6298_v24 = vsel (!%p7071_p6), %vm1065_vm1, %v11841_v9, 0.0 }
 0xaf9   : > { %6249 = vst.msk [vmem:[#allocation2 + $0x60] sm:$0xff] %vm1065_vm1, %v11844_v25  ;;  %v6213_v59 = vadd.f32 %v7070_v15, %v6212_v22  ;;  %v6295_v38 = vsel (!%p7071_p6), %vm1065_vm1, %v11844_v25, 0.0 }
 0xafa   : > { %v11851_v60 = vadd.f32 %v6218_v32, %v11574_v51  ;;  %v6262_v51 = vsel (!%p7071_p6), %vm1065_vm1, %v11781_v10, 0.0 }
 0xafb   : > { %v11854_v29 = vadd.f32 %v6213_v59, %v11576_v4  ;;  %v6268_v4 = vsel (!%p7071_p6), %vm1065_vm1, %v11791_v19, 0.0  ;;  %6263 = vadd.xlane.f32.xlu0 (!%p7071_p6), %v6262_v51 }
 0xafc   : > { %6252 = vst.msk [vmem:[#allocation2 + $0x78] sm:$0xff] %vm1065_vm1, %v11851_v60  ;;  %6269 = vadd.xlane.f32.xlu1 (!%p7071_p6), %v6268_v4  ;;  %v6304_v15 = vsel (!%p7071_p6), %vm1065_vm1, %v11851_v60, 0.0 }
 0xafd   : > { %6251 = vst.msk [vmem:[#allocation2 + $0x70] sm:$0xff] %vm1065_vm1, %v11854_v29  ;;  %v6301_v2 = vsel (!%p7071_p6), %vm1065_vm1, %v11854_v29, 0.0 }
 0xaff   : > { %6272 = vadd.xlane.f32.xlu0 %v6271_v11 }
 0xb00   : > { %6275 = vadd.xlane.f32.xlu1 %v6274_v57 }
 0xb03   : > { %6278 = vadd.xlane.f32.xlu0 %v6277_v28 }
 0xb04   : > { %6281 = vadd.xlane.f32.xlu1 %v6280_v27 }
 0xb07   : > { %6284 = vadd.xlane.f32.xlu0 %v6283_v30 }
 0xb08   : > { %6287 = vadd.xlane.f32.xlu1 %v6286_v34 }
 0xb0b   : > { %6290 = vadd.xlane.f32.xlu0 %v6289_v41 }
 0xb0c   : > { %6293 = vadd.xlane.f32.xlu1 %v6292_v63 }
 0xb0f   : > { %6296 = vadd.xlane.f32.xlu0 %v6295_v38 }
 0xb10   : > { %6299 = vadd.xlane.f32.xlu1 %v6298_v24 }
 0xb13   : > { %6302 = vadd.xlane.f32.xlu0 %v6301_v2 }
 0xb14   : > { %6305 = vadd.xlane.f32.xlu1 %v6304_v15 }
 0xb84   : > { %v6261_v55 = vpop.xlane.xlu0 %6260 }
 0xb85   : > { %v6267_v43 = vpop.xlane.xlu1 %6266  ;;  %v6307_v39 = vmul.f32 0.03125, %v6261_v55 }
 0xb86   : > { %v6309_v62 = vmul.f32 0.03125, %v6267_v43 }
 0xb87   : > { %v11894_v53 = vsub.f32 %v11784_v35, %v6307_v39 }
 0xb88   : > { %v11897_v54 = vsub.f32 %v11794_v49, %v6309_v62  ;;  %v6264_v46 = vpop.xlane.xlu0 %6263 }
 0xb89   : > { %v6270_v36 = vpop.xlane.xlu1 %6269  ;;  %v6308_v3 = vmul.f32 0.03125, %v6264_v46  ;;  %v6339_v44 = vmul.f32 %v11894_v53, %v11894_v53 }
 0xb8a   : > { %v6310_v52 = vmul.f32 0.03125, %v6270_v36  ;;  %v6341_v26 = vmul.f32 %v11897_v54, %v11897_v54 }
 0xb8b   : > { %v11904_v0 = vsub.f32 %v11781_v10, %v6308_v3  ;;  %v6355_v35 = vsel %vm1065_vm1, %v6339_v44, 0.0 }
 0xb8c   : > { %v11907_v18 = vsub.f32 %v11791_v19, %v6310_v52  ;;  %6356 = vadd.xlane.f32.xlu0 %v6355_v35  ;;  %v6273_v49 = vpop.xlane.xlu0 %6272  ;;  %v6361_v58 = vsel %vm1065_vm1, %v6341_v26, 0.0 }
 0xb8d   : > { %v6276_v45 = vpop.xlane.xlu1 %6275  ;;  %v6311_v33 = vmul.f32 0.03125, %v6273_v49  ;;  %v6340_v17 = vmul.f32 %v11904_v0, %v11904_v0 }
 0xb8e   : > { %v6312_v47 = vmul.f32 0.03125, %v6276_v45  ;;  %v6342_v61 = vmul.f32 %v11907_v18, %v11907_v18 }
 0xb8f   : > { %v11916_v10 = vsub.f32 %v11804_v50, %v6311_v33  ;;  %v6358_v8 = vsel %vm1065_vm1, %v6340_v17, 0.0 }
 0xb90   : > { %v11919_v19 = vsub.f32 %v11801_v21, %v6312_v47  ;;  %6362 = vadd.xlane.f32.xlu0 %v6361_v58  ;;  %6359 = vadd.xlane.f32.xlu1 %v6358_v8  ;;  %v6279_v48 = vpop.xlane.xlu0 %6278  ;;  %v6364_v7 = vsel %vm1065_vm1, %v6342_v61, 0.0 }
 0xb91   : > { %v6282_v13 = vpop.xlane.xlu1 %6281  ;;  %v6313_v20 = vmul.f32 0.03125, %v6279_v48  ;;  %v6343_v37 = vmul.f32 %v11916_v10, %v11916_v10 }
 0xb92   : > { %v6314_v12 = vmul.f32 0.03125, %v6282_v13  ;;  %v6344_v50 = vmul.f32 %v11919_v19, %v11919_v19 }
 0xb93   : > { %v11928_v6 = vsub.f32 %v11814_v42, %v6313_v20  ;;  %v6367_v16 = vsel %vm1065_vm1, %v6343_v37, 0.0 }
 0xb94   : > { %v11931_v21 = vsub.f32 %v11811_v56, %v6314_v12  ;;  %6365 = vadd.xlane.f32.xlu1 %v6364_v7  ;;  %6368 = vadd.xlane.f32.xlu0 %v6367_v16  ;;  %v6285_v32 = vpop.xlane.xlu0 %6284  ;;  %v6370_v59 = vsel %vm1065_vm1, %v6344_v50, 0.0 }
 0xb95   : > { %v6288_v22 = vpop.xlane.xlu1 %6287  ;;  %v6315_v31 = vmul.f32 0.03125, %v6285_v32  ;;  %v6345_v51 = vmul.f32 %v11928_v6, %v11928_v6 }
 0xb96   : > { %v6316_v23 = vmul.f32 0.03125, %v6288_v22  ;;  %v6346_v42 = vmul.f32 %v11931_v21, %v11931_v21 }
 0xb97   : > { %v11940_v4 = vsub.f32 %v11824_v40, %v6315_v31  ;;  %v6373_v11 = vsel %vm1065_vm1, %v6345_v51, 0.0 }
 0xb98   : > { %v11943_v56 = vsub.f32 %v11821_v14, %v6316_v23  ;;  %6371 = vadd.xlane.f32.xlu1 %v6370_v59  ;;  %6374 = vadd.xlane.f32.xlu0 %v6373_v11  ;;  %v6291_v57 = vpop.xlane.xlu0 %6290  ;;  %v6376_v27 = vsel %vm1065_vm1, %v6346_v42, 0.0 }
 0xb99   : > { %v6294_v28 = vpop.xlane.xlu1 %6293  ;;  %v6317_v30 = vmul.f32 0.03125, %v6291_v57  ;;  %v6347_v41 = vmul.f32 %v11940_v4, %v11940_v4 }
 0xb9a   : > { %v6318_v34 = vmul.f32 0.03125, %v6294_v28  ;;  %v6348_v40 = vmul.f32 %v11943_v56, %v11943_v56  ;;  %v11992_v28 = vld [vmem:[%s12329_s2] ss:$0 sm:$0xff] }
 0xb9b   : > { %v11952_v63 = vsub.f32 %v11834_v5, %v6317_v30  ;;  %v6379_v38 = vsel %vm1065_vm1, %v6347_v41, 0.0 }
 0xb9c   : > { %v11955_v14 = vsub.f32 %v11831_v1, %v6318_v34  ;;  %6377 = vadd.xlane.f32.xlu1 %v6376_v27  ;;  %6380 = vadd.xlane.f32.xlu0 %v6379_v38  ;;  %v6297_v24 = vpop.xlane.xlu0 %6296  ;;  %v6382_v15 = vsel %vm1065_vm1, %v6348_v40, 0.0  ;;  %v11998_v38 = vld [vmem:[%s12330_s25] ss:$0 sm:$0xff] }
 0xb9d   : > { %v6300_v2 = vpop.xlane.xlu1 %6299  ;;  %v6319_v55 = vmul.f32 0.03125, %v6297_v24  ;;  %v6349_v39 = vmul.f32 %v11952_v63, %v11952_v63 }
 0xb9e   : > { %v6320_v43 = vmul.f32 0.03125, %v6300_v2  ;;  %v6350_v5 = vmul.f32 %v11955_v14, %v11955_v14 }
 0xb9f   : > { %v11964_v62 = vsub.f32 %v11844_v25, %v6319_v55  ;;  %v6385_v46 = vsel %vm1065_vm1, %v6349_v39, 0.0 }
 0xba0   : > { %v11967_v1 = vsub.f32 %v11841_v9, %v6320_v43  ;;  %6383 = vadd.xlane.f32.xlu1 %v6382_v15  ;;  %6386 = vadd.xlane.f32.xlu0 %v6385_v46  ;;  %v6303_v36 = vpop.xlane.xlu0 %6302  ;;  %v6388_v52 = vsel %vm1065_vm1, %v6350_v5, 0.0 }
 0xba1   : > { %v6306_v3 = vpop.xlane.xlu1 %6305  ;;  %v6321_v44 = vmul.f32 0.03125, %v6303_v36  ;;  %v6351_v35 = vmul.f32 %v11964_v62, %v11964_v62 }
 0xba2   : > { %v6322_v26 = vmul.f32 0.03125, %v6306_v3  ;;  %v6352_v25 = vmul.f32 %v11967_v1, %v11967_v1 }
 0xba3   : > { %v11976_v49 = vsub.f32 %v11854_v29, %v6321_v44  ;;  %v6391_v45 = vsel %vm1065_vm1, %v6351_v35, 0.0 }
 0xba4   : > { %v11979_v9 = vsub.f32 %v11851_v60, %v6322_v26  ;;  %6389 = vadd.xlane.f32.xlu1 %v6388_v52  ;;  %6392 = vadd.xlane.f32.xlu0 %v6391_v45  ;;  %v6394_v58 = vsel %vm1065_vm1, %v6352_v25, 0.0 }
 0xba5   : > { %v6353_v33 = vmul.f32 %v11976_v49, %v11976_v49 }
 0xba6   : > { %v6354_v47 = vmul.f32 %v11979_v9, %v11979_v9 }
 0xba7   : > { %v6397_v17 = vsel %vm1065_vm1, %v6353_v33, 0.0 }
 0xba8   : > { %6395 = vadd.xlane.f32.xlu1 %v6394_v58  ;;  %6398 = vadd.xlane.f32.xlu0 %v6397_v17  ;;  %v6400_v29 = vsel %vm1065_vm1, %v6354_v47, 0.0 }
 0xbac   : > { %6401 = vadd.xlane.f32.xlu1 %v6400_v29 }
 0xc19   : > { %v6357_v60 = vpop.xlane.xlu0 %6356 }
 0xc1a   : > { %v6403_v61 = vmul.f32 0.03125, %v6357_v60 }
 0xc1c   : > { %v6419_v8 = vadd.f32 1e-05, %v6403_v61 }
 0xc1d   : > { %v6360_v48 = vpop.xlane.xlu1 %6359  ;;  %v6363_v13 = vpop.xlane.xlu0 %6362 }
 0xc1e   : > { %9138 = vrsqrt.f32 %v6419_v8  ;;  %v6404_v7 = vmul.f32 0.03125, %v6360_v48  ;;  %v6405_v20 = vmul.f32 0.03125, %v6363_v13 }
 0xc20   : > { %v6420_v12 = vadd.f32 1e-05, %v6404_v7  ;;  %v6421_v37 = vadd.f32 1e-05, %v6405_v20 }
 0xc21   : > { %v6366_v50 = vpop.xlane.xlu1 %6365  ;;  %v6369_v16 = vpop.xlane.xlu0 %6368 }
 0xc22   : > { %9140 = vrsqrt.f32 %v6420_v12  ;;  %v6406_v32 = vmul.f32 0.03125, %v6366_v50  ;;  %v6407_v22 = vmul.f32 0.03125, %v6369_v16 }
 0xc23   : > { %9142 = vrsqrt.f32 %v6421_v37 }
 0xc24   : > { %v6422_v59 = vadd.f32 1e-05, %v6406_v32  ;;  %v6423_v31 = vadd.f32 1e-05, %v6407_v22 }
 0xc25   : > { %v6372_v23 = vpop.xlane.xlu1 %6371  ;;  %v6375_v51 = vpop.xlane.xlu0 %6374 }
 0xc26   : > { %9144 = vrsqrt.f32 %v6422_v59  ;;  %v6408_v42 = vmul.f32 0.03125, %v6372_v23  ;;  %v6409_v11 = vmul.f32 0.03125, %v6375_v51 }
 0xc27   : > { %9146 = vrsqrt.f32 %v6423_v31 }
 0xc28   : > { %v9139_v57 = vpop.eup %9138  ;;  %v6424_v27 = vadd.f32 1e-05, %v6408_v42  ;;  %v6425_v30 = vadd.f32 1e-05, %v6409_v11 }
 0xc29   : > { %v6451_v34 = vmul.f32 %v9139_v57, %v11894_v53  ;;  %v6378_v41 = vpop.xlane.xlu1 %6377  ;;  %v6381_v40 = vpop.xlane.xlu0 %6380 }
 0xc2a   : > { %9148 = vrsqrt.f32 %v6424_v27  ;;  %v6410_v24 = vmul.f32 0.03125, %v6378_v41  ;;  %v6411_v2 = vmul.f32 0.03125, %v6381_v40 }
 0xc2b   : > { %v6473_v15 = vmul.f32 %v11992_v28, %v6451_v34  ;;  %9150 = vrsqrt.f32 %v6425_v30 }
 0xc2c   : > { %v9141_v55 = vpop.eup %9140  ;;  %v6426_v43 = vadd.f32 1e-05, %v6410_v24  ;;  %v6427_v39 = vadd.f32 1e-05, %v6411_v2 }
 0xc2d   : > { %v9143_v5 = vpop.eup %9142  ;;  %v6495_v46 = vadd.f32 %v11998_v38, %v6473_v15  ;;  %v6452_v53 = vmul.f32 %v9141_v55, %v11904_v0  ;;  %v6384_v36 = vpop.xlane.xlu1 %6383 }
 0xc2e   : > { %v6387_v3 = vpop.xlane.xlu0 %6386  ;;  %v6453_v52 = vmul.f32 %v9143_v5, %v11897_v54  ;;  %9152 = vrsqrt.f32 %v6426_v43  ;;  %v6412_v44 = vmul.f32 0.03125, %v6384_v36 }
 0xc2f   : > { %v6413_v26 = vmul.f32 0.03125, %v6387_v3  ;;  %6511 = vst.msk [vmem:[%s12331_s11] sm:$0xff] %vm1065_vm1, %v6495_v46  ;;  %v6474_v35 = vmul.f32 %v11992_v28, %v6452_v53  ;;  %9154 = vrsqrt.f32 %v6427_v39 }
 0xc30   : > { %v9145_v25 = vpop.eup %9144  ;;  %v6475_v45 = vmul.f32 %v11992_v28, %v6453_v52  ;;  %v6428_v58 = vadd.f32 1e-05, %v6412_v44 }
 0xc31   : > { %v6429_v0 = vadd.f32 1e-05, %v6413_v26  ;;  %v9147_v33 = vpop.eup %9146  ;;  %v6496_v47 = vadd.f32 %v11998_v38, %v6474_v35  ;;  %v6454_v54 = vmul.f32 %v9145_v25, %v11907_v18  ;;  %v6390_v17 = vpop.xlane.xlu1 %6389 }
 0xc32   : > { %v6393_v29 = vpop.xlane.xlu0 %6392  ;;  %v6497_v60 = vadd.f32 %v11998_v38, %v6475_v45  ;;  %v6455_v61 = vmul.f32 %v9147_v33, %v11916_v10  ;;  %9156 = vrsqrt.f32 %v6428_v58  ;;  %v6414_v8 = vmul.f32 0.03125, %v6390_v17 }
 0xc33   : > { %6512 = vst.msk [vmem:[%s12331_s11 + $0x8] sm:$0xff] %vm1065_vm1, %v6496_v47  ;;  %v6476_v48 = vmul.f32 %v11992_v28, %v6454_v54  ;;  %9158 = vrsqrt.f32 %v6429_v0  ;;  %v6415_v13 = vmul.f32 0.03125, %v6393_v29 }
 0xc34   : > { %v9149_v7 = vpop.eup %9148  ;;  %6513 = vst.msk [vmem:[%s12331_s11 + $0x10] sm:$0xff] %vm1065_vm1, %v6497_v60  ;;  %v6477_v18 = vmul.f32 %v11992_v28, %v6455_v61  ;;  %v6430_v10 = vadd.f32 1e-05, %v6414_v8 }
 0xc35   : > { %v9151_v20 = vpop.eup %9150  ;;  %v6498_v12 = vadd.f32 %v11998_v38, %v6476_v48  ;;  %v6456_v37 = vmul.f32 %v9149_v7, %v11919_v19  ;;  %v6431_v50 = vadd.f32 1e-05, %v6415_v13  ;;  %v6396_v16 = vpop.xlane.xlu1 %6395 }
 0xc36   : > { %v6399_v32 = vpop.xlane.xlu0 %6398  ;;  %v6499_v22 = vadd.f32 %v11998_v38, %v6477_v18  ;;  %v6457_v59 = vmul.f32 %v9151_v20, %v11928_v6  ;;  %9160 = vrsqrt.f32 %v6430_v10  ;;  %v6416_v31 = vmul.f32 0.03125, %v6396_v16 }
 0xc37   : > { %6514 = vst.msk [vmem:[%s12331_s11 + $0x18] sm:$0xff] %vm1065_vm1, %v6498_v12  ;;  %v6478_v23 = vmul.f32 %v11992_v28, %v6456_v37  ;;  %9162 = vrsqrt.f32 %v6431_v50  ;;  %v6417_v51 = vmul.f32 0.03125, %v6399_v32 }
 0xc38   : > { %v9153_v42 = vpop.eup %9152  ;;  %6515 = vst.msk [vmem:[%s12331_s11 + $0x20] sm:$0xff] %vm1065_vm1, %v6499_v22  ;;  %v6479_v19 = vmul.f32 %v11992_v28, %v6457_v59  ;;  %v6432_v6 = vadd.f32 1e-05, %v6416_v31 }
 0xc39   : > { %v9155_v11 = vpop.eup %9154  ;;  %v6500_v57 = vadd.f32 %v11998_v38, %v6478_v23  ;;  %v6458_v27 = vmul.f32 %v9153_v42, %v11931_v21  ;;  %v6433_v30 = vadd.f32 1e-05, %v6417_v51  ;;  %v6402_v34 = vpop.xlane.xlu1 %6401 }
 0xc3a   : > { %v6501_v41 = vadd.f32 %v11998_v38, %v6479_v19  ;;  %v6459_v40 = vmul.f32 %v9155_v11, %v11940_v4  ;;  %9164 = vrsqrt.f32 %v6432_v6  ;;  %v6418_v24 = vmul.f32 0.03125, %v6402_v34 }
 0xc3b   : > { %6516 = vst.msk [vmem:[%s12331_s11 + $0x28] sm:$0xff] %vm1065_vm1, %v6500_v57  ;;  %v6480_v2 = vmul.f32 %v11992_v28, %v6458_v27  ;;  %9166 = vrsqrt.f32 %v6433_v30 }
 0xc3c   : > { %v9157_v15 = vpop.eup %9156  ;;  %6517 = vst.msk [vmem:[%s12331_s11 + $0x30] sm:$0xff] %vm1065_vm1, %v6501_v41  ;;  %v6481_v21 = vmul.f32 %v11992_v28, %v6459_v40  ;;  %v6434_v55 = vadd.f32 1e-05, %v6418_v24 }
 0xc3d   : > { %v9159_v4 = vpop.eup %9158  ;;  %v6502_v43 = vadd.f32 %v11998_v38, %v6480_v2  ;;  %v6460_v39 = vmul.f32 %v9157_v15, %v11943_v56 }
 0xc3e   : > { %v6503_v5 = vadd.f32 %v11998_v38, %v6481_v21  ;;  %v6461_v46 = vmul.f32 %v9159_v4, %v11952_v63  ;;  %9168 = vrsqrt.f32 %v6434_v55 }
 0xc3f   : > { %6518 = vst.msk [vmem:[%s12331_s11 + $0x38] sm:$0xff] %vm1065_vm1, %v6502_v43  ;;  %v6482_v53 = vmul.f32 %v11992_v28, %v6460_v39 }
 0xc40   : > { %v9161_v36 = vpop.eup %9160  ;;  %6519 = vst.msk [vmem:[%s12331_s11 + $0x40] sm:$0xff] %vm1065_vm1, %v6503_v5  ;;  %v6483_v56 = vmul.f32 %v11992_v28, %v6461_v46 }
 0xc41   : > { %v9163_v3 = vpop.eup %9162  ;;  %v6504_v52 = vadd.f32 %v11998_v38, %v6482_v53  ;;  %v6462_v63 = vmul.f32 %v9161_v36, %v11955_v14 }
 0xc42   : > { %v6505_v44 = vadd.f32 %v11998_v38, %v6483_v56  ;;  %v6463_v26 = vmul.f32 %v9163_v3, %v11964_v62 }
 0xc43   : > { %6520 = vst.msk [vmem:[%s12331_s11 + $0x48] sm:$0xff] %vm1065_vm1, %v6504_v52  ;;  %v6484_v35 = vmul.f32 %v11992_v28, %v6462_v63 }
 0xc44   : > { %v9165_v25 = vpop.eup %9164  ;;  %6521 = vst.msk [vmem:[%s12331_s11 + $0x50] sm:$0xff] %vm1065_vm1, %v6505_v44  ;;  %v6485_v45 = vmul.f32 %v11992_v28, %v6463_v26 }
 0xc45   : > { %v9167_v14 = vpop.eup %9166  ;;  %v6506_v58 = vadd.f32 %v11998_v38, %v6484_v35  ;;  %v6464_v62 = vmul.f32 %v9165_v25, %v11967_v1 }
 0xc46   : > { %v6507_v0 = vadd.f32 %v11998_v38, %v6485_v45  ;;  %v6465_v33 = vmul.f32 %v9167_v14, %v11976_v49 }
 0xc47   : > { %6522 = vst.msk [vmem:[%s12331_s11 + $0x58] sm:$0xff] %vm1065_vm1, %v6506_v58  ;;  %v6486_v47 = vmul.f32 %v11992_v28, %v6464_v62 }
 0xc48   : > { %v9169_v54 = vpop.eup %9168  ;;  %6523 = vst.msk [vmem:[%s12331_s11 + $0x60] sm:$0xff] %vm1065_vm1, %v6507_v0  ;;  %v6487_v17 = vmul.f32 %v11992_v28, %v6465_v33 }
 0xc49   : > { %v6508_v1 = vadd.f32 %v11998_v38, %v6486_v47  ;;  %v6466_v29 = vmul.f32 %v9169_v54, %v11979_v9 }
 0xc4a   : > { %v6509_v49 = vadd.f32 %v11998_v38, %v6487_v17 }
 0xc4b   : > { %6524 = vst.msk [vmem:[%s12331_s11 + $0x68] sm:$0xff] %vm1065_vm1, %v6508_v1  ;;  %v6488_v60 = vmul.f32 %v11992_v28, %v6466_v29 }
 0xc4c   : > { %6525 = vst.msk [vmem:[%s12331_s11 + $0x70] sm:$0xff] %vm1065_vm1, %v6509_v49 }
 0xc4d   : > { %v6510_v61 = vadd.f32 %v11998_v38, %v6488_v60 }
 0xc4f   : > { %6526 = vst.msk [vmem:[%s12331_s11 + $0x78] sm:$0xff] %vm1065_vm1, %v6510_v61 }
 0xc50 PF: > { %s12332_s2 = sld [smem:[#allocation5_spill]]  ;;  %s12334_s25 = sld [smem:[#allocation6_spill]] }
 0xc56   : > { %s31_s26 = sadd.s32 1, %s12332_s2   ;;  %s12333_s2 = sld [smem:[#allocation4_spill]] }
 0xc57   : > { %p28_p7 = scmp.ge.s32.totalorder %s31_s26, 4  }
 0xc59   :  { %30 = sbr.rel (!%p28_p7) target bundleno = 14 (0xe), region = 193 }

</bundles_post_ra>
